<compile_context>
chip_gen: v6e
topology: v6e:2x2x1
jax: 0.10.0
libtpu: 0.0.40
codegen_flags: <defaults>
</compile_context>

<pallas_src>
import math

import jax
import jax.numpy as jnp
from jax.experimental import pallas as pl
from jax.experimental.pallas import tpu as pltpu  # noqa: F401  (TPU backend namespace)

# ------------------------- configuration (small) -------------------------
BATCH = 2
CHANNELS = 4
IMAGE_SIZE = 16
PATCH_SIZE = 4
NUM_PATCHES = (IMAGE_SIZE // PATCH_SIZE) ** 2          # 16
MAX_SEQ = NUM_PATCHES + 1                              # 17
# dim_model chosen == patch_size^2 * channels so that the reference
# nn.Linear(patch_size^2*channels, dim_model) is shape-consistent.
DIM_MODEL = PATCH_SIZE * PATCH_SIZE * CHANNELS         # 64
NUM_HEADS = 4
DIM_HEAD = DIM_MODEL // NUM_HEADS                      # 16
DIM_MLP = 128
NUM_LAYERS = 2
LN_EPS = 1e-5
INV_DOT_SCALE = 1.0 / math.sqrt(DIM_HEAD)              # 1 / torch.sqrt(dim_head)
INV_SQRT2 = 1.0 / math.sqrt(2.0)
TOKENS = BATCH * NUM_PATCHES                           # 32
CPP = CHANNELS * PATCH_SIZE * PATCH_SIZE               # 64 (patch vector length)

# bf16 operands for the MXU (f32 accumulate).  Elementwise math is always f32.
MATMUL_DTYPE = jnp.bfloat16

# ----------------------- packed-slab row layout -----------------------------
SLAB_W = 3 * DIM_MODEL                                 # 192 lanes (widest block)

# bf16 weight slab (rows):
W_EMB_ROW = 0                                          # [CPP, D]  fused conv+patch linear
W_LAYER_BASE = CPP                                     # 64
W_LAYER_STRIDE = 3 * DIM_MODEL + DIM_MLP               # 320
W_OFF_QKV = 0                                          # [D, 3D]
W_OFF_O = DIM_MODEL                                    # [D, D]
W_OFF_1 = 2 * DIM_MODEL                                # [D, MLP]
W_OFF_2 = 3 * DIM_MODEL                                # [MLP, D]
W_SLAB_ROWS = W_LAYER_BASE + NUM_LAYERS * W_LAYER_STRIDE   # 704

# f32 bias / LayerNorm-affine slab (rows, each a [1, <=192] vector):
V_BEMB = 0
V_ELN1_G = 1
V_ELN1_B = 2                                           # pos-emb folded in here
V_LAYER_BASE = 3
V_LAYER_STRIDE = 8
V_OFF_LN1_G, V_OFF_LN1_B, V_OFF_BQKV, V_OFF_BO = 0, 1, 2, 3
V_OFF_LN2_G, V_OFF_LN2_B, V_OFF_B1, V_OFF_B2 = 4, 5, 6, 7
V_FLN_G = V_LAYER_BASE + NUM_LAYERS * V_LAYER_STRIDE   # 19
V_FLN_B = V_FLN_G + 1                                  # 20
V_SLAB_ROWS = V_FLN_B + 1                              # 21


# ------------------------------ kernel -------------------------------------
def _erf(x):
    # Abramowitz & Stegun 7.1.26 (exp / mul / where only -> lowers on TPU VPU/EUP).
    a1, a2, a3, a4, a5 = 0.254829592, -0.284496736, 1.421413741, -1.453152027, 1.061405429
    p = 0.3275911
    sgn = jnp.where(x < 0.0, -1.0, 1.0)
    ax = jnp.abs(x)
    t = 1.0 / (1.0 + p * ax)
    poly = ((((a5 * t + a4) * t + a3) * t + a2) * t + a1) * t
    return sgn * (1.0 - poly * jnp.exp(-ax * ax))


def _vit_kernel(patches_ref, w_ref, v_ref, last_ref, hidden_ref):
    D = DIM_MODEL

    def vec(row, n=DIM_MODEL):
        # static [1, n] view out of the f32 bias/LN slab
        return v_ref[row:row + 1, 0:n]

    def layernorm(x, g_row, b_row):
        # single-pass E[x], E[x^2]; biased variance (matches torch.nn.LayerNorm)
        mean = jnp.mean(x, axis=-1, keepdims=True)
        var = jnp.mean(x * x, axis=-1, keepdims=True) - mean * mean
        return (x - mean) * jax.lax.rsqrt(var + LN_EPS) * vec(g_row) + vec(b_row)

    def matmul(x, row0, kdim, ndim):
        # bf16 MXU operands, f32 accumulate; weight is a static slab slice.
        w = w_ref[row0:row0 + kdim, 0:ndim]
        return jnp.dot(x.astype(MATMUL_DTYPE), w, preferred_element_type=jnp.float32)

    def gelu(x):
        return 0.5 * x * (1.0 + _erf(x * INV_SQRT2))

    # ---------------- Embedding ----------------
    # conv-as-matmul + patch Linear are pre-composed into one weight (wrapper);
    # the constant absolute position embedding is folded into the LN bias.
    x = matmul(patches_ref[...], W_EMB_ROW, CPP, D) + vec(V_BEMB)          # [T, D]
    x = layernorm(x, V_ELN1_G, V_ELN1_B)

    # ---------------- Encoder layers ----------------
    for l in range(NUM_LAYERS):
        wb = W_LAYER_BASE + l * W_LAYER_STRIDE
        vb = V_LAYER_BASE + l * V_LAYER_STRIDE

        ln_x = layernorm(x, vb + V_OFF_LN1_G, vb + V_OFF_LN1_B)

        # fused QKV projection [T, D] @ [D, 3D]; 1/sqrt(dim_head) already folded
        # into the Q weight columns; single bf16 cast of the whole qkv tensor.
        qkv = (matmul(ln_x, wb + W_OFF_QKV, D, 3 * D) + vec(vb + V_OFF_BQKV, 3 * D)
               ).astype(MATMUL_DTYPE)                                       # [T, 3D]
        q = qkv[:, 0:D].reshape(BATCH, NUM_PATCHES, D)
        k = qkv[:, D:2 * D].reshape(BATCH, NUM_PATCHES, D)
        v = qkv[:, 2 * D:3 * D].reshape(BATCH, NUM_PATCHES, D)

        # TODO(synk): a single 'bqhd,bkhd->bhqk' einsum (2 batch dims) would
        # remove this static head loop + concatenate, but Mosaic lowering of
        # multi-batch-dim dot_general / 5-D transposes is not guaranteed, so we
        # keep the proven single-batch-dim einsum form.
        heads = []
        for h in range(NUM_HEADS):
            lo, hi = h * DIM_HEAD, (h + 1) * DIM_HEAD
            s = jnp.einsum('bqd,bkd->bqk', q[:, :, lo:hi], k[:, :, lo:hi],
                           preferred_element_type=jnp.float32)             # [B, S, S]
            s = s - jnp.max(s, axis=-1, keepdims=True)
            p = jnp.exp(s)
            p = p * pl.reciprocal(jnp.sum(p, axis=-1, keepdims=True), approx=True)
            heads.append(jnp.einsum('bqk,bkd->bqd', p.astype(MATMUL_DTYPE),
                                    v[:, :, lo:hi],
                                    preferred_element_type=jnp.float32))    # [B, S, Dh]
        attn = jnp.concatenate(heads, axis=-1).reshape(TOKENS, D)           # [T, D]

        attn_out = matmul(attn, wb + W_OFF_O, D, D) + vec(vb + V_OFF_BO)
        residual = attn_out + x                     # dropout == identity (eval)

        ln2 = layernorm(residual, vb + V_OFF_LN2_G, vb + V_OFF_LN2_B)
        hmid = gelu(matmul(ln2, wb + W_OFF_1, D, DIM_MLP)
                    + vec(vb + V_OFF_B1, DIM_MLP))                          # [T, MLP]
        x = matmul(hmid, wb + W_OFF_2, DIM_MLP, D) + vec(vb + V_OFF_B2) + residual

        hidden_ref[l] = x.astype(hidden_ref.dtype)                          # pre-final-LN

    last_ref[...] = layernorm(x, V_FLN_G, V_FLN_B).astype(last_ref.dtype)


# ----------------------------- model glue ----------------------------------
def _layernorm_f32(x, g, b):
    mean = jnp.mean(x, axis=-1, keepdims=True)
    var = jnp.mean(jnp.square(x - mean), axis=-1, keepdims=True)
    return (x - mean) * jax.lax.rsqrt(var + LN_EPS) * g + b


def _pad_cols(a, width=SLAB_W):
    return jnp.pad(a, ((0, 0), (0, width - a.shape[1])))


def vit_forward(params, inputs):
    B, C, H, W = inputs.shape
    P, D = PATCH_SIZE, DIM_MODEL
    nh, nw = H // P, W // P
    N = nh * nw
    f32 = jnp.float32

    # --- Embedding.image_slicer : Conv2d(C, D, P, stride=P) as patch extract ---
    patches = (inputs.reshape(B, C, nh, P, nw, P)
                     .transpose(0, 2, 4, 1, 3, 5)        # [B, nh, nw, C, P, P]
                     .reshape(B * N, C * P * P)).astype(MATMUL_DTYPE)
    # TODO(synk): reference feeds the un-flattened 4-D conv output into nn.Linear /
    # LayerNorm (shape-inconsistent); we apply the intended patch flatten first.

    # ---- wrapper-side constant folds (tiny, f32, one-time) ----
    conv_w_flat = params["conv_w"].reshape(D, C * P * P).T.astype(f32)   # [CPP, D]
    w_emb = conv_w_flat @ params["patch_w"]                               # conv∘patch linear
    b_emb = params["conv_b"] @ params["patch_w"] + params["patch_b"]      # [D]

    # Absolute position embedding: one constant [1, D] vector -> fold into LN bias.
    # TODO(synk): reference passes int64 arange into nn.Linear and adds the result
    # with an ill-formed broadcast; we use the intended semantics (same vector
    # added to every token of every batch element).
    pos_ids = jnp.arange(MAX_SEQ, dtype=f32).reshape(1, MAX_SEQ)
    ape = pos_ids @ params["pos_w"] + params["pos_b"]                     # [1, D]
    ape = _layernorm_f32(ape, params["emb_ln2_g"], params["emb_ln2_b"])
    eln1_b_eff = params["emb_ln1_b"] + ape.reshape(-1)                    # [D]

    # ---- pack all operands into 2 slabs (3 input DMAs total) ----
    w_blocks = [_pad_cols(w_emb)]
    v_rows = [b_emb, params["emb_ln1_g"], eln1_b_eff]
    for lp in params["layers"]:
        wqkv = jnp.concatenate([lp["wq"] * INV_DOT_SCALE, lp["wk"], lp["wv"]], axis=1)
        bqkv = jnp.concatenate([lp["bq"] * INV_DOT_SCALE, lp["bk"], lp["bv"]])
        w_blocks += [_pad_cols(wqkv), _pad_cols(lp["wo"]),
                     _pad_cols(lp["w1"]), _pad_cols(lp["w2"])]
        v_rows += [lp["ln1_g"], lp["ln1_b"], bqkv, lp["bo"],
                   lp["ln2_g"], lp["ln2_b"], lp["b1"], lp["b2"]]
    v_rows += [params["final_ln_g"], params["final_ln_b"]]

    w_slab = jnp.concatenate(w_blocks, axis=0).astype(MATMUL_DTYPE)   # [704, 192] bf16
    v_slab = jnp.concatenate(
        [_pad_cols(r.reshape(1, -1).astype(f32)) for r in v_rows], axis=0)  # [21, 192] f32
    assert w_slab.shape == (W_SLAB_ROWS, SLAB_W)
    assert v_slab.shape == (V_SLAB_ROWS, SLAB_W)

    # Single fully-fused kernel: no grid, every operand is one VMEM-resident block.
    last, hidden = pl.pallas_call(
        _vit_kernel,
        out_shape=(
            jax.ShapeDtypeStruct((B * N, D), jnp.float32),
            jax.ShapeDtypeStruct((NUM_LAYERS, B * N, D), jnp.float32),
        ),
    )(patches, w_slab, v_slab)

    last_hidden_state = last.reshape(B, N, D)
    hidden_states = hidden.reshape(NUM_LAYERS, B, N, D)   # pre-final-LN layer outputs
    return last_hidden_state, hidden_states


# ------------------------- deterministic init -------------------------------
def init_params(key):
    ks = iter(jax.random.split(key, 8 + 8 * NUM_LAYERS))

    def nrm(shape):
        return jax.random.normal(next(ks), shape, jnp.float32) * 0.02

    D, C, P = DIM_MODEL, CHANNELS, PATCH_SIZE
    ones = lambda n: jnp.ones((n,), jnp.float32)
    zeros = lambda n: jnp.zeros((n,), jnp.float32)

    params = {
        "conv_w": nrm((D, C, P, P)), "conv_b": zeros(D),
        "patch_w": nrm((P * P * C, D)), "patch_b": zeros(D),
        "pos_w": nrm((MAX_SEQ, D)), "pos_b": zeros(D),
        "emb_ln1_g": ones(D), "emb_ln1_b": zeros(D),
        "emb_ln2_g": ones(D), "emb_ln2_b": zeros(D),
        "final_ln_g": ones(D), "final_ln_b": zeros(D),
        "layers": [],
    }
    for _ in range(NUM_LAYERS):
        params["layers"].append({
            "ln1_g": ones(D), "ln1_b": zeros(D),
            "wq": nrm((D, D)), "bq": zeros(D),
            "wk": nrm((D, D)), "bk": zeros(D),
            "wv": nrm((D, D)), "bv": zeros(D),
            "wo": nrm((D, D)), "bo": zeros(D),
            "ln2_g": ones(D), "ln2_b": zeros(D),
            "w1": nrm((D, DIM_MLP)), "b1": zeros(DIM_MLP),
            "w2": nrm((DIM_MLP, D)), "b2": zeros(D),
        })
    return params


if __name__ == "__main__":
    key = jax.random.PRNGKey(0)
    pkey, xkey = jax.random.split(key)
    params = init_params(pkey)
    x = jax.random.normal(xkey, (BATCH, CHANNELS, IMAGE_SIZE, IMAGE_SIZE), jnp.float32)

    last_hidden_state, hidden_states = jax.jit(vit_forward)(params, x)
    jax.block_until_ready((last_hidden_state, hidden_states))

    assert last_hidden_state.shape == (BATCH, NUM_PATCHES, DIM_MODEL)
    assert hidden_states.shape == (NUM_LAYERS, BATCH, NUM_PATCHES, DIM_MODEL)
    assert jnp.isfinite(last_hidden_state).all() and jnp.isfinite(hidden_states).all()
    print("KERNEL_OK")
</pallas_src>

<mosaic_0001>
module attributes {stable_mosaic.version = 11 : i64} {
  func.func @_vit_kernel(%arg0: memref<32x64xbf16, #tpu.memory_space<vmem>>, %arg1: memref<704x192xbf16, #tpu.memory_space<vmem>>, %arg2: memref<21x192xf32, #tpu.memory_space<vmem>>, %arg3: memref<32x64xf32, #tpu.memory_space<vmem>>, %arg4: memref<2x32x64xf32, #tpu.memory_space<vmem>>) attributes {dimension_semantics = [], scalar_prefetch = 0 : i64, scratch_operands = 0 : i64, tpu.core_type = #tpu.core_type<tc>} {
    %c0 = arith.constant 0 : index
    %c0_0 = arith.constant 0 : index
    %0 = vector.load %arg0[%c0, %c0_0] : memref<32x64xbf16, #tpu.memory_space<vmem>>, vector<32x64xbf16>
    %c0_1 = arith.constant 0 : index
    %c0_2 = arith.constant 0 : index
    %1 = vector.load %arg1[%c0_1, %c0_2] : memref<704x192xbf16, #tpu.memory_space<vmem>>, vector<64x64xbf16>
    %cst = arith.constant dense<0.000000e+00> : vector<32x64xf32>
    %2 = tpu.matmul %0, %1, %cst {dimension_numbers = #tpu.dot_dimension_numbers<[1], [0], [0], [1], [0, 0, 1, 1], [], []>} : vector<32x64xbf16>, vector<64x64xbf16>, vector<32x64xf32> -> vector<32x64xf32>
    %c0_3 = arith.constant 0 : index
    %c0_4 = arith.constant 0 : index
    %3 = vector.load %arg2[%c0_3, %c0_4] : memref<21x192xf32, #tpu.memory_space<vmem>>, vector<1x64xf32>
    %4 = vector.broadcast %3 : vector<1x64xf32> to vector<32x64xf32>
    %5 = arith.addf %2, %4 : vector<32x64xf32>
    %cst_5 = arith.constant dense<0.000000e+00> : vector<32xf32>
    %6 = vector.multi_reduction <add>, %5, %cst_5 [1] : vector<32x64xf32> to vector<32xf32>
    %7 = vector.shape_cast %6 : vector<32xf32> to vector<32x1xf32>
    %cst_6 = arith.constant 6.400000e+01 : f32
    %8 = vector.broadcast %cst_6 : f32 to vector<32x1xf32>
    %9 = arith.divf %7, %8 : vector<32x1xf32>
    %10 = arith.mulf %5, %5 : vector<32x64xf32>
    %cst_7 = arith.constant dense<0.000000e+00> : vector<32xf32>
    %11 = vector.multi_reduction <add>, %10, %cst_7 [1] : vector<32x64xf32> to vector<32xf32>
    %12 = vector.shape_cast %11 : vector<32xf32> to vector<32x1xf32>
    %cst_8 = arith.constant 6.400000e+01 : f32
    %13 = vector.broadcast %cst_8 : f32 to vector<32x1xf32>
    %14 = arith.divf %12, %13 : vector<32x1xf32>
    %15 = arith.mulf %9, %9 : vector<32x1xf32>
    %16 = arith.subf %14, %15 : vector<32x1xf32>
    %17 = vector.broadcast %9 : vector<32x1xf32> to vector<32x64xf32>
    %18 = arith.subf %5, %17 : vector<32x64xf32>
    %cst_9 = arith.constant 9.99999974E-6 : f32
    %19 = vector.broadcast %cst_9 : f32 to vector<32x1xf32>
    %20 = arith.addf %16, %19 : vector<32x1xf32>
    %21 = math.rsqrt %20 : vector<32x1xf32>
    %22 = vector.broadcast %21 : vector<32x1xf32> to vector<32x64xf32>
    %23 = arith.mulf %18, %22 : vector<32x64xf32>
    %c1 = arith.constant 1 : index
    %c0_10 = arith.constant 0 : index
    %24 = vector.load %arg2[%c1, %c0_10] : memref<21x192xf32, #tpu.memory_space<vmem>>, vector<1x64xf32>
    %25 = vector.broadcast %24 : vector<1x64xf32> to vector<32x64xf32>
    %26 = arith.mulf %23, %25 : vector<32x64xf32>
    %c2 = arith.constant 2 : index
    %c0_11 = arith.constant 0 : index
    %27 = vector.load %arg2[%c2, %c0_11] : memref<21x192xf32, #tpu.memory_space<vmem>>, vector<1x64xf32>
    %28 = vector.broadcast %27 : vector<1x64xf32> to vector<32x64xf32>
    %29 = arith.addf %26, %28 : vector<32x64xf32>
    %cst_12 = arith.constant dense<0.000000e+00> : vector<32xf32>
    %30 = vector.multi_reduction <add>, %29, %cst_12 [1] : vector<32x64xf32> to vector<32xf32>
    %31 = vector.shape_cast %30 : vector<32xf32> to vector<32x1xf32>
    %cst_13 = arith.constant 6.400000e+01 : f32
    %32 = vector.broadcast %cst_13 : f32 to vector<32x1xf32>
    %33 = arith.divf %31, %32 : vector<32x1xf32>
    %34 = arith.mulf %29, %29 : vector<32x64xf32>
    %cst_14 = arith.constant dense<0.000000e+00> : vector<32xf32>
    %35 = vector.multi_reduction <add>, %34, %cst_14 [1] : vector<32x64xf32> to vector<32xf32>
    %36 = vector.shape_cast %35 : vector<32xf32> to vector<32x1xf32>
    %cst_15 = arith.constant 6.400000e+01 : f32
    %37 = vector.broadcast %cst_15 : f32 to vector<32x1xf32>
    %38 = arith.divf %36, %37 : vector<32x1xf32>
    %39 = arith.mulf %33, %33 : vector<32x1xf32>
    %40 = arith.subf %38, %39 : vector<32x1xf32>
    %41 = vector.broadcast %33 : vector<32x1xf32> to vector<32x64xf32>
    %42 = arith.subf %29, %41 : vector<32x64xf32>
    %cst_16 = arith.constant 9.99999974E-6 : f32
    %43 = vector.broadcast %cst_16 : f32 to vector<32x1xf32>
    %44 = arith.addf %40, %43 : vector<32x1xf32>
    %45 = math.rsqrt %44 : vector<32x1xf32>
    %46 = vector.broadcast %45 : vector<32x1xf32> to vector<32x64xf32>
    %47 = arith.mulf %42, %46 : vector<32x64xf32>
    %c3 = arith.constant 3 : index
    %c0_17 = arith.constant 0 : index
    %48 = vector.load %arg2[%c3, %c0_17] : memref<21x192xf32, #tpu.memory_space<vmem>>, vector<1x64xf32>
    %49 = vector.broadcast %48 : vector<1x64xf32> to vector<32x64xf32>
    %50 = arith.mulf %47, %49 : vector<32x64xf32>
    %c4 = arith.constant 4 : index
    %c0_18 = arith.constant 0 : index
    %51 = vector.load %arg2[%c4, %c0_18] : memref<21x192xf32, #tpu.memory_space<vmem>>, vector<1x64xf32>
    %52 = vector.broadcast %51 : vector<1x64xf32> to vector<32x64xf32>
    %53 = arith.addf %50, %52 : vector<32x64xf32>
    %c64 = arith.constant 64 : index
    %c0_19 = arith.constant 0 : index
    %54 = vector.load %arg1[%c64, %c0_19] : memref<704x192xbf16, #tpu.memory_space<vmem>>, vector<64x192xbf16>
    %55 = arith.truncf %53 : vector<32x64xf32> to vector<32x64xbf16>
    %cst_20 = arith.constant dense<0.000000e+00> : vector<32x192xf32>
    %56 = tpu.matmul %55, %54, %cst_20 {dimension_numbers = #tpu.dot_dimension_numbers<[1], [0], [0], [1], [0, 0, 1, 1], [], []>} : vector<32x64xbf16>, vector<64x192xbf16>, vector<32x192xf32> -> vector<32x192xf32>
    %c5 = arith.constant 5 : index
    %c0_21 = arith.constant 0 : index
    %57 = vector.load %arg2[%c5, %c0_21] : memref<21x192xf32, #tpu.memory_space<vmem>>, vector<1x192xf32>
    %58 = vector.broadcast %57 : vector<1x192xf32> to vector<32x192xf32>
    %59 = arith.addf %56, %58 : vector<32x192xf32>
    %60 = arith.truncf %59 : vector<32x192xf32> to vector<32x192xbf16>
    %61 = vector.extract_strided_slice %60 {offsets = [0, 0], sizes = [32, 64], strides = [1, 1]} : vector<32x192xbf16> to vector<32x64xbf16>
    %62 = vector.shape_cast %61 : vector<32x64xbf16> to vector<2x16x64xbf16>
    %63 = vector.extract_strided_slice %60 {offsets = [0, 64], sizes = [32, 64], strides = [1, 1]} : vector<32x192xbf16> to vector<32x64xbf16>
    %64 = vector.shape_cast %63 : vector<32x64xbf16> to vector<2x16x64xbf16>
    %65 = vector.extract_strided_slice %60 {offsets = [0, 128], sizes = [32, 64], strides = [1, 1]} : vector<32x192xbf16> to vector<32x64xbf16>
    %66 = vector.shape_cast %65 : vector<32x64xbf16> to vector<2x16x64xbf16>
    %67 = vector.extract_strided_slice %62 {offsets = [0, 0, 0], sizes = [2, 16, 16], strides = [1, 1, 1]} : vector<2x16x64xbf16> to vector<2x16x16xbf16>
    %68 = vector.extract_strided_slice %64 {offsets = [0, 0, 0], sizes = [2, 16, 16], strides = [1, 1, 1]} : vector<2x16x64xbf16> to vector<2x16x16xbf16>
    "tpu.trace_start"() <{level = 10 : i32, message = "bqd,bkd->bqk"}> : () -> ()
    %cst_22 = arith.constant dense<0.000000e+00> : vector<2x16x16xf32>
    %69 = tpu.matmul %67, %68, %cst_22 {dimension_numbers = #tpu.dot_dimension_numbers<[2], [2], [1], [1], [0, 0, 0, 1, 1, 1], [0], [0]>} : vector<2x16x16xbf16>, vector<2x16x16xbf16>, vector<2x16x16xf32> -> vector<2x16x16xf32>
    "tpu.trace_stop"() : () -> ()
    %cst_23 = arith.constant dense<0xFF800000> : vector<2x16xf32>
    %70 = vector.multi_reduction <maximumf>, %69, %cst_23 [2] : vector<2x16x16xf32> to vector<2x16xf32>
    %71 = vector.shape_cast %70 : vector<2x16xf32> to vector<2x16x1xf32>
    %72 = vector.broadcast %71 : vector<2x16x1xf32> to vector<2x16x16xf32>
    %73 = arith.subf %69, %72 : vector<2x16x16xf32>
    %74 = math.exp %73 : vector<2x16x16xf32>
    %cst_24 = arith.constant dense<0.000000e+00> : vector<2x16xf32>
    %75 = vector.multi_reduction <add>, %74, %cst_24 [2] : vector<2x16x16xf32> to vector<2x16xf32>
    %76 = vector.shape_cast %75 : vector<2x16xf32> to vector<2x16x1xf32>
    %77 = tpu.reciprocal %76 {approx = true} : vector<2x16x1xf32> -> vector<2x16x1xf32>
    %78 = vector.broadcast %77 : vector<2x16x1xf32> to vector<2x16x16xf32>
    %79 = arith.mulf %74, %78 : vector<2x16x16xf32>
    %80 = arith.truncf %79 : vector<2x16x16xf32> to vector<2x16x16xbf16>
    %81 = vector.extract_strided_slice %66 {offsets = [0, 0, 0], sizes = [2, 16, 16], strides = [1, 1, 1]} : vector<2x16x64xbf16> to vector<2x16x16xbf16>
    "tpu.trace_start"() <{level = 10 : i32, message = "bqk,bkd->bqd"}> : () -> ()
    %cst_25 = arith.constant dense<0.000000e+00> : vector<2x16x16xf32>
    %82 = tpu.matmul %80, %81, %cst_25 {dimension_numbers = #tpu.dot_dimension_numbers<[2], [1], [1], [2], [0, 0, 0, 1, 1, 2], [0], [0]>} : vector<2x16x16xbf16>, vector<2x16x16xbf16>, vector<2x16x16xf32> -> vector<2x16x16xf32>
    "tpu.trace_stop"() : () -> ()
    %83 = vector.extract_strided_slice %62 {offsets = [0, 0, 16], sizes = [2, 16, 16], strides = [1, 1, 1]} : vector<2x16x64xbf16> to vector<2x16x16xbf16>
    %84 = vector.extract_strided_slice %64 {offsets = [0, 0, 16], sizes = [2, 16, 16], strides = [1, 1, 1]} : vector<2x16x64xbf16> to vector<2x16x16xbf16>
    "tpu.trace_start"() <{level = 10 : i32, message = "bqd,bkd->bqk"}> : () -> ()
    %cst_26 = arith.constant dense<0.000000e+00> : vector<2x16x16xf32>
    %85 = tpu.matmul %83, %84, %cst_26 {dimension_numbers = #tpu.dot_dimension_numbers<[2], [2], [1], [1], [0, 0, 0, 1, 1, 1], [0], [0]>} : vector<2x16x16xbf16>, vector<2x16x16xbf16>, vector<2x16x16xf32> -> vector<2x16x16xf32>
    "tpu.trace_stop"() : () -> ()
    %cst_27 = arith.constant dense<0xFF800000> : vector<2x16xf32>
    %86 = vector.multi_reduction <maximumf>, %85, %cst_27 [2] : vector<2x16x16xf32> to vector<2x16xf32>
    %87 = vector.shape_cast %86 : vector<2x16xf32> to vector<2x16x1xf32>
    %88 = vector.broadcast %87 : vector<2x16x1xf32> to vector<2x16x16xf32>
    %89 = arith.subf %85, %88 : vector<2x16x16xf32>
    %90 = math.exp %89 : vector<2x16x16xf32>
    %cst_28 = arith.constant dense<0.000000e+00> : vector<2x16xf32>
    %91 = vector.multi_reduction <add>, %90, %cst_28 [2] : vector<2x16x16xf32> to vector<2x16xf32>
    %92 = vector.shape_cast %91 : vector<2x16xf32> to vector<2x16x1xf32>
    %93 = tpu.reciprocal %92 {approx = true} : vector<2x16x1xf32> -> vector<2x16x1xf32>
    %94 = vector.broadcast %93 : vector<2x16x1xf32> to vector<2x16x16xf32>
    %95 = arith.mulf %90, %94 : vector<2x16x16xf32>
    %96 = arith.truncf %95 : vector<2x16x16xf32> to vector<2x16x16xbf16>
    %97 = vector.extract_strided_slice %66 {offsets = [0, 0, 16], sizes = [2, 16, 16], strides = [1, 1, 1]} : vector<2x16x64xbf16> to vector<2x16x16xbf16>
    "tpu.trace_start"() <{level = 10 : i32, message = "bqk,bkd->bqd"}> : () -> ()
    %cst_29 = arith.constant dense<0.000000e+00> : vector<2x16x16xf32>
    %98 = tpu.matmul %96, %97, %cst_29 {dimension_numbers = #tpu.dot_dimension_numbers<[2], [1], [1], [2], [0, 0, 0, 1, 1, 2], [0], [0]>} : vector<2x16x16xbf16>, vector<2x16x16xbf16>, vector<2x16x16xf32> -> vector<2x16x16xf32>
    "tpu.trace_stop"() : () -> ()
    %99 = vector.extract_strided_slice %62 {offsets = [0, 0, 32], sizes = [2, 16, 16], strides = [1, 1, 1]} : vector<2x16x64xbf16> to vector<2x16x16xbf16>
    %100 = vector.extract_strided_slice %64 {offsets = [0, 0, 32], sizes = [2, 16, 16], strides = [1, 1, 1]} : vector<2x16x64xbf16> to vector<2x16x16xbf16>
    "tpu.trace_start"() <{level = 10 : i32, message = "bqd,bkd->bqk"}> : () -> ()
    %cst_30 = arith.constant dense<0.000000e+00> : vector<2x16x16xf32>
    %101 = tpu.matmul %99, %100, %cst_30 {dimension_numbers = #tpu.dot_dimension_numbers<[2], [2], [1], [1], [0, 0, 0, 1, 1, 1], [0], [0]>} : vector<2x16x16xbf16>, vector<2x16x16xbf16>, vector<2x16x16xf32> -> vector<2x16x16xf32>
    "tpu.trace_stop"() : () -> ()
    %cst_31 = arith.constant dense<0xFF800000> : vector<2x16xf32>
    %102 = vector.multi_reduction <maximumf>, %101, %cst_31 [2] : vector<2x16x16xf32> to vector<2x16xf32>
    %103 = vector.shape_cast %102 : vector<2x16xf32> to vector<2x16x1xf32>
    %104 = vector.broadcast %103 : vector<2x16x1xf32> to vector<2x16x16xf32>
    %105 = arith.subf %101, %104 : vector<2x16x16xf32>
    %106 = math.exp %105 : vector<2x16x16xf32>
    %cst_32 = arith.constant dense<0.000000e+00> : vector<2x16xf32>
    %107 = vector.multi_reduction <add>, %106, %cst_32 [2] : vector<2x16x16xf32> to vector<2x16xf32>
    %108 = vector.shape_cast %107 : vector<2x16xf32> to vector<2x16x1xf32>
    %109 = tpu.reciprocal %108 {approx = true} : vector<2x16x1xf32> -> vector<2x16x1xf32>
    %110 = vector.broadcast %109 : vector<2x16x1xf32> to vector<2x16x16xf32>
    %111 = arith.mulf %106, %110 : vector<2x16x16xf32>
    %112 = arith.truncf %111 : vector<2x16x16xf32> to vector<2x16x16xbf16>
    %113 = vector.extract_strided_slice %66 {offsets = [0, 0, 32], sizes = [2, 16, 16], strides = [1, 1, 1]} : vector<2x16x64xbf16> to vector<2x16x16xbf16>
    "tpu.trace_start"() <{level = 10 : i32, message = "bqk,bkd->bqd"}> : () -> ()
    %cst_33 = arith.constant dense<0.000000e+00> : vector<2x16x16xf32>
    %114 = tpu.matmul %112, %113, %cst_33 {dimension_numbers = #tpu.dot_dimension_numbers<[2], [1], [1], [2], [0, 0, 0, 1, 1, 2], [0], [0]>} : vector<2x16x16xbf16>, vector<2x16x16xbf16>, vector<2x16x16xf32> -> vector<2x16x16xf32>
    "tpu.trace_stop"() : () -> ()
    %115 = vector.extract_strided_slice %62 {offsets = [0, 0, 48], sizes = [2, 16, 16], strides = [1, 1, 1]} : vector<2x16x64xbf16> to vector<2x16x16xbf16>
    %116 = vector.extract_strided_slice %64 {offsets = [0, 0, 48], sizes = [2, 16, 16], strides = [1, 1, 1]} : vector<2x16x64xbf16> to vector<2x16x16xbf16>
    "tpu.trace_start"() <{level = 10 : i32, message = "bqd,bkd->bqk"}> : () -> ()
    %cst_34 = arith.constant dense<0.000000e+00> : vector<2x16x16xf32>
    %117 = tpu.matmul %115, %116, %cst_34 {dimension_numbers = #tpu.dot_dimension_numbers<[2], [2], [1], [1], [0, 0, 0, 1, 1, 1], [0], [0]>} : vector<2x16x16xbf16>, vector<2x16x16xbf16>, vector<2x16x16xf32> -> vector<2x16x16xf32>
    "tpu.trace_stop"() : () -> ()
    %cst_35 = arith.constant dense<0xFF800000> : vector<2x16xf32>
    %118 = vector.multi_reduction <maximumf>, %117, %cst_35 [2] : vector<2x16x16xf32> to vector<2x16xf32>
    %119 = vector.shape_cast %118 : vector<2x16xf32> to vector<2x16x1xf32>
    %120 = vector.broadcast %119 : vector<2x16x1xf32> to vector<2x16x16xf32>
    %121 = arith.subf %117, %120 : vector<2x16x16xf32>
    %122 = math.exp %121 : vector<2x16x16xf32>
    %cst_36 = arith.constant dense<0.000000e+00> : vector<2x16xf32>
    %123 = vector.multi_reduction <add>, %122, %cst_36 [2] : vector<2x16x16xf32> to vector<2x16xf32>
    %124 = vector.shape_cast %123 : vector<2x16xf32> to vector<2x16x1xf32>
    %125 = tpu.reciprocal %124 {approx = true} : vector<2x16x1xf32> -> vector<2x16x1xf32>
    %126 = vector.broadcast %125 : vector<2x16x1xf32> to vector<2x16x16xf32>
    %127 = arith.mulf %122, %126 : vector<2x16x16xf32>
    %128 = arith.truncf %127 : vector<2x16x16xf32> to vector<2x16x16xbf16>
    %129 = vector.extract_strided_slice %66 {offsets = [0, 0, 48], sizes = [2, 16, 16], strides = [1, 1, 1]} : vector<2x16x64xbf16> to vector<2x16x16xbf16>
    "tpu.trace_start"() <{level = 10 : i32, message = "bqk,bkd->bqd"}> : () -> ()
    %cst_37 = arith.constant dense<0.000000e+00> : vector<2x16x16xf32>
    %130 = tpu.matmul %128, %129, %cst_37 {dimension_numbers = #tpu.dot_dimension_numbers<[2], [1], [1], [2], [0, 0, 0, 1, 1, 2], [0], [0]>} : vector<2x16x16xbf16>, vector<2x16x16xbf16>, vector<2x16x16xf32> -> vector<2x16x16xf32>
    "tpu.trace_stop"() : () -> ()
    %131 = tpu.concatenate %82, %98, %114, %130 in 2 : vector<2x16x16xf32>, vector<2x16x16xf32>, vector<2x16x16xf32>, vector<2x16x16xf32> -> vector<2x16x64xf32>
    %132 = vector.shape_cast %131 : vector<2x16x64xf32> to vector<32x64xf32>
    %c128 = arith.constant 128 : index
    %c0_38 = arith.constant 0 : index
    %133 = vector.load %arg1[%c128, %c0_38] : memref<704x192xbf16, #tpu.memory_space<vmem>>, vector<64x64xbf16>
    %134 = arith.truncf %132 : vector<32x64xf32> to vector<32x64xbf16>
    %cst_39 = arith.constant dense<0.000000e+00> : vector<32x64xf32>
    %135 = tpu.matmul %134, %133, %cst_39 {dimension_numbers = #tpu.dot_dimension_numbers<[1], [0], [0], [1], [0, 0, 1, 1], [], []>} : vector<32x64xbf16>, vector<64x64xbf16>, vector<32x64xf32> -> vector<32x64xf32>
    %c6 = arith.constant 6 : index
    %c0_40 = arith.constant 0 : index
    %136 = vector.load %arg2[%c6, %c0_40] : memref<21x192xf32, #tpu.memory_space<vmem>>, vector<1x64xf32>
    %137 = vector.broadcast %136 : vector<1x64xf32> to vector<32x64xf32>
    %138 = arith.addf %135, %137 : vector<32x64xf32>
    %139 = arith.addf %138, %29 : vector<32x64xf32>
    %cst_41 = arith.constant dense<0.000000e+00> : vector<32xf32>
    %140 = vector.multi_reduction <add>, %139, %cst_41 [1] : vector<32x64xf32> to vector<32xf32>
    %141 = vector.shape_cast %140 : vector<32xf32> to vector<32x1xf32>
    %cst_42 = arith.constant 6.400000e+01 : f32
    %142 = vector.broadcast %cst_42 : f32 to vector<32x1xf32>
    %143 = arith.divf %141, %142 : vector<32x1xf32>
    %144 = arith.mulf %139, %139 : vector<32x64xf32>
    %cst_43 = arith.constant dense<0.000000e+00> : vector<32xf32>
    %145 = vector.multi_reduction <add>, %144, %cst_43 [1] : vector<32x64xf32> to vector<32xf32>
    %146 = vector.shape_cast %145 : vector<32xf32> to vector<32x1xf32>
    %cst_44 = arith.constant 6.400000e+01 : f32
    %147 = vector.broadcast %cst_44 : f32 to vector<32x1xf32>
    %148 = arith.divf %146, %147 : vector<32x1xf32>
    %149 = arith.mulf %143, %143 : vector<32x1xf32>
    %150 = arith.subf %148, %149 : vector<32x1xf32>
    %151 = vector.broadcast %143 : vector<32x1xf32> to vector<32x64xf32>
    %152 = arith.subf %139, %151 : vector<32x64xf32>
    %cst_45 = arith.constant 9.99999974E-6 : f32
    %153 = vector.broadcast %cst_45 : f32 to vector<32x1xf32>
    %154 = arith.addf %150, %153 : vector<32x1xf32>
    %155 = math.rsqrt %154 : vector<32x1xf32>
    %156 = vector.broadcast %155 : vector<32x1xf32> to vector<32x64xf32>
    %157 = arith.mulf %152, %156 : vector<32x64xf32>
    %c7 = arith.constant 7 : index
    %c0_46 = arith.constant 0 : index
    %158 = vector.load %arg2[%c7, %c0_46] : memref<21x192xf32, #tpu.memory_space<vmem>>, vector<1x64xf32>
    %159 = vector.broadcast %158 : vector<1x64xf32> to vector<32x64xf32>
    %160 = arith.mulf %157, %159 : vector<32x64xf32>
    %c8 = arith.constant 8 : index
    %c0_47 = arith.constant 0 : index
    %161 = vector.load %arg2[%c8, %c0_47] : memref<21x192xf32, #tpu.memory_space<vmem>>, vector<1x64xf32>
    %162 = vector.broadcast %161 : vector<1x64xf32> to vector<32x64xf32>
    %163 = arith.addf %160, %162 : vector<32x64xf32>
    %c192 = arith.constant 192 : index
    %c0_48 = arith.constant 0 : index
    %164 = vector.load %arg1[%c192, %c0_48] : memref<704x192xbf16, #tpu.memory_space<vmem>>, vector<64x128xbf16>
    %165 = arith.truncf %163 : vector<32x64xf32> to vector<32x64xbf16>
    %cst_49 = arith.constant dense<0.000000e+00> : vector<32x128xf32>
    %166 = tpu.matmul %165, %164, %cst_49 {dimension_numbers = #tpu.dot_dimension_numbers<[1], [0], [0], [1], [0, 0, 1, 1], [], []>} : vector<32x64xbf16>, vector<64x128xbf16>, vector<32x128xf32> -> vector<32x128xf32>
    %c9 = arith.constant 9 : index
    %c0_50 = arith.constant 0 : index
    %167 = vector.load %arg2[%c9, %c0_50] : memref<21x192xf32, #tpu.memory_space<vmem>>, vector<1x128xf32>
    %168 = vector.broadcast %167 : vector<1x128xf32> to vector<32x128xf32>
    %169 = arith.addf %166, %168 : vector<32x128xf32>
    %cst_51 = arith.constant 5.000000e-01 : f32
    %170 = vector.broadcast %cst_51 : f32 to vector<32x128xf32>
    %171 = arith.mulf %170, %169 : vector<32x128xf32>
    %cst_52 = arith.constant 0.707106769 : f32
    %172 = vector.broadcast %cst_52 : f32 to vector<32x128xf32>
    %173 = arith.mulf %169, %172 : vector<32x128xf32>
    %cst_53 = arith.constant 0.000000e+00 : f32
    %174 = vector.broadcast %cst_53 : f32 to vector<32x128xf32>
    %175 = arith.cmpf olt, %173, %174 : vector<32x128xf32>
    %cst_54 = arith.constant -1.000000e+00 : f32
    %cst_55 = arith.constant 1.000000e+00 : f32
    %176 = vector.broadcast %cst_54 : f32 to vector<32x128xf32>
    %177 = vector.broadcast %cst_55 : f32 to vector<32x128xf32>
    %178 = arith.select %175, %176, %177 : vector<32x128xi1>, vector<32x128xf32>
    %179 = math.absf %173 : vector<32x128xf32>
    %cst_56 = arith.constant 0.327591091 : f32
    %180 = vector.broadcast %cst_56 : f32 to vector<32x128xf32>
    %181 = arith.mulf %180, %179 : vector<32x128xf32>
    %cst_57 = arith.constant 1.000000e+00 : f32
    %182 = vector.broadcast %cst_57 : f32 to vector<32x128xf32>
    %183 = arith.addf %182, %181 : vector<32x128xf32>
    %cst_58 = arith.constant 1.000000e+00 : f32
    %184 = vector.broadcast %cst_58 : f32 to vector<32x128xf32>
    %185 = arith.divf %184, %183 : vector<32x128xf32>
    %cst_59 = arith.constant 1.06140542 : f32
    %186 = vector.broadcast %cst_59 : f32 to vector<32x128xf32>
    %187 = arith.mulf %186, %185 : vector<32x128xf32>
    %cst_60 = arith.constant -1.45315206 : f32
    %188 = vector.broadcast %cst_60 : f32 to vector<32x128xf32>
    %189 = arith.addf %187, %188 : vector<32x128xf32>
    %190 = arith.mulf %189, %185 : vector<32x128xf32>
    %cst_61 = arith.constant 1.42141378 : f32
    %191 = vector.broadcast %cst_61 : f32 to vector<32x128xf32>
    %192 = arith.addf %190, %191 : vector<32x128xf32>
    %193 = arith.mulf %192, %185 : vector<32x128xf32>
    %cst_62 = arith.constant -0.284496725 : f32
    %194 = vector.broadcast %cst_62 : f32 to vector<32x128xf32>
    %195 = arith.addf %193, %194 : vector<32x128xf32>
    %196 = arith.mulf %195, %185 : vector<32x128xf32>
    %cst_63 = arith.constant 0.254829586 : f32
    %197 = vector.broadcast %cst_63 : f32 to vector<32x128xf32>
    %198 = arith.addf %196, %197 : vector<32x128xf32>
    %199 = arith.mulf %198, %185 : vector<32x128xf32>
    %cst_64 = arith.constant 0.000000e+00 : f32
    %200 = vector.broadcast %cst_64 : f32 to vector<32x128xf32>
    %201 = arith.subf %200, %179 : vector<32x128xf32>
    %202 = arith.mulf %201, %179 : vector<32x128xf32>
    %203 = math.exp %202 : vector<32x128xf32>
    %204 = arith.mulf %199, %203 : vector<32x128xf32>
    %cst_65 = arith.constant 1.000000e+00 : f32
    %205 = vector.broadcast %cst_65 : f32 to vector<32x128xf32>
    %206 = arith.subf %205, %204 : vector<32x128xf32>
    %207 = arith.mulf %178, %206 : vector<32x128xf32>
    %cst_66 = arith.constant 1.000000e+00 : f32
    %208 = vector.broadcast %cst_66 : f32 to vector<32x128xf32>
    %209 = arith.addf %208, %207 : vector<32x128xf32>
    %210 = arith.mulf %171, %209 : vector<32x128xf32>
    %c256 = arith.constant 256 : index
    %c0_67 = arith.constant 0 : index
    %211 = vector.load %arg1[%c256, %c0_67] : memref<704x192xbf16, #tpu.memory_space<vmem>>, vector<128x64xbf16>
    %212 = arith.truncf %210 : vector<32x128xf32> to vector<32x128xbf16>
    %cst_68 = arith.constant dense<0.000000e+00> : vector<32x64xf32>
    %213 = tpu.matmul %212, %211, %cst_68 {dimension_numbers = #tpu.dot_dimension_numbers<[1], [0], [0], [1], [0, 0, 1, 1], [], []>} : vector<32x128xbf16>, vector<128x64xbf16>, vector<32x64xf32> -> vector<32x64xf32>
    %c10 = arith.constant 10 : index
    %c0_69 = arith.constant 0 : index
    %214 = vector.load %arg2[%c10, %c0_69] : memref<21x192xf32, #tpu.memory_space<vmem>>, vector<1x64xf32>
    %215 = vector.broadcast %214 : vector<1x64xf32> to vector<32x64xf32>
    %216 = arith.addf %213, %215 : vector<32x64xf32>
    %217 = arith.addf %216, %139 : vector<32x64xf32>
    %c0_70 = arith.constant 0 : index
    %c0_71 = arith.constant 0 : index
    %c0_72 = arith.constant 0 : index
    %218 = vector.load %arg4[%c0_70, %c0_71, %c0_72] : memref<2x32x64xf32, #tpu.memory_space<vmem>>, vector<1x32x64xf32>
    %219 = vector.shape_cast %218 : vector<1x32x64xf32> to vector<32x64xf32>
    %220 = vector.shape_cast %217 : vector<32x64xf32> to vector<1x32x64xf32>
    tpu.vector_store %arg4[%c0_70, %c0_71, %c0_72], %220 {strides = array<i32>} : memref<2x32x64xf32, #tpu.memory_space<vmem>>, vector<1x32x64xf32>,
    %cst_73 = arith.constant dense<0.000000e+00> : vector<32xf32>
    %221 = vector.multi_reduction <add>, %217, %cst_73 [1] : vector<32x64xf32> to vector<32xf32>
    %222 = vector.shape_cast %221 : vector<32xf32> to vector<32x1xf32>
    %cst_74 = arith.constant 6.400000e+01 : f32
    %223 = vector.broadcast %cst_74 : f32 to vector<32x1xf32>
    %224 = arith.divf %222, %223 : vector<32x1xf32>
    %225 = arith.mulf %217, %217 : vector<32x64xf32>
    %cst_75 = arith.constant dense<0.000000e+00> : vector<32xf32>
    %226 = vector.multi_reduction <add>, %225, %cst_75 [1] : vector<32x64xf32> to vector<32xf32>
    %227 = vector.shape_cast %226 : vector<32xf32> to vector<32x1xf32>
    %cst_76 = arith.constant 6.400000e+01 : f32
    %228 = vector.broadcast %cst_76 : f32 to vector<32x1xf32>
    %229 = arith.divf %227, %228 : vector<32x1xf32>
    %230 = arith.mulf %224, %224 : vector<32x1xf32>
    %231 = arith.subf %229, %230 : vector<32x1xf32>
    %232 = vector.broadcast %224 : vector<32x1xf32> to vector<32x64xf32>
    %233 = arith.subf %217, %232 : vector<32x64xf32>
    %cst_77 = arith.constant 9.99999974E-6 : f32
    %234 = vector.broadcast %cst_77 : f32 to vector<32x1xf32>
    %235 = arith.addf %231, %234 : vector<32x1xf32>
    %236 = math.rsqrt %235 : vector<32x1xf32>
    %237 = vector.broadcast %236 : vector<32x1xf32> to vector<32x64xf32>
    %238 = arith.mulf %233, %237 : vector<32x64xf32>
    %c11 = arith.constant 11 : index
    %c0_78 = arith.constant 0 : index
    %239 = vector.load %arg2[%c11, %c0_78] : memref<21x192xf32, #tpu.memory_space<vmem>>, vector<1x64xf32>
    %240 = vector.broadcast %239 : vector<1x64xf32> to vector<32x64xf32>
    %241 = arith.mulf %238, %240 : vector<32x64xf32>
    %c12 = arith.constant 12 : index
    %c0_79 = arith.constant 0 : index
    %242 = vector.load %arg2[%c12, %c0_79] : memref<21x192xf32, #tpu.memory_space<vmem>>, vector<1x64xf32>
    %243 = vector.broadcast %242 : vector<1x64xf32> to vector<32x64xf32>
    %244 = arith.addf %241, %243 : vector<32x64xf32>
    %c384 = arith.constant 384 : index
    %c0_80 = arith.constant 0 : index
    %245 = vector.load %arg1[%c384, %c0_80] : memref<704x192xbf16, #tpu.memory_space<vmem>>, vector<64x192xbf16>
    %246 = arith.truncf %244 : vector<32x64xf32> to vector<32x64xbf16>
    %cst_81 = arith.constant dense<0.000000e+00> : vector<32x192xf32>
    %247 = tpu.matmul %246, %245, %cst_81 {dimension_numbers = #tpu.dot_dimension_numbers<[1], [0], [0], [1], [0, 0, 1, 1], [], []>} : vector<32x64xbf16>, vector<64x192xbf16>, vector<32x192xf32> -> vector<32x192xf32>
    %c13 = arith.constant 13 : index
    %c0_82 = arith.constant 0 : index
    %248 = vector.load %arg2[%c13, %c0_82] : memref<21x192xf32, #tpu.memory_space<vmem>>, vector<1x192xf32>
    %249 = vector.broadcast %248 : vector<1x192xf32> to vector<32x192xf32>
    %250 = arith.addf %247, %249 : vector<32x192xf32>
    %251 = arith.truncf %250 : vector<32x192xf32> to vector<32x192xbf16>
    %252 = vector.extract_strided_slice %251 {offsets = [0, 0], sizes = [32, 64], strides = [1, 1]} : vector<32x192xbf16> to vector<32x64xbf16>
    %253 = vector.shape_cast %252 : vector<32x64xbf16> to vector<2x16x64xbf16>
    %254 = vector.extract_strided_slice %251 {offsets = [0, 64], sizes = [32, 64], strides = [1, 1]} : vector<32x192xbf16> to vector<32x64xbf16>
    %255 = vector.shape_cast %254 : vector<32x64xbf16> to vector<2x16x64xbf16>
    %256 = vector.extract_strided_slice %251 {offsets = [0, 128], sizes = [32, 64], strides = [1, 1]} : vector<32x192xbf16> to vector<32x64xbf16>
    %257 = vector.shape_cast %256 : vector<32x64xbf16> to vector<2x16x64xbf16>
    %258 = vector.extract_strided_slice %253 {offsets = [0, 0, 0], sizes = [2, 16, 16], strides = [1, 1, 1]} : vector<2x16x64xbf16> to vector<2x16x16xbf16>
    %259 = vector.extract_strided_slice %255 {offsets = [0, 0, 0], sizes = [2, 16, 16], strides = [1, 1, 1]} : vector<2x16x64xbf16> to vector<2x16x16xbf16>
    "tpu.trace_start"() <{level = 10 : i32, message = "bqd,bkd->bqk"}> : () -> ()
    %cst_83 = arith.constant dense<0.000000e+00> : vector<2x16x16xf32>
    %260 = tpu.matmul %258, %259, %cst_83 {dimension_numbers = #tpu.dot_dimension_numbers<[2], [2], [1], [1], [0, 0, 0, 1, 1, 1], [0], [0]>} : vector<2x16x16xbf16>, vector<2x16x16xbf16>, vector<2x16x16xf32> -> vector<2x16x16xf32>
    "tpu.trace_stop"() : () -> ()
    %cst_84 = arith.constant dense<0xFF800000> : vector<2x16xf32>
    %261 = vector.multi_reduction <maximumf>, %260, %cst_84 [2] : vector<2x16x16xf32> to vector<2x16xf32>
    %262 = vector.shape_cast %261 : vector<2x16xf32> to vector<2x16x1xf32>
    %263 = vector.broadcast %262 : vector<2x16x1xf32> to vector<2x16x16xf32>
    %264 = arith.subf %260, %263 : vector<2x16x16xf32>
    %265 = math.exp %264 : vector<2x16x16xf32>
    %cst_85 = arith.constant dense<0.000000e+00> : vector<2x16xf32>
    %266 = vector.multi_reduction <add>, %265, %cst_85 [2] : vector<2x16x16xf32> to vector<2x16xf32>
    %267 = vector.shape_cast %266 : vector<2x16xf32> to vector<2x16x1xf32>
    %268 = tpu.reciprocal %267 {approx = true} : vector<2x16x1xf32> -> vector<2x16x1xf32>
    %269 = vector.broadcast %268 : vector<2x16x1xf32> to vector<2x16x16xf32>
    %270 = arith.mulf %265, %269 : vector<2x16x16xf32>
    %271 = arith.truncf %270 : vector<2x16x16xf32> to vector<2x16x16xbf16>
    %272 = vector.extract_strided_slice %257 {offsets = [0, 0, 0], sizes = [2, 16, 16], strides = [1, 1, 1]} : vector<2x16x64xbf16> to vector<2x16x16xbf16>
    "tpu.trace_start"() <{level = 10 : i32, message = "bqk,bkd->bqd"}> : () -> ()
    %cst_86 = arith.constant dense<0.000000e+00> : vector<2x16x16xf32>
    %273 = tpu.matmul %271, %272, %cst_86 {dimension_numbers = #tpu.dot_dimension_numbers<[2], [1], [1], [2], [0, 0, 0, 1, 1, 2], [0], [0]>} : vector<2x16x16xbf16>, vector<2x16x16xbf16>, vector<2x16x16xf32> -> vector<2x16x16xf32>
    "tpu.trace_stop"() : () -> ()
    %274 = vector.extract_strided_slice %253 {offsets = [0, 0, 16], sizes = [2, 16, 16], strides = [1, 1, 1]} : vector<2x16x64xbf16> to vector<2x16x16xbf16>
    %275 = vector.extract_strided_slice %255 {offsets = [0, 0, 16], sizes = [2, 16, 16], strides = [1, 1, 1]} : vector<2x16x64xbf16> to vector<2x16x16xbf16>
    "tpu.trace_start"() <{level = 10 : i32, message = "bqd,bkd->bqk"}> : () -> ()
    %cst_87 = arith.constant dense<0.000000e+00> : vector<2x16x16xf32>
    %276 = tpu.matmul %274, %275, %cst_87 {dimension_numbers = #tpu.dot_dimension_numbers<[2], [2], [1], [1], [0, 0, 0, 1, 1, 1], [0], [0]>} : vector<2x16x16xbf16>, vector<2x16x16xbf16>, vector<2x16x16xf32> -> vector<2x16x16xf32>
    "tpu.trace_stop"() : () -> ()
    %cst_88 = arith.constant dense<0xFF800000> : vector<2x16xf32>
    %277 = vector.multi_reduction <maximumf>, %276, %cst_88 [2] : vector<2x16x16xf32> to vector<2x16xf32>
    %278 = vector.shape_cast %277 : vector<2x16xf32> to vector<2x16x1xf32>
    %279 = vector.broadcast %278 : vector<2x16x1xf32> to vector<2x16x16xf32>
    %280 = arith.subf %276, %279 : vector<2x16x16xf32>
    %281 = math.exp %280 : vector<2x16x16xf32>
    %cst_89 = arith.constant dense<0.000000e+00> : vector<2x16xf32>
    %282 = vector.multi_reduction <add>, %281, %cst_89 [2] : vector<2x16x16xf32> to vector<2x16xf32>
    %283 = vector.shape_cast %282 : vector<2x16xf32> to vector<2x16x1xf32>
    %284 = tpu.reciprocal %283 {approx = true} : vector<2x16x1xf32> -> vector<2x16x1xf32>
    %285 = vector.broadcast %284 : vector<2x16x1xf32> to vector<2x16x16xf32>
    %286 = arith.mulf %281, %285 : vector<2x16x16xf32>
    %287 = arith.truncf %286 : vector<2x16x16xf32> to vector<2x16x16xbf16>
    %288 = vector.extract_strided_slice %257 {offsets = [0, 0, 16], sizes = [2, 16, 16], strides = [1, 1, 1]} : vector<2x16x64xbf16> to vector<2x16x16xbf16>
    "tpu.trace_start"() <{level = 10 : i32, message = "bqk,bkd->bqd"}> : () -> ()
    %cst_90 = arith.constant dense<0.000000e+00> : vector<2x16x16xf32>
    %289 = tpu.matmul %287, %288, %cst_90 {dimension_numbers = #tpu.dot_dimension_numbers<[2], [1], [1], [2], [0, 0, 0, 1, 1, 2], [0], [0]>} : vector<2x16x16xbf16>, vector<2x16x16xbf16>, vector<2x16x16xf32> -> vector<2x16x16xf32>
    "tpu.trace_stop"() : () -> ()
    %290 = vector.extract_strided_slice %253 {offsets = [0, 0, 32], sizes = [2, 16, 16], strides = [1, 1, 1]} : vector<2x16x64xbf16> to vector<2x16x16xbf16>
    %291 = vector.extract_strided_slice %255 {offsets = [0, 0, 32], sizes = [2, 16, 16], strides = [1, 1, 1]} : vector<2x16x64xbf16> to vector<2x16x16xbf16>
    "tpu.trace_start"() <{level = 10 : i32, message = "bqd,bkd->bqk"}> : () -> ()
    %cst_91 = arith.constant dense<0.000000e+00> : vector<2x16x16xf32>
    %292 = tpu.matmul %290, %291, %cst_91 {dimension_numbers = #tpu.dot_dimension_numbers<[2], [2], [1], [1], [0, 0, 0, 1, 1, 1], [0], [0]>} : vector<2x16x16xbf16>, vector<2x16x16xbf16>, vector<2x16x16xf32> -> vector<2x16x16xf32>
    "tpu.trace_stop"() : () -> ()
    %cst_92 = arith.constant dense<0xFF800000> : vector<2x16xf32>
    %293 = vector.multi_reduction <maximumf>, %292, %cst_92 [2] : vector<2x16x16xf32> to vector<2x16xf32>
    %294 = vector.shape_cast %293 : vector<2x16xf32> to vector<2x16x1xf32>
    %295 = vector.broadcast %294 : vector<2x16x1xf32> to vector<2x16x16xf32>
    %296 = arith.subf %292, %295 : vector<2x16x16xf32>
    %297 = math.exp %296 : vector<2x16x16xf32>
    %cst_93 = arith.constant dense<0.000000e+00> : vector<2x16xf32>
    %298 = vector.multi_reduction <add>, %297, %cst_93 [2] : vector<2x16x16xf32> to vector<2x16xf32>
    %299 = vector.shape_cast %298 : vector<2x16xf32> to vector<2x16x1xf32>
    %300 = tpu.reciprocal %299 {approx = true} : vector<2x16x1xf32> -> vector<2x16x1xf32>
    %301 = vector.broadcast %300 : vector<2x16x1xf32> to vector<2x16x16xf32>
    %302 = arith.mulf %297, %301 : vector<2x16x16xf32>
    %303 = arith.truncf %302 : vector<2x16x16xf32> to vector<2x16x16xbf16>
    %304 = vector.extract_strided_slice %257 {offsets = [0, 0, 32], sizes = [2, 16, 16], strides = [1, 1, 1]} : vector<2x16x64xbf16> to vector<2x16x16xbf16>
    "tpu.trace_start"() <{level = 10 : i32, message = "bqk,bkd->bqd"}> : () -> ()
    %cst_94 = arith.constant dense<0.000000e+00> : vector<2x16x16xf32>
    %305 = tpu.matmul %303, %304, %cst_94 {dimension_numbers = #tpu.dot_dimension_numbers<[2], [1], [1], [2], [0, 0, 0, 1, 1, 2], [0], [0]>} : vector<2x16x16xbf16>, vector<2x16x16xbf16>, vector<2x16x16xf32> -> vector<2x16x16xf32>
    "tpu.trace_stop"() : () -> ()
    %306 = vector.extract_strided_slice %253 {offsets = [0, 0, 48], sizes = [2, 16, 16], strides = [1, 1, 1]} : vector<2x16x64xbf16> to vector<2x16x16xbf16>
    %307 = vector.extract_strided_slice %255 {offsets = [0, 0, 48], sizes = [2, 16, 16], strides = [1, 1, 1]} : vector<2x16x64xbf16> to vector<2x16x16xbf16>
    "tpu.trace_start"() <{level = 10 : i32, message = "bqd,bkd->bqk"}> : () -> ()
    %cst_95 = arith.constant dense<0.000000e+00> : vector<2x16x16xf32>
    %308 = tpu.matmul %306, %307, %cst_95 {dimension_numbers = #tpu.dot_dimension_numbers<[2], [2], [1], [1], [0, 0, 0, 1, 1, 1], [0], [0]>} : vector<2x16x16xbf16>, vector<2x16x16xbf16>, vector<2x16x16xf32> -> vector<2x16x16xf32>
    "tpu.trace_stop"() : () -> ()
    %cst_96 = arith.constant dense<0xFF800000> : vector<2x16xf32>
    %309 = vector.multi_reduction <maximumf>, %308, %cst_96 [2] : vector<2x16x16xf32> to vector<2x16xf32>
    %310 = vector.shape_cast %309 : vector<2x16xf32> to vector<2x16x1xf32>
    %311 = vector.broadcast %310 : vector<2x16x1xf32> to vector<2x16x16xf32>
    %312 = arith.subf %308, %311 : vector<2x16x16xf32>
    %313 = math.exp %312 : vector<2x16x16xf32>
    %cst_97 = arith.constant dense<0.000000e+00> : vector<2x16xf32>
    %314 = vector.multi_reduction <add>, %313, %cst_97 [2] : vector<2x16x16xf32> to vector<2x16xf32>
    %315 = vector.shape_cast %314 : vector<2x16xf32> to vector<2x16x1xf32>
    %316 = tpu.reciprocal %315 {approx = true} : vector<2x16x1xf32> -> vector<2x16x1xf32>
    %317 = vector.broadcast %316 : vector<2x16x1xf32> to vector<2x16x16xf32>
    %318 = arith.mulf %313, %317 : vector<2x16x16xf32>
    %319 = arith.truncf %318 : vector<2x16x16xf32> to vector<2x16x16xbf16>
    %320 = vector.extract_strided_slice %257 {offsets = [0, 0, 48], sizes = [2, 16, 16], strides = [1, 1, 1]} : vector<2x16x64xbf16> to vector<2x16x16xbf16>
    "tpu.trace_start"() <{level = 10 : i32, message = "bqk,bkd->bqd"}> : () -> ()
    %cst_98 = arith.constant dense<0.000000e+00> : vector<2x16x16xf32>
    %321 = tpu.matmul %319, %320, %cst_98 {dimension_numbers = #tpu.dot_dimension_numbers<[2], [1], [1], [2], [0, 0, 0, 1, 1, 2], [0], [0]>} : vector<2x16x16xbf16>, vector<2x16x16xbf16>, vector<2x16x16xf32> -> vector<2x16x16xf32>
    "tpu.trace_stop"() : () -> ()
    %322 = tpu.concatenate %273, %289, %305, %321 in 2 : vector<2x16x16xf32>, vector<2x16x16xf32>, vector<2x16x16xf32>, vector<2x16x16xf32> -> vector<2x16x64xf32>
    %323 = vector.shape_cast %322 : vector<2x16x64xf32> to vector<32x64xf32>
    %c448 = arith.constant 448 : index
    %c0_99 = arith.constant 0 : index
    %324 = vector.load %arg1[%c448, %c0_99] : memref<704x192xbf16, #tpu.memory_space<vmem>>, vector<64x64xbf16>
    %325 = arith.truncf %323 : vector<32x64xf32> to vector<32x64xbf16>
    %cst_100 = arith.constant dense<0.000000e+00> : vector<32x64xf32>
    %326 = tpu.matmul %325, %324, %cst_100 {dimension_numbers = #tpu.dot_dimension_numbers<[1], [0], [0], [1], [0, 0, 1, 1], [], []>} : vector<32x64xbf16>, vector<64x64xbf16>, vector<32x64xf32> -> vector<32x64xf32>
    %c14 = arith.constant 14 : index
    %c0_101 = arith.constant 0 : index
    %327 = vector.load %arg2[%c14, %c0_101] : memref<21x192xf32, #tpu.memory_space<vmem>>, vector<1x64xf32>
    %328 = vector.broadcast %327 : vector<1x64xf32> to vector<32x64xf32>
    %329 = arith.addf %326, %328 : vector<32x64xf32>
    %330 = arith.addf %329, %217 : vector<32x64xf32>
    %cst_102 = arith.constant dense<0.000000e+00> : vector<32xf32>
    %331 = vector.multi_reduction <add>, %330, %cst_102 [1] : vector<32x64xf32> to vector<32xf32>
    %332 = vector.shape_cast %331 : vector<32xf32> to vector<32x1xf32>
    %cst_103 = arith.constant 6.400000e+01 : f32
    %333 = vector.broadcast %cst_103 : f32 to vector<32x1xf32>
    %334 = arith.divf %332, %333 : vector<32x1xf32>
    %335 = arith.mulf %330, %330 : vector<32x64xf32>
    %cst_104 = arith.constant dense<0.000000e+00> : vector<32xf32>
    %336 = vector.multi_reduction <add>, %335, %cst_104 [1] : vector<32x64xf32> to vector<32xf32>
    %337 = vector.shape_cast %336 : vector<32xf32> to vector<32x1xf32>
    %cst_105 = arith.constant 6.400000e+01 : f32
    %338 = vector.broadcast %cst_105 : f32 to vector<32x1xf32>
    %339 = arith.divf %337, %338 : vector<32x1xf32>
    %340 = arith.mulf %334, %334 : vector<32x1xf32>
    %341 = arith.subf %339, %340 : vector<32x1xf32>
    %342 = vector.broadcast %334 : vector<32x1xf32> to vector<32x64xf32>
    %343 = arith.subf %330, %342 : vector<32x64xf32>
    %cst_106 = arith.constant 9.99999974E-6 : f32
    %344 = vector.broadcast %cst_106 : f32 to vector<32x1xf32>
    %345 = arith.addf %341, %344 : vector<32x1xf32>
    %346 = math.rsqrt %345 : vector<32x1xf32>
    %347 = vector.broadcast %346 : vector<32x1xf32> to vector<32x64xf32>
    %348 = arith.mulf %343, %347 : vector<32x64xf32>
    %c15 = arith.constant 15 : index
    %c0_107 = arith.constant 0 : index
    %349 = vector.load %arg2[%c15, %c0_107] : memref<21x192xf32, #tpu.memory_space<vmem>>, vector<1x64xf32>
    %350 = vector.broadcast %349 : vector<1x64xf32> to vector<32x64xf32>
    %351 = arith.mulf %348, %350 : vector<32x64xf32>
    %c16 = arith.constant 16 : index
    %c0_108 = arith.constant 0 : index
    %352 = vector.load %arg2[%c16, %c0_108] : memref<21x192xf32, #tpu.memory_space<vmem>>, vector<1x64xf32>
    %353 = vector.broadcast %352 : vector<1x64xf32> to vector<32x64xf32>
    %354 = arith.addf %351, %353 : vector<32x64xf32>
    %c512 = arith.constant 512 : index
    %c0_109 = arith.constant 0 : index
    %355 = vector.load %arg1[%c512, %c0_109] : memref<704x192xbf16, #tpu.memory_space<vmem>>, vector<64x128xbf16>
    %356 = arith.truncf %354 : vector<32x64xf32> to vector<32x64xbf16>
    %cst_110 = arith.constant dense<0.000000e+00> : vector<32x128xf32>
    %357 = tpu.matmul %356, %355, %cst_110 {dimension_numbers = #tpu.dot_dimension_numbers<[1], [0], [0], [1], [0, 0, 1, 1], [], []>} : vector<32x64xbf16>, vector<64x128xbf16>, vector<32x128xf32> -> vector<32x128xf32>
    %c17 = arith.constant 17 : index
    %c0_111 = arith.constant 0 : index
    %358 = vector.load %arg2[%c17, %c0_111] : memref<21x192xf32, #tpu.memory_space<vmem>>, vector<1x128xf32>
    %359 = vector.broadcast %358 : vector<1x128xf32> to vector<32x128xf32>
    %360 = arith.addf %357, %359 : vector<32x128xf32>
    %cst_112 = arith.constant 5.000000e-01 : f32
    %361 = vector.broadcast %cst_112 : f32 to vector<32x128xf32>
    %362 = arith.mulf %361, %360 : vector<32x128xf32>
    %cst_113 = arith.constant 0.707106769 : f32
    %363 = vector.broadcast %cst_113 : f32 to vector<32x128xf32>
    %364 = arith.mulf %360, %363 : vector<32x128xf32>
    %cst_114 = arith.constant 0.000000e+00 : f32
    %365 = vector.broadcast %cst_114 : f32 to vector<32x128xf32>
    %366 = arith.cmpf olt, %364, %365 : vector<32x128xf32>
    %cst_115 = arith.constant -1.000000e+00 : f32
    %cst_116 = arith.constant 1.000000e+00 : f32
    %367 = vector.broadcast %cst_115 : f32 to vector<32x128xf32>
    %368 = vector.broadcast %cst_116 : f32 to vector<32x128xf32>
    %369 = arith.select %366, %367, %368 : vector<32x128xi1>, vector<32x128xf32>
    %370 = math.absf %364 : vector<32x128xf32>
    %cst_117 = arith.constant 0.327591091 : f32
    %371 = vector.broadcast %cst_117 : f32 to vector<32x128xf32>
    %372 = arith.mulf %371, %370 : vector<32x128xf32>
    %cst_118 = arith.constant 1.000000e+00 : f32
    %373 = vector.broadcast %cst_118 : f32 to vector<32x128xf32>
    %374 = arith.addf %373, %372 : vector<32x128xf32>
    %cst_119 = arith.constant 1.000000e+00 : f32
    %375 = vector.broadcast %cst_119 : f32 to vector<32x128xf32>
    %376 = arith.divf %375, %374 : vector<32x128xf32>
    %cst_120 = arith.constant 1.06140542 : f32
    %377 = vector.broadcast %cst_120 : f32 to vector<32x128xf32>
    %378 = arith.mulf %377, %376 : vector<32x128xf32>
    %cst_121 = arith.constant -1.45315206 : f32
    %379 = vector.broadcast %cst_121 : f32 to vector<32x128xf32>
    %380 = arith.addf %378, %379 : vector<32x128xf32>
    %381 = arith.mulf %380, %376 : vector<32x128xf32>
    %cst_122 = arith.constant 1.42141378 : f32
    %382 = vector.broadcast %cst_122 : f32 to vector<32x128xf32>
    %383 = arith.addf %381, %382 : vector<32x128xf32>
    %384 = arith.mulf %383, %376 : vector<32x128xf32>
    %cst_123 = arith.constant -0.284496725 : f32
    %385 = vector.broadcast %cst_123 : f32 to vector<32x128xf32>
    %386 = arith.addf %384, %385 : vector<32x128xf32>
    %387 = arith.mulf %386, %376 : vector<32x128xf32>
    %cst_124 = arith.constant 0.254829586 : f32
    %388 = vector.broadcast %cst_124 : f32 to vector<32x128xf32>
    %389 = arith.addf %387, %388 : vector<32x128xf32>
    %390 = arith.mulf %389, %376 : vector<32x128xf32>
    %cst_125 = arith.constant 0.000000e+00 : f32
    %391 = vector.broadcast %cst_125 : f32 to vector<32x128xf32>
    %392 = arith.subf %391, %370 : vector<32x128xf32>
    %393 = arith.mulf %392, %370 : vector<32x128xf32>
    %394 = math.exp %393 : vector<32x128xf32>
    %395 = arith.mulf %390, %394 : vector<32x128xf32>
    %cst_126 = arith.constant 1.000000e+00 : f32
    %396 = vector.broadcast %cst_126 : f32 to vector<32x128xf32>
    %397 = arith.subf %396, %395 : vector<32x128xf32>
    %398 = arith.mulf %369, %397 : vector<32x128xf32>
    %cst_127 = arith.constant 1.000000e+00 : f32
    %399 = vector.broadcast %cst_127 : f32 to vector<32x128xf32>
    %400 = arith.addf %399, %398 : vector<32x128xf32>
    %401 = arith.mulf %362, %400 : vector<32x128xf32>
    %c576 = arith.constant 576 : index
    %c0_128 = arith.constant 0 : index
    %402 = vector.load %arg1[%c576, %c0_128] : memref<704x192xbf16, #tpu.memory_space<vmem>>, vector<128x64xbf16>
    %403 = arith.truncf %401 : vector<32x128xf32> to vector<32x128xbf16>
    %cst_129 = arith.constant dense<0.000000e+00> : vector<32x64xf32>
    %404 = tpu.matmul %403, %402, %cst_129 {dimension_numbers = #tpu.dot_dimension_numbers<[1], [0], [0], [1], [0, 0, 1, 1], [], []>} : vector<32x128xbf16>, vector<128x64xbf16>, vector<32x64xf32> -> vector<32x64xf32>
    %c18 = arith.constant 18 : index
    %c0_130 = arith.constant 0 : index
    %405 = vector.load %arg2[%c18, %c0_130] : memref<21x192xf32, #tpu.memory_space<vmem>>, vector<1x64xf32>
    %406 = vector.broadcast %405 : vector<1x64xf32> to vector<32x64xf32>
    %407 = arith.addf %404, %406 : vector<32x64xf32>
    %408 = arith.addf %407, %330 : vector<32x64xf32>
    %c1_131 = arith.constant 1 : index
    %c0_132 = arith.constant 0 : index
    %c0_133 = arith.constant 0 : index
    %409 = vector.load %arg4[%c1_131, %c0_132, %c0_133] : memref<2x32x64xf32, #tpu.memory_space<vmem>>, vector<1x32x64xf32>
    %410 = vector.shape_cast %409 : vector<1x32x64xf32> to vector<32x64xf32>
    %411 = vector.shape_cast %408 : vector<32x64xf32> to vector<1x32x64xf32>
    tpu.vector_store %arg4[%c1_131, %c0_132, %c0_133], %411 {strides = array<i32>} : memref<2x32x64xf32, #tpu.memory_space<vmem>>, vector<1x32x64xf32>,
    %cst_134 = arith.constant dense<0.000000e+00> : vector<32xf32>
    %412 = vector.multi_reduction <add>, %408, %cst_134 [1] : vector<32x64xf32> to vector<32xf32>
    %413 = vector.shape_cast %412 : vector<32xf32> to vector<32x1xf32>
    %cst_135 = arith.constant 6.400000e+01 : f32
    %414 = vector.broadcast %cst_135 : f32 to vector<32x1xf32>
    %415 = arith.divf %413, %414 : vector<32x1xf32>
    %416 = arith.mulf %408, %408 : vector<32x64xf32>
    %cst_136 = arith.constant dense<0.000000e+00> : vector<32xf32>
    %417 = vector.multi_reduction <add>, %416, %cst_136 [1] : vector<32x64xf32> to vector<32xf32>
    %418 = vector.shape_cast %417 : vector<32xf32> to vector<32x1xf32>
    %cst_137 = arith.constant 6.400000e+01 : f32
    %419 = vector.broadcast %cst_137 : f32 to vector<32x1xf32>
    %420 = arith.divf %418, %419 : vector<32x1xf32>
    %421 = arith.mulf %415, %415 : vector<32x1xf32>
    %422 = arith.subf %420, %421 : vector<32x1xf32>
    %423 = vector.broadcast %415 : vector<32x1xf32> to vector<32x64xf32>
    %424 = arith.subf %408, %423 : vector<32x64xf32>
    %cst_138 = arith.constant 9.99999974E-6 : f32
    %425 = vector.broadcast %cst_138 : f32 to vector<32x1xf32>
    %426 = arith.addf %422, %425 : vector<32x1xf32>
    %427 = math.rsqrt %426 : vector<32x1xf32>
    %428 = vector.broadcast %427 : vector<32x1xf32> to vector<32x64xf32>
    %429 = arith.mulf %424, %428 : vector<32x64xf32>
    %c19 = arith.constant 19 : index
    %c0_139 = arith.constant 0 : index
    %430 = vector.load %arg2[%c19, %c0_139] : memref<21x192xf32, #tpu.memory_space<vmem>>, vector<1x64xf32>
    %431 = vector.broadcast %430 : vector<1x64xf32> to vector<32x64xf32>
    %432 = arith.mulf %429, %431 : vector<32x64xf32>
    %c20 = arith.constant 20 : index
    %c0_140 = arith.constant 0 : index
    %433 = vector.load %arg2[%c20, %c0_140] : memref<21x192xf32, #tpu.memory_space<vmem>>, vector<1x64xf32>
    %434 = vector.broadcast %433 : vector<1x64xf32> to vector<32x64xf32>
    %435 = arith.addf %432, %434 : vector<32x64xf32>
    %c0_141 = arith.constant 0 : index
    %c0_142 = arith.constant 0 : index
    %436 = vector.load %arg3[%c0_141, %c0_142] : memref<32x64xf32, #tpu.memory_space<vmem>>, vector<32x64xf32>
    tpu.vector_store %arg3[%c0_141, %c0_142], %435 {strides = array<i32>} : memref<32x64xf32, #tpu.memory_space<vmem>>, vector<32x64xf32>,
    return
  }
}

</mosaic_0001>

<bundles_post_ra>
// kernel: vit_forward.1
= control target key start
LH: loop header
LB: loop body
LE: loop exit
PB: predicated region body
PF: predicated region fallthrough
CT: control target
= control target key end

     0   :  { %10 = vsyncpa [#allocation3], 0  ;;  %vm66_vm0 = vcmask 523264   ;;  %s5611_s0 = inlined_call_operand.vmem [shape: bf16[32,64], index: 0, kind: input, shape index: {}]   ;;  %s5612_s1 = inlined_call_operand.vmem [shape: bf16[704,192], index: 1, kind: input, shape index: {}]   ;;  %s5613_s2 = inlined_call_operand.vmem [shape: f32[21,192], index: 2, kind: input, shape index: {}]   ;;  %s5614_s3 = inlined_call_operand.hbm [shape: f32[32,64], index: 3, kind: output, shape index: {0}]   ;;  %s5615_s4 = inlined_call_operand.hbm [shape: f32[2,32,64], index: 4, kind: output, shape index: {1}]  }
   0x1   :  { %v4294_v0 = vld [vmem:[%s5612_s1 + $0x30] ss:$8 sps:$4 sm:$0xff]   ;;  %v4295_v1 = vld [vmem:[%s5612_s1 + $0x20] ss:$8 sps:$4 sm:$0xff]  }
   0x2   :  { %3927 = vmatprep.subr.bf16.mxu1 %v4294_v0  ;;  %v4296_v2 = vld [vmem:[%s5612_s1 + $0x10] ss:$8 sps:$4 sm:$0xff]   ;;  %v4298_v3 = vld [vmem:[%s5611_s0] sm:$0xff]   ;;  %v4299_v5 = vld [vmem:[%s5611_s0 + $0x8] sm:$0xff]  }
   0x3   :  { %3928 = vmatpush3.bf16.msra.mxu1 %v4294_v0  ;;  %v4297_v4 = vld [vmem:[%s5612_s1] ss:$8 sps:$4 sm:$0xff]   ;;  %3935 = vmatprep.mubr.msk.bf16.mxu1 %vm66_vm0, %v4298_v3 }
   0x4   :  { %3929 = vmatprep.subr.bf16.mxu1 %v4295_v1 }
   0x7   :  { %3930 = vmatpush3.bf16.msra.mxu1 %v4295_v1 }
   0x8   :  { %3931 = vmatprep.subr.bf16.mxu1 %v4296_v2 }
   0xb   :  { %3932 = vmatpush3.bf16.msra.mxu1 %v4296_v2 }
   0xc   :  { %3933 = vmatprep.subr.bf16.mxu1 %v4297_v4 }
   0xf   :  { %3934 = vmatpush3.bf16.msra.mxu1 %v4297_v4 }
  0x12   :  { %3936 = vmatmul.mubr.msk.bf16.vlgmr.msra.gmra.mxu1 %vm66_vm0, %v4299_v5 }
  0x13   :  { %11 = vsyncpa [#allocation5], 0  ;;  %v31_v7 = vld [vmem:[%s5613_s2] ss:$0 sm:$0xff]  ;;  %v183_v57 = vld [vmem:[%s5613_s2 + $0x1] ss:$0 sm:$0xff] }
  0x14   :  { %v188_v59 = vld [vmem:[%s5613_s2 + $0x2] ss:$0 sm:$0xff]  ;;  %vm4610_vm1 = vmmov 0   ;;  %s4611_s28 = smov 64   ;;  %vm392_vm2 = vcmask 130048   ;;  %s4612_s0 = smov 48  }
  0x15   :  { %s4613_s29 = smov 112   ;;  %s4614_s30 = smov 32   ;;  %vm1404_vm3 = vcmask 261120   ;;  %vm1409_vm4 = vcmask 392192  }
  0x16   :  { %s4615_s5 = smov 96   ;;  %s4616_s6 = smov 16  }
  0x17   :  { %s4617_s7 = smov 80   ;;  %s4619_s19 = smov [#allocation4]  }
  0x18   :  { %s3696_s20 = sshll.u32 %s4619_s19, 4  ;;  %s3697_s20 = int_to_ptr.vmem [resolvable:$true] %s3696_s20 }
  0x19   :  { %s4564_s21 = scalar_lea.vmem %s3697_s20, 1024  ;;  %p4569_p1 = scmp.lt.s32.totalorder %s3697_s20, %s3697_s20 }
  0x1a   :  { %p4565_p0 = scmp.ne.s32.totalorder %s3697_s20, %s4564_s21  ;;  %p4570_p2 = scmp.lt.s32.totalorder %s4564_s21, %s4564_s21 }
  0x1c   :  { %p4571_p3 = por %p4570_p2, %p4569_p1 }
  0x1e   :  { %p4572_p4 = pnand %p4571_p3, %p4565_p0 }
  0xd2   :  { %v3937_v6 = vpop.f32.mrf.mxu1 }
  0xd3   :  { %v4673_v16 = vadd.f32 %v3937_v6, %v31_v7 }
  0xd4   :  { %v107_v8 = vpop.f32.mrf.mxu1 }
  0xd5   :  { %v108_v9 = vadd.f32 %v107_v8, %v31_v7  ;;  %v128_v21 = vsel %vm66_vm0, %v4673_v16, 0.0  ;;  %v141_v22 = vmul.f32 %v4673_v16, %v4673_v16 }
  0xd6   :  { %v3938_v10 = vpop.f32.mrf.mxu1 }
  0xd7   :  { %v122_v11 = vsel %vm66_vm0, %v108_v9, 0.0  ;;  %v139_v12 = vmul.f32 %v108_v9, %v108_v9  ;;  %v4676_v19 = vadd.f32 %v3938_v10, %v31_v7  ;;  %v149_v25 = vsel %vm66_vm0, %v141_v22, 0.0 }
  0xd8   :  { %v110_v13 = vpop.f32.mrf.mxu1  ;;  %123 = vadd.xlane.f32.xlu0 %v122_v11 }
  0xd9   :  { %v111_v14 = vadd.f32 %v110_v13, %v31_v7  ;;  %v143_v15 = vsel %vm66_vm0, %v139_v12, 0.0  ;;  %v131_v23 = vsel %vm66_vm0, %v4676_v19, 0.0  ;;  %v142_v24 = vmul.f32 %v4676_v19, %v4676_v19 }
  0xda   :  { %144 = vadd.xlane.f32.xlu1 %v143_v15 }
  0xdb   :  { %v125_v17 = vsel %vm66_vm0, %v111_v14, 0.0  ;;  %v140_v18 = vmul.f32 %v111_v14, %v111_v14  ;;  %v152_v26 = vsel %vm66_vm0, %v142_v24, 0.0 }
  0xdc   :  { %126 = vadd.xlane.f32.xlu0 %v125_v17 }
  0xdd   :  { %v146_v20 = vsel %vm66_vm0, %v140_v18, 0.0 }
  0xde   :  { %147 = vadd.xlane.f32.xlu1 %v146_v20 }
  0xe0   :  { %129 = vadd.xlane.f32.xlu0 %v128_v21 }
  0xe2   :  { %132 = vadd.xlane.f32.xlu1 %v131_v23 }
  0xe4   :  { %150 = vadd.xlane.f32.xlu0 %v149_v25  ;;  %v4302_v25 = vld [vmem:[%s5612_s1 + $0x74] ss:$8 sps:$4 sm:$0xff]  }
  0xe5   :  { %340 = vmatprep.subr.bf16.mxu1 %v4302_v25 }
  0xe6   :  { %153 = vadd.xlane.f32.xlu1 %v152_v26  ;;  %v4300_v26 = vld [vmem:[%s5612_s1 + $0x70] ss:$8 sps:$4 sm:$0xff]  }
  0xe7   :  { %341 = vmatpush1.bf16.msra.mxu1 %v4300_v26  ;;  %v4609_v26 = vmov 0.0  }
  0xe8   :  { %3939 = vmatprep.subr.bf16.mxu0 %v4609_v26  ;;  %3941 = vmatprep.mubr.msk.bf16.mxu0 %vm4610_vm1, %v4609_v26 }
 0x161   :  { %v124_v27 = vpop.xlane.xlu0 %123 }
 0x162   :  { %v135_v28 = vmul.f32 0.015625, %v124_v27  ;;  %v4303_v27 = vld [vmem:[%s5612_s1 + $0x60] ss:$8 sps:$4 sm:$0xff]  }
 0x163   :  { %v145_v29 = vpop.xlane.xlu1 %144 }
 0x164   :  { %v159_v30 = vmul.f32 %v135_v28, %v135_v28  ;;  %v155_v31 = vmul.f32 0.015625, %v145_v29  ;;  %v167_v55 = vsub.f32 %v108_v9, %v135_v28  ;;  %v4305_v28 = vld [vmem:[%s5612_s1 + $0x64] ss:$8 sps:$4 sm:$0xff]   ;;  %v4308_v29 = vld [vmem:[%s5612_s1 + $0x54] ss:$8 sps:$4 sm:$0xff]  }
 0x165   :  { %v127_v32 = vpop.xlane.xlu0 %126  ;;  %342 = vmatprep.subr.bf16.mxu1 %v4305_v28 }
 0x166   :  { %v163_v33 = vsub.f32 %v155_v31, %v159_v30  ;;  %v136_v34 = vmul.f32 0.015625, %v127_v32  ;;  %343 = vmatpush1.bf16.msra.mxu1 %v4303_v27  ;;  %v4306_v30 = vld [vmem:[%s5612_s1 + $0x50] ss:$8 sps:$4 sm:$0xff]   ;;  %v4608_v31 = vmov 0   ;;  %v4311_v32 = vld [vmem:[%s5612_s1 + $0x44] ss:$8 sps:$4 sm:$0xff]   ;;  %v276_v27 = vlaneseq }
 0x167   :  { %v148_v35 = vpop.xlane.xlu1 %147  ;;  %364 = vmatprep.mubr.bf16.mxu1 %v4608_v31  ;;  %344 = vmatprep.subr.bf16.mxu1 %v4308_v29 }
 0x168   :  { %v171_v36 = vadd.f32 1e-05, %v163_v33  ;;  %v160_v37 = vmul.f32 %v136_v34, %v136_v34  ;;  %v156_v38 = vmul.f32 0.015625, %v148_v35  ;;  %v168_v60 = vsub.f32 %v111_v14, %v136_v34  ;;  %v4309_v33 = vld [vmem:[%s5612_s1 + $0x40] ss:$8 sps:$4 sm:$0xff]  }
 0x169   :  { %v130_v39 = vpop.xlane.xlu0 %129  ;;  %v4765_v28 = vshrl.u32 %v276_v27, 7 }
 0x16a   :  { %4356 = vrsqrt.f32 %v171_v36  ;;  %v164_v40 = vsub.f32 %v156_v38, %v160_v37  ;;  %v137_v41 = vmul.f32 0.015625, %v130_v39  ;;  %345 = vmatpush1.bf16.msra.mxu1 %v4306_v30  ;;  %v3719_v30 = vld [vmem:[%s5613_s2 + $0x5] ss:$8 sm:$0x3] }
 0x16b   :  { %v133_v42 = vpop.xlane.xlu1 %132  ;;  %346 = vmatprep.subr.bf16.mxu1 %v4311_v32  ;;  %v278_v29 = vsub.s32 0, %v4765_v28  ;;  %v282_v32 = vsub.s32 1, %v4765_v28 }
 0x16c   :  { %v172_v43 = vadd.f32 1e-05, %v164_v40  ;;  %v138_v44 = vmul.f32 0.015625, %v133_v42  ;;  %v161_v46 = vmul.f32 %v137_v41, %v137_v41  ;;  %v169_v4 = vsub.f32 %v4673_v16, %v137_v41 }
 0x16d   :  { %v151_v45 = vpop.xlane.xlu0 %150 }
 0x16e   :  { %4358 = vrsqrt.f32 %v172_v43  ;;  %v157_v47 = vmul.f32 0.015625, %v151_v45  ;;  %v162_v49 = vmul.f32 %v138_v44, %v138_v44  ;;  %v170_v7 = vsub.f32 %v4676_v19, %v138_v44  ;;  %347 = vmatpush1.bf16.msra.mxu1 %v4309_v33 }
 0x16f   :  { %v154_v48 = vpop.xlane.xlu1 %153  ;;  %3951 = vmatprep.subr.bf16.mxu1 %v4609_v26 }
 0x170   :  { %v165_v50 = vsub.f32 %v157_v47, %v161_v46  ;;  %v158_v51 = vmul.f32 0.015625, %v154_v48 }
 0x172   :  { %v173_v52 = vadd.f32 1e-05, %v165_v50  ;;  %v166_v53 = vsub.f32 %v158_v51, %v162_v49 }
 0x174   :  { %4360 = vrsqrt.f32 %v173_v52  ;;  %v174_v54 = vadd.f32 1e-05, %v166_v53 }
 0x176   :  { %4362 = vrsqrt.f32 %v174_v54 }
 0x177   :  { %v4357_v56 = vpop.eup %4356 }
 0x178   :  { %v179_v58 = vmul.f32 %v4357_v56, %v167_v55 }
 0x17a   :  { %v184_v61 = vmul.f32 %v183_v57, %v179_v58 }
 0x17b   :  { %v4359_v62 = vpop.eup %4358 }
 0x17c   :  { %v4695_v63 = vadd.f32 %v188_v59, %v184_v61  ;;  %v180_v0 = vmul.f32 %v4359_v62, %v168_v60 }
 0x17e   :  { %v193_v1 = vsel %vm66_vm0, %v4695_v63, 0.0  ;;  %v209_v2 = vmul.f32 %v4695_v63, %v4695_v63  ;;  %v185_v3 = vmul.f32 %v183_v57, %v180_v0 }
 0x17f   :  { %194 = vadd.xlane.f32.xlu0 %v193_v1 }
 0x180   :  { %v4702_v5 = vadd.f32 %v188_v59, %v185_v3  ;;  %v213_v8 = vsel %vm66_vm0, %v209_v2, 0.0  ;;  %v253_v2 = vld [vmem:[%s5613_s2 + $0x3] ss:$0 sm:$0xff] }
 0x181   :  { %v4361_v6 = vpop.eup %4360 }
 0x182   :  { %v196_v9 = vsel %vm66_vm0, %v4702_v5, 0.0  ;;  %v210_v10 = vmul.f32 %v4702_v5, %v4702_v5  ;;  %v181_v11 = vmul.f32 %v4361_v6, %v169_v4 }
 0x183   :  { %v4363_v12 = vpop.eup %4362  ;;  %214 = vadd.xlane.f32.xlu0 %v213_v8  ;;  %197 = vadd.xlane.f32.xlu1 %v196_v9  ;;  %v258_v8 = vld [vmem:[%s5613_s2 + $0x4] ss:$0 sm:$0xff] }
 0x184   :  { %v186_v13 = vmul.f32 %v183_v57, %v181_v11  ;;  %v182_v14 = vmul.f32 %v4363_v12, %v170_v7  ;;  %v216_v15 = vsel %vm66_vm0, %v210_v10, 0.0 }
 0x186   :  { %v4711_v16 = vadd.f32 %v188_v59, %v186_v13  ;;  %v187_v17 = vmul.f32 %v183_v57, %v182_v14 }
 0x187   :  { %217 = vadd.xlane.f32.xlu1 %v216_v15 }
 0x188   :  { %v199_v18 = vsel %vm66_vm0, %v4711_v16, 0.0  ;;  %v4715_v19 = vadd.f32 %v188_v59, %v187_v17  ;;  %v211_v20 = vmul.f32 %v4711_v16, %v4711_v16 }
 0x189   :  { %200 = vadd.xlane.f32.xlu0 %v199_v18 }
 0x18a   :  { %v202_v21 = vsel %vm66_vm0, %v4715_v19, 0.0  ;;  %v212_v22 = vmul.f32 %v4715_v19, %v4715_v19  ;;  %v219_v23 = vsel %vm66_vm0, %v211_v20, 0.0 }
 0x18b   :  { %203 = vadd.xlane.f32.xlu1 %v202_v21 }
 0x18c   :  { %v222_v24 = vsel %vm66_vm0, %v212_v22, 0.0 }
 0x18d   :  { %220 = vadd.xlane.f32.xlu0 %v219_v23 }
 0x18f   :  { %223 = vadd.xlane.f32.xlu1 %v222_v24 }
 0x208   :  { %v195_v34 = vpop.xlane.xlu0 %194 }
 0x209   :  { %v205_v35 = vmul.f32 0.015625, %v195_v34  ;;  %v279_v34 = vrot.slane %v3719_v30, %v278_v29 }
 0x20b   :  { %v229_v38 = vmul.f32 %v205_v35, %v205_v35  ;;  %v237_v62 = vsub.f32 %v4695_v63, %v205_v35 }
 0x20c   :  { %v198_v36 = vpop.xlane.xlu1 %197  ;;  %v215_v37 = vpop.xlane.xlu0 %214 }
 0x20d   :  { %v206_v39 = vmul.f32 0.015625, %v198_v36  ;;  %v225_v40 = vmul.f32 0.015625, %v215_v37  ;;  %v283_v36 = vrot.slane %v3719_v30, %v282_v32 }
 0x20f   :  { %v233_v41 = vsub.f32 %v225_v40, %v229_v38  ;;  %v230_v43 = vmul.f32 %v206_v39, %v206_v39  ;;  %v238_v3 = vsub.f32 %v4702_v5, %v206_v39 }
 0x210   :  { %v218_v42 = vpop.xlane.xlu1 %217 }
 0x211   :  { %v241_v44 = vadd.f32 1e-05, %v233_v41  ;;  %v226_v45 = vmul.f32 0.015625, %v218_v42 }
 0x212   :  { %v201_v46 = vpop.xlane.xlu0 %200 }
 0x213   :  { %4364 = vrsqrt.f32 %v241_v44  ;;  %v234_v47 = vsub.f32 %v226_v45, %v230_v43  ;;  %v207_v48 = vmul.f32 0.015625, %v201_v46 }
 0x214   :  { %v204_v49 = vpop.xlane.xlu1 %203 }
 0x215   :  { %v242_v50 = vadd.f32 1e-05, %v234_v47  ;;  %v208_v51 = vmul.f32 0.015625, %v204_v49  ;;  %v231_v53 = vmul.f32 %v207_v48, %v207_v48  ;;  %v239_v10 = vsub.f32 %v4711_v16, %v207_v48 }
 0x216   :  { %v221_v52 = vpop.xlane.xlu0 %220 }
 0x217   :  { %4366 = vrsqrt.f32 %v242_v50  ;;  %v227_v54 = vmul.f32 0.015625, %v221_v52  ;;  %v232_v56 = vmul.f32 %v208_v51, %v208_v51  ;;  %v240_v14 = vsub.f32 %v4715_v19, %v208_v51 }
 0x218   :  { %v224_v55 = vpop.xlane.xlu1 %223 }
 0x219   :  { %v235_v57 = vsub.f32 %v227_v54, %v231_v53  ;;  %v228_v58 = vmul.f32 0.015625, %v224_v55 }
 0x21b   :  { %v243_v59 = vadd.f32 1e-05, %v235_v57  ;;  %v236_v60 = vsub.f32 %v228_v58, %v232_v56 }
 0x21d   :  { %4368 = vrsqrt.f32 %v243_v59  ;;  %v244_v61 = vadd.f32 1e-05, %v236_v60 }
 0x21f   :  { %4370 = vrsqrt.f32 %v244_v61 }
 0x220   :  { %v4365_v0 = vpop.eup %4364 }
 0x221   :  { %v249_v1 = vmul.f32 %v4365_v0, %v237_v62 }
 0x223   :  { %v254_v7 = vmul.f32 %v253_v2, %v249_v1 }
 0x224   :  { %v4367_v4 = vpop.eup %4366 }
 0x225   :  { %v250_v6 = vmul.f32 %v4367_v4, %v238_v3  ;;  %v259_v11 = vadd.f32 %v258_v8, %v254_v7 }
 0x227   :  { %v255_v9 = vmul.f32 %v253_v2, %v250_v6 }
 0x229   :  { %v260_v12 = vadd.f32 %v258_v8, %v255_v9 }
 0x22a   :  { %v4369_v13 = vpop.eup %4368 }
 0x22b   :  { %v271_v15 = vpack.c.bf16 %v260_v12, %v259_v11  ;;  %v251_v17 = vmul.f32 %v4369_v13, %v239_v10 }
 0x22c   :  { %v4371_v18 = vpop.eup %4370 }
 0x22d   :  { %3728 = vmatmul.mubr.msk.bf16.vlgmr.msra.gmra.mxu1 %vm66_vm0, %v271_v15  ;;  %v252_v20 = vmul.f32 %v4371_v18, %v240_v14  ;;  %v256_v21 = vmul.f32 %v253_v2, %v251_v17 }
 0x22e   :  { %374 = vmatprep.mubr.bf16.mxu1 %v4608_v31 }
 0x22f   :  { %v257_v22 = vmul.f32 %v253_v2, %v252_v20  ;;  %v261_v23 = vadd.f32 %v258_v8, %v256_v21 }
 0x231   :  { %v262_v24 = vadd.f32 %v258_v8, %v257_v22 }
 0x233   :  { %v272_v25 = vpack.c.bf16 %v262_v24, %v261_v23 }
 0x235   :  { %3729 = vmatmul.mubr.msk.bf16.gmra.mxu1 %vm66_vm0, %v272_v25 }
 0x236   :  { %3953 = vmatprep.mubr.msk.bf16.mxu1 %vm4610_vm1, %v4609_v26 }
 0x2ed   :  { %v366_v33 = vpop.f32.mrf.mxu1 }
 0x2ee   :  { %v367_v38 = vadd.f32 %v366_v33, %v279_v34 }
 0x2ef   :  { %v368_v35 = vpop.f32.mrf.mxu1 }
 0x2f0   :  { %v369_v41 = vadd.f32 %v368_v35, %v283_v36 }
 0x2f1   :  { %v370_v37 = vpop.f32.mrf.mxu1 }
 0x2f2   :  { %v371_v39 = vadd.f32 %v370_v37, %v279_v34 }
 0x2f3   :  { %v372_v40 = vpop.f32.mrf.mxu1 }
 0x2f4   :  { %v4780_v42 = vpack.c.bf16 %v371_v39, %v367_v38  ;;  %v373_v43 = vadd.f32 %v372_v40, %v283_v36 }
 0x2f5   :  { %v376_v44 = vpop.f32.mrf.mxu1 }
 0x2f6   :  { %v4782_v45 = vpack.c.bf16 %v373_v43, %v369_v41  ;;  %390 = vrot.lane.b32.xlu0 %v4780_v42, %s4611_s28  ;;  %v377_v49 = vadd.f32 %v376_v44, %v279_v34 }
 0x2f7   :  { %v378_v46 = vpop.f32.mrf.mxu1 }
 0x2f8   :  { %v379_v47 = vadd.f32 %v378_v46, %v283_v36  ;;  %3952 = vmatpush3.bf16.msra.mxu1 %v4782_v45 }
 0x2f9   :  { %v380_v48 = vpop.f32.mrf.mxu1  ;;  %3963 = vmatprep.subr.bf16.mxu1 %v4609_v26 }
 0x2fa   :  { %v381_v50 = vadd.f32 %v380_v48, %v279_v34 }
 0x2fb   :  { %v382_v51 = vpop.f32.mrf.mxu1 }
 0x2fc   :  { %v4788_v52 = vpack.c.bf16 %v381_v50, %v377_v49  ;;  %v383_v53 = vadd.f32 %v382_v51, %v283_v36 }
 0x2fe   :  { %v4790_v54 = vpack.c.bf16 %v383_v53, %v379_v47  ;;  %441 = vrot.lane.b32.xlu1 %v4788_v52, %s4611_s28 }
 0x368   :  { %v391_v55 = vpop.permute.xlu0 %390 }
 0x369   :  { %v397_v56 = vsel %vm392_vm2, %v391_v55, 0 }
 0x36a   :  { %3940 = vmatpush3.bf16.xpose.msra.mxu0 %v397_v56 }
 0x36b   :  { %3945 = vmatprep.subr.bf16.mxu0 %v4609_v26 }
 0x370   :  { %v442_v57 = vpop.permute.xlu1 %441 }
 0x371   :  { %v447_v58 = vsel %vm392_vm2, %v442_v57, 0  ;;  %3942 = vmatmul.mubr.msk.bf16.vlgmr.msra.gmra.mxu0 %vm392_vm2, %v4780_v42 }
 0x372   :  { %3946 = vmatpush3.bf16.xpose.msra.mxu0 %v447_v58  ;;  %3947 = vmatprep.mubr.msk.bf16.mxu0 %vm4610_vm1, %v4609_v26 }
 0x373   :  { %3957 = vmatprep.subr.bf16.mxu0 %v4609_v26 }
 0x379   :  { %3948 = vmatmul.mubr.msk.bf16.vlgmr.msra.gmra.mxu0 %vm392_vm2, %v4788_v52 }
 0x37a   :  { %3958 = vmatpush3.bf16.msra.mxu0 %v4790_v54  ;;  %3959 = vmatprep.mubr.msk.bf16.mxu0 %vm4610_vm1, %v4609_v26 }
 0x37b   :  { %3969 = vmatprep.subr.bf16.mxu0 %v4609_v26 }
 0x431   :  { %v433_v59 = vpop.f32.mrf.mxu0 }
 0x432   :  { %v490_v60 = vsel %vm392_vm2, %v433_v59, -inf }
 0x433   :  { %491 = vmax.xlane.f32.xlu1 %v490_v60  ;;  %v3943_v61 = vpop.f32.mrf.mxu0 }
 0x435   :  { %v436_v62 = vpop.f32.mrf.mxu0 }
 0x436   :  { %v493_v0 = vsel %vm392_vm2, %v436_v62, -inf }
 0x437   :  { %494 = vmax.xlane.f32.xlu0 %v493_v0  ;;  %v3944_v1 = vpop.f32.mrf.mxu0 }
 0x439   :  { %v483_v2 = vpop.f32.mrf.mxu0 }
 0x43a   :  { %v496_v3 = vsel %vm392_vm2, %v483_v2, -inf }
 0x43b   :  { %497 = vmax.xlane.f32.xlu0 %v496_v3  ;;  %v3949_v4 = vpop.f32.mrf.mxu0 }
 0x43d   :  { %v486_v6 = vpop.f32.mrf.mxu0 }
 0x43e   :  { %v499_v7 = vsel %vm392_vm2, %v486_v6, -inf }
 0x43f   :  { %500 = vmax.xlane.f32.xlu1 %v499_v7  ;;  %v3950_v8 = vpop.f32.mrf.mxu0 }
 0x4bc   :  { %v492_v9 = vpop.xlane.xlu1 %491 }
 0x4bd   :  { %v502_v10 = vsub.f32 %v433_v59, %v492_v9 }
 0x4bf   :  { %v506_v11 = vmul.f32 1.442695, %v502_v10 }
 0x4c0   :  { %v495_v12 = vpop.xlane.xlu0 %494 }
 0x4c1   :  { %4372 = vpow2.f32 %v506_v11  ;;  %v503_v13 = vsub.f32 %v436_v62, %v495_v12 }
 0x4c3   :  { %v508_v14 = vmul.f32 1.442695, %v503_v13 }
 0x4c4   :  { %v498_v15 = vpop.xlane.xlu0 %497 }
 0x4c5   :  { %4374 = vpow2.f32 %v508_v14  ;;  %v504_v17 = vsub.f32 %v483_v2, %v498_v15 }
 0x4c7   :  { %v510_v18 = vmul.f32 1.442695, %v504_v17 }
 0x4c8   :  { %v501_v27 = vpop.xlane.xlu1 %500 }
 0x4c9   :  { %4376 = vpow2.f32 %v510_v18  ;;  %v505_v30 = vsub.f32 %v486_v6, %v501_v27 }
 0x4cb   :  { %v512_v33 = vmul.f32 1.442695, %v505_v30 }
 0x4cd   :  { %4378 = vpow2.f32 %v512_v33 }
 0x4ce   :  { %v4373_v20 = vpop.eup %4372 }
 0x4cf   :  { %v514_v21 = vsel %vm392_vm2, %v4373_v20, 0.0 }
 0x4d0   :  { %515 = vadd.xlane.f32.xlu0 %v514_v21 }
 0x4d2   :  { %v4375_v22 = vpop.eup %4374 }
 0x4d3   :  { %v517_v23 = vsel %vm392_vm2, %v4375_v22, 0.0 }
 0x4d4   :  { %518 = vadd.xlane.f32.xlu1 %v517_v23 }
 0x4d6   :  { %v4377_v24 = vpop.eup %4376 }
 0x4d7   :  { %v520_v25 = vsel %vm392_vm2, %v4377_v24, 0.0 }
 0x4d8   :  { %521 = vadd.xlane.f32.xlu0 %v520_v25 }
 0x4da   :  { %v4379_v34 = vpop.eup %4378 }
 0x4db   :  { %v523_v35 = vsel %vm392_vm2, %v4379_v34, 0.0 }
 0x4e5   :  { %677 = vrot.lane.b32.xlu1 %v4788_v52, %s4612_s0 }
 0x4ee   :  { %626 = vrot.lane.b32.xlu0 %v4780_v42, %s4612_s0 }
 0x509   :  { %524 = vadd.xlane.f32.xlu1 %v523_v35 }
 0x51a   :  { %624 = vrot.lane.b32.xlu1 %v4780_v42, %s4613_s29 }
 0x51e   :  { %675 = vrot.lane.b32.xlu1 %v4788_v52, %s4613_s29 }
 0x559   :  { %v516_v36 = vpop.xlane.xlu0 %515 }
 0x55a   :  { %4380 = vrcp.f32 %v516_v36 }
 0x55d   :  { %v519_v37 = vpop.xlane.xlu1 %518 }
 0x55e   :  { %4382 = vrcp.f32 %v519_v37 }
 0x561   :  { %v522_v38 = vpop.xlane.xlu0 %521  ;;  %v678_v48 = vpop.permute.xlu1 %677 }
 0x562   :  { %4384 = vrcp.f32 %v522_v38  ;;  %v683_v58 = vsel %vm392_vm2, %v678_v48, 0 }
 0x565   :  { %v627_v44 = vpop.permute.xlu0 %626 }
 0x566   :  { %v632_v47 = vsel %vm392_vm2, %v627_v44, 0 }
 0x567   :  { %v4381_v39 = vpop.eup %4380 }
 0x568   :  { %v530_v41 = vmul.f32 %v4381_v39, %v4373_v20 }
 0x56b   :  { %v4383_v40 = vpop.eup %4382 }
 0x56c   :  { %v531_v43 = vmul.f32 %v4383_v40, %v4375_v22 }
 0x56e   :  { %v534_v46 = vpack.c.bf16 %v531_v43, %v530_v41 }
 0x56f   :  { %v4385_v51 = vpop.eup %4384 }
 0x570   :  { %3954 = vmatmul.mubr.msk.bf16.vlgmr.msra.gmra.mxu1 %vm392_vm2, %v534_v46  ;;  %v532_v55 = vmul.f32 %v4385_v51, %v4377_v24 }
 0x571   :  { %3964 = vmatpush3.bf16.xpose.msra.mxu1 %v632_v47  ;;  %3965 = vmatprep.mubr.msk.bf16.mxu1 %vm4610_vm1, %v4609_v26 }
 0x572   :  { %3975 = vmatprep.subr.bf16.mxu1 %v4609_v26 }
 0x592   :  { %v525_v49 = vpop.xlane.xlu1 %524 }
 0x593   :  { %4386 = vrcp.f32 %v525_v49 }
 0x596   :  { %v625_v50 = vpop.permute.xlu1 %624 }
 0x597   :  { %3966 = vmatmul.mubr.msk.bf16.vlgmr.msra.gmra.mxu1 %vm392_vm2, %v625_v50 }
 0x598   :  { %3977 = vmatprep.mubr.msk.bf16.mxu1 %vm4610_vm1, %v4609_v26 }
 0x59a   :  { %v676_v59 = vpop.permute.xlu1 %675 }
 0x5a0   :  { %v4387_v53 = vpop.eup %4386 }
 0x5a1   :  { %v533_v56 = vmul.f32 %v4387_v53, %v4379_v34 }
 0x5a3   :  { %v535_v57 = vpack.c.bf16 %v533_v56, %v532_v55 }
 0x5a5   :  { %3960 = vmatmul.mubr.msk.bf16.vlgmr.msra.gmra.mxu0 %vm392_vm2, %v535_v57 }
 0x5a6   :  { %3970 = vmatpush3.bf16.xpose.msra.mxu0 %v683_v58  ;;  %3971 = vmatprep.mubr.msk.bf16.mxu0 %vm4610_vm1, %v4609_v26 }
 0x5a7   :  { %3981 = vmatprep.subr.bf16.mxu0 %v4609_v26 }
 0x5ad   :  { %3972 = vmatmul.mubr.msk.bf16.vlgmr.msra.gmra.mxu0 %vm392_vm2, %v676_v59 }
 0x5ae   :  { %3983 = vmatprep.mubr.msk.bf16.mxu0 %vm4610_vm1, %v4609_v26 }
 0x630   :  { %v4840_v60 = vpop.f32.mrf.mxu1 }
 0x632   :  { %v3955_v61 = vpop.f32.mrf.mxu1 }
 0x634   :  { %v4842_v62 = vpop.f32.mrf.mxu1 }
 0x636   :  { %v3956_v0 = vpop.f32.mrf.mxu1 }
 0x657   :  { %v668_v1 = vpop.f32.mrf.mxu1 }
 0x658   :  { %v726_v2 = vsel %vm392_vm2, %v668_v1, -inf }
 0x659   :  { %727 = vmax.xlane.f32.xlu0 %v726_v2  ;;  %v3967_v3 = vpop.f32.mrf.mxu1 }
 0x65b   :  { %v671_v4 = vpop.f32.mrf.mxu1 }
 0x65c   :  { %v729_v6 = vsel %vm392_vm2, %v671_v4, -inf }
 0x65d   :  { %730 = vmax.xlane.f32.xlu1 %v729_v6  ;;  %v3968_v7 = vpop.f32.mrf.mxu1 }
 0x665   :  { %v4846_v8 = vpop.f32.mrf.mxu0 }
 0x667   :  { %v3961_v9 = vpop.f32.mrf.mxu0 }
 0x669   :  { %v4848_v10 = vpop.f32.mrf.mxu0 }
 0x66b   :  { %v3962_v11 = vpop.f32.mrf.mxu0 }
 0x66d   :  { %v719_v12 = vpop.f32.mrf.mxu0 }
 0x66e   :  { %v732_v13 = vsel %vm392_vm2, %v719_v12, -inf }
 0x66f   :  { %733 = vmax.xlane.f32.xlu0 %v732_v13  ;;  %v3973_v14 = vpop.f32.mrf.mxu0 }
 0x671   :  { %v722_v15 = vpop.f32.mrf.mxu0 }
 0x672   :  { %v735_v17 = vsel %vm392_vm2, %v722_v15, -inf }
 0x673   :  { %736 = vmax.xlane.f32.xlu0 %v735_v17  ;;  %v3974_v18 = vpop.f32.mrf.mxu0 }
 0x6e2   :  { %v728_v20 = vpop.xlane.xlu0 %727 }
 0x6e3   :  { %v738_v21 = vsub.f32 %v668_v1, %v728_v20 }
 0x6e5   :  { %v742_v22 = vmul.f32 1.442695, %v738_v21 }
 0x6e6   :  { %v731_v23 = vpop.xlane.xlu1 %730 }
 0x6e7   :  { %4388 = vpow2.f32 %v742_v22  ;;  %v739_v24 = vsub.f32 %v671_v4, %v731_v23 }
 0x6e9   :  { %v744_v25 = vmul.f32 1.442695, %v739_v24 }
 0x6eb   :  { %4390 = vpow2.f32 %v744_v25 }
 0x6f4   :  { %v4389_v27 = vpop.eup %4388 }
 0x6f5   :  { %v750_v30 = vsel %vm392_vm2, %v4389_v27, 0.0 }
 0x6f6   :  { %751 = vadd.xlane.f32.xlu0 %v750_v30 }
 0x6f8   :  { %v4391_v33 = vpop.eup %4390  ;;  %v734_v34 = vpop.xlane.xlu0 %733 }
 0x6f9   :  { %v740_v35 = vsub.f32 %v719_v12, %v734_v34  ;;  %v753_v36 = vsel %vm392_vm2, %v4391_v33, 0.0 }
 0x6fa   :  { %754 = vadd.xlane.f32.xlu1 %v753_v36 }
 0x6fb   :  { %v746_v37 = vmul.f32 1.442695, %v740_v35 }
 0x6fc   :  { %v737_v40 = vpop.xlane.xlu0 %736 }
 0x6fd   :  { %4392 = vpow2.f32 %v746_v37  ;;  %v741_v41 = vsub.f32 %v722_v15, %v737_v40 }
 0x6ff   :  { %v748_v43 = vmul.f32 1.442695, %v741_v41 }
 0x701   :  { %4394 = vpow2.f32 %v748_v43 }
 0x70a   :  { %v4393_v38 = vpop.eup %4392 }
 0x70b   :  { %821 = vrot.lane.b32.xlu1 %v4790_v54, %s4613_s29  ;;  %v756_v39 = vsel %vm392_vm2, %v4393_v38, 0.0 }
 0x70c   :  { %757 = vadd.xlane.f32.xlu0 %v756_v39 }
 0x70e   :  { %v4395_v44 = vpop.eup %4394 }
 0x70f   :  { %870 = vrot.lane.b32.xlu1 %v4780_v42, %s4614_s30  ;;  %v759_v46 = vsel %vm392_vm2, %v4395_v44, 0.0 }
 0x722   :  { %773 = vrot.lane.b32.xlu0 %v4782_v45, %s4613_s29 }
 0x726   :  { %868 = vrot.lane.b32.xlu0 %v4780_v42, %s4615_s5 }
 0x733   :  { %760 = vadd.xlane.f32.xlu1 %v759_v46 }
 0x744   :  { %921 = vrot.lane.b32.xlu1 %v4788_v52, %s4614_s30 }
 0x748   :  { %919 = vrot.lane.b32.xlu1 %v4788_v52, %s4615_s5 }
 0x77f   :  { %v752_v48 = vpop.xlane.xlu0 %751 }
 0x783   :  { %v755_v47 = vpop.xlane.xlu1 %754 }
 0x784   :  { %4396 = vrcp.f32 %v755_v47 }
 0x785   :  { %4398 = vrcp.f32 %v752_v48 }
 0x787   :  { %v822_v49 = vpop.permute.xlu1 %821 }
 0x788   :  { %3982 = vmatpush3.bf16.msra.mxu0 %v822_v49 }
 0x789   :  { %3993 = vmatprep.subr.bf16.mxu0 %v4609_v26 }
 0x78b   :  { %v871_v58 = vpop.permute.xlu1 %870 }
 0x78c   :  { %v876_v61 = vsel %vm392_vm2, %v871_v58, 0 }
 0x791   :  { %v4397_v50 = vpop.eup %4396 }
 0x792   :  { %v4399_v53 = vpop.eup %4398  ;;  %v767_v55 = vmul.f32 %v4397_v50, %v4391_v33 }
 0x793   :  { %v766_v57 = vmul.f32 %v4399_v53, %v4389_v27 }
 0x795   :  { %v758_v51 = vpop.xlane.xlu0 %757  ;;  %v770_v59 = vpack.c.bf16 %v767_v55, %v766_v57 }
 0x796   :  { %4400 = vrcp.f32 %v758_v51 }
 0x799   :  { %v774_v56 = vpop.permute.xlu0 %773 }
 0x79a   :  { %3976 = vmatpush3.bf16.msra.mxu1 %v774_v56 }
 0x79b   :  { %3987 = vmatprep.subr.bf16.mxu1 %v4609_v26 }
 0x79d   :  { %3978 = vmatmul.mubr.msk.bf16.vlgmr.msra.gmra.mxu1 %vm392_vm2, %v770_v59  ;;  %v869_v0 = vpop.permute.xlu0 %868 }
 0x79e   :  { %3988 = vmatpush3.bf16.xpose.msra.mxu1 %v876_v61  ;;  %3989 = vmatprep.mubr.msk.bf16.mxu1 %vm4610_vm1, %v4609_v26 }
 0x79f   :  { %3999 = vmatprep.subr.bf16.mxu1 %v4609_v26 }
 0x7a3   :  { %v4401_v2 = vpop.eup %4400 }
 0x7a4   :  { %v768_v4 = vmul.f32 %v4401_v2, %v4393_v38 }
 0x7a5   :  { %3990 = vmatmul.mubr.msk.bf16.vlgmr.msra.gmra.mxu1 %vm392_vm2, %v869_v0 }
 0x7a6   :  { %4001 = vmatprep.mubr.msk.bf16.mxu1 %vm4610_vm1, %v4609_v26 }
 0x7bc   :  { %v761_v1 = vpop.xlane.xlu1 %760 }
 0x7bd   :  { %4402 = vrcp.f32 %v761_v1 }
 0x7c0   :  { %v922_v7 = vpop.permute.xlu1 %921 }
 0x7c1   :  { %v927_v11 = vsel %vm392_vm2, %v922_v7, 0 }
 0x7c4   :  { %v920_v12 = vpop.permute.xlu1 %919 }
 0x7ca   :  { %v4403_v3 = vpop.eup %4402 }
 0x7cb   :  { %v769_v6 = vmul.f32 %v4403_v3, %v4395_v44 }
 0x7cd   :  { %v771_v9 = vpack.c.bf16 %v769_v6, %v768_v4 }
 0x7cf   :  { %3984 = vmatmul.mubr.msk.bf16.vlgmr.msra.gmra.mxu0 %vm392_vm2, %v771_v9 }
 0x7d0   :  { %3994 = vmatpush3.bf16.xpose.msra.mxu0 %v927_v11  ;;  %3995 = vmatprep.mubr.msk.bf16.mxu0 %vm4610_vm1, %v4609_v26 }
 0x7d1   :  { %4005 = vmatprep.subr.bf16.mxu0 %v4609_v26 }
 0x7d7   :  { %3996 = vmatmul.mubr.msk.bf16.vlgmr.msra.gmra.mxu0 %vm392_vm2, %v920_v12 }
 0x7d8   :  { %4007 = vmatprep.mubr.msk.bf16.mxu0 %vm4610_vm1, %v4609_v26 }
 0x85d   :  { %v4886_v13 = vpop.f32.mrf.mxu1 }
 0x85f   :  { %v3979_v14 = vpop.f32.mrf.mxu1 }
 0x861   :  { %v4888_v15 = vpop.f32.mrf.mxu1 }
 0x862   :  { %v4234_v17 = vpack.i.bf16 %v4888_v15, %v4886_v13 }
 0x863   :  { %v3980_v18 = vpop.f32.mrf.mxu1 }
 0x865   :  { %v912_v20 = vpop.f32.mrf.mxu1 }
 0x866   :  { %v970_v21 = vsel %vm392_vm2, %v912_v20, -inf }
 0x867   :  { %971 = vmax.xlane.f32.xlu0 %v970_v21  ;;  %v3991_v22 = vpop.f32.mrf.mxu1 }
 0x869   :  { %v915_v23 = vpop.f32.mrf.mxu1 }
 0x86a   :  { %v973_v24 = vsel %vm392_vm2, %v915_v23, -inf }
 0x86b   :  { %974 = vmax.xlane.f32.xlu1 %v973_v24  ;;  %v3992_v25 = vpop.f32.mrf.mxu1 }
 0x88f   :  { %v4894_v27 = vpop.f32.mrf.mxu0 }
 0x891   :  { %v3985_v30 = vpop.f32.mrf.mxu0 }
 0x893   :  { %v4896_v33 = vpop.f32.mrf.mxu0 }
 0x894   :  { %v4239_v34 = vpack.i.bf16 %v4896_v33, %v4894_v27 }
 0x895   :  { %v3986_v35 = vpop.f32.mrf.mxu0 }
 0x897   :  { %v963_v36 = vpop.f32.mrf.mxu0 }
 0x898   :  { %v976_v37 = vsel %vm392_vm2, %v963_v36, -inf }
 0x899   :  { %977 = vmax.xlane.f32.xlu0 %v976_v37  ;;  %v3997_v38 = vpop.f32.mrf.mxu0 }
 0x89b   :  { %v966_v39 = vpop.f32.mrf.mxu0 }
 0x89c   :  { %v979_v40 = vsel %vm392_vm2, %v966_v39, -inf }
 0x89d   :  { %980 = vmax.xlane.f32.xlu0 %v979_v40  ;;  %v3998_v41 = vpop.f32.mrf.mxu0 }
 0x8f0   :  { %v972_v43 = vpop.xlane.xlu0 %971 }
 0x8f1   :  { %v982_v44 = vsub.f32 %v912_v20, %v972_v43 }
 0x8f3   :  { %v986_v46 = vmul.f32 1.442695, %v982_v44 }
 0x8f4   :  { %v975_v47 = vpop.xlane.xlu1 %974 }
 0x8f5   :  { %4404 = vpow2.f32 %v986_v46  ;;  %v983_v48 = vsub.f32 %v915_v23, %v975_v47 }
 0x8f7   :  { %v988_v49 = vmul.f32 1.442695, %v983_v48 }
 0x8f9   :  { %4406 = vpow2.f32 %v988_v49 }
 0x902   :  { %v4405_v50 = vpop.eup %4404 }
 0x903   :  { %v994_v51 = vsel %vm392_vm2, %v4405_v50, 0.0 }
 0x904   :  { %995 = vadd.xlane.f32.xlu0 %v994_v51 }
 0x906   :  { %v4407_v53 = vpop.eup %4406 }
 0x907   :  { %v997_v55 = vsel %vm392_vm2, %v4407_v53, 0.0 }
 0x908   :  { %998 = vadd.xlane.f32.xlu1 %v997_v55 }
 0x919   :  { %1063 = vrot.lane.b32.xlu1 %v4790_v54, %s4615_s5 }
 0x91d   :  { %1112 = vrot.lane.b32.xlu1 %v4780_v42, %s4616_s6 }
 0x922   :  { %v978_v56 = vpop.xlane.xlu0 %977 }
 0x923   :  { %v984_v57 = vsub.f32 %v963_v36, %v978_v56 }
 0x925   :  { %v990_v58 = vmul.f32 1.442695, %v984_v57 }
 0x926   :  { %v981_v59 = vpop.xlane.xlu0 %980 }
 0x927   :  { %4408 = vpow2.f32 %v990_v58  ;;  %v985_v61 = vsub.f32 %v966_v39, %v981_v59 }
 0x929   :  { %v992_v0 = vmul.f32 1.442695, %v985_v61 }
 0x92b   :  { %4410 = vpow2.f32 %v992_v0 }
 0x934   :  { %v4409_v1 = vpop.eup %4408 }
 0x935   :  { %v1000_v2 = vsel %vm392_vm2, %v4409_v1, 0.0 }
 0x936   :  { %1001 = vadd.xlane.f32.xlu0 %v1000_v2 }
 0x938   :  { %v4411_v3 = vpop.eup %4410 }
 0x939   :  { %v1003_v4 = vsel %vm392_vm2, %v4411_v3, 0.0 }
 0x941   :  { %1004 = vadd.xlane.f32.xlu1 %v1003_v4 }
 0x94c   :  { %1016 = vrot.lane.b32.xlu0 %v4782_v45, %s4615_s5 }
 0x950   :  { %1110 = vrot.lane.b32.xlu0 %v4780_v42, %s4617_s7 }
 0x952   :  { %1163 = vrot.lane.b32.xlu1 %v4788_v52, %s4616_s6 }
 0x956   :  { %1161 = vrot.lane.b32.xlu1 %v4788_v52, %s4617_s7 }
 0x98d   :  { %v996_v9 = vpop.xlane.xlu0 %995 }
 0x991   :  { %v999_v6 = vpop.xlane.xlu1 %998 }
 0x992   :  { %4412 = vrcp.f32 %v999_v6 }
 0x993   :  { %4414 = vrcp.f32 %v996_v9 }
 0x995   :  { %v1064_v7 = vpop.permute.xlu1 %1063 }
 0x996   :  { %4006 = vmatpush3.bf16.msra.mxu0 %v1064_v7 }
 0x997   :  { %4017 = vmatprep.subr.bf16.mxu0 %v4609_v26 }
 0x999   :  { %v1113_v21 = vpop.permute.xlu1 %1112 }
 0x99a   :  { %v1118_v52 = vsel %vm392_vm2, %v1113_v21, 0 }
 0x99f   :  { %v4413_v11 = vpop.eup %4412 }
 0x9a0   :  { %v4415_v14 = vpop.eup %4414  ;;  %v1011_v18 = vmul.f32 %v4413_v11, %v4407_v53 }
 0x9a1   :  { %v1010_v42 = vmul.f32 %v4415_v14, %v4405_v50 }
 0x9a3   :  { %v1014_v22 = vpack.c.bf16 %v1011_v18, %v1010_v42 }
 0x9bf   :  { %v1002_v12 = vpop.xlane.xlu0 %1001 }
 0x9c0   :  { %4416 = vrcp.f32 %v1002_v12 }
 0x9c3   :  { %v1017_v20 = vpop.permute.xlu0 %1016 }
 0x9c4   :  { %4000 = vmatpush3.bf16.msra.mxu1 %v1017_v20 }
 0x9c5   :  { %4011 = vmatprep.subr.bf16.mxu1 %v4609_v26 }
 0x9c7   :  { %4002 = vmatmul.mubr.msk.bf16.vlgmr.msra.gmra.mxu1 %vm392_vm2, %v1014_v22  ;;  %v1111_v24 = vpop.permute.xlu0 %1110 }
 0x9c8   :  { %4012 = vmatpush3.bf16.xpose.msra.mxu1 %v1118_v52  ;;  %4013 = vmatprep.mubr.msk.bf16.mxu1 %vm4610_vm1, %v4609_v26 }
 0x9c9   :  { %4023 = vmatprep.subr.bf16.mxu1 %v4609_v26 }
 0x9ca   :  { %v1005_v23 = vpop.xlane.xlu1 %1004 }
 0x9cb   :  { %4418 = vrcp.f32 %v1005_v23 }
 0x9cd   :  { %v4417_v25 = vpop.eup %4416 }
 0x9ce   :  { %v1012_v35 = vmul.f32 %v4417_v25, %v4409_v1  ;;  %v1164_v37 = vpop.permute.xlu1 %1163 }
 0x9cf   :  { %4014 = vmatmul.mubr.msk.bf16.vlgmr.msra.gmra.mxu1 %vm392_vm2, %v1111_v24  ;;  %v1169_v39 = vsel %vm392_vm2, %v1164_v37, 0 }
 0x9d0   :  { %4025 = vmatprep.mubr.msk.bf16.mxu1 %vm4610_vm1, %v4609_v26 }
 0x9d2   :  { %v1162_v40 = vpop.permute.xlu1 %1161 }
 0x9d8   :  { %v4419_v30 = vpop.eup %4418 }
 0x9d9   :  { %v1013_v36 = vmul.f32 %v4419_v30, %v4411_v3 }
 0x9db   :  { %v1015_v38 = vpack.c.bf16 %v1013_v36, %v1012_v35 }
 0x9dd   :  { %4008 = vmatmul.mubr.msk.bf16.vlgmr.msra.gmra.mxu0 %vm392_vm2, %v1015_v38 }
 0x9de   :  { %4018 = vmatpush3.bf16.xpose.msra.mxu0 %v1169_v39  ;;  %4019 = vmatprep.mubr.msk.bf16.mxu0 %vm4610_vm1, %v4609_v26 }
 0x9df   :  { %4029 = vmatprep.subr.bf16.mxu0 %v4609_v26 }
 0x9e5   :  { %4020 = vmatmul.mubr.msk.bf16.vlgmr.msra.gmra.mxu0 %vm392_vm2, %v1162_v40 }
 0x9e6   :  { %4031 = vmatprep.mubr.msk.bf16.mxu0 %vm4610_vm1, %v4609_v26 }
 0xa87   :  { %v1056_v41 = vpop.f32.mrf.mxu1 }
 0xa89   :  { %v4003_v43 = vpop.f32.mrf.mxu1 }
 0xa8b   :  { %v1059_v44 = vpop.f32.mrf.mxu1 }
 0xa8c   :  { %v4244_v46 = vpack.i.bf16 %v1059_v44, %v1056_v41 }
 0xa8d   :  { %v4004_v47 = vpop.f32.mrf.mxu1 }
 0xa8f   :  { %v1154_v48 = vpop.f32.mrf.mxu1 }
 0xa90   :  { %v1212_v49 = vsel %vm392_vm2, %v1154_v48, -inf }
 0xa91   :  { %1213 = vmax.xlane.f32.xlu0 %v1212_v49  ;;  %v4015_v50 = vpop.f32.mrf.mxu1 }
 0xa92   :  { %v4312_v50 = vld [vmem:[%s5612_s1 + $0xb0] ss:$8 sps:$4 sm:$0xff]  }
 0xa93   :  { %v1157_v51 = vpop.f32.mrf.mxu1 }
 0xa94   :  { %v1215_v53 = vsel %vm392_vm2, %v1157_v51, -inf }
 0xa95   :  { %1216 = vmax.xlane.f32.xlu1 %v1215_v53  ;;  %v4016_v55 = vpop.f32.mrf.mxu1 }
 0xa96   :  { %v4314_v55 = vld [vmem:[%s5612_s1 + $0x90] ss:$8 sps:$4 sm:$0xff]  }
 0xa9d   :  { %v1103_v56 = vpop.f32.mrf.mxu0 }
 0xa9f   :  { %v4009_v57 = vpop.f32.mrf.mxu0 }
 0xaa1   :  { %v1106_v58 = vpop.f32.mrf.mxu0 }
 0xaa2   :  { %v4249_v59 = vpack.i.bf16 %v1106_v58, %v1103_v56 }
 0xaa3   :  { %v4010_v61 = vpop.f32.mrf.mxu0 }
 0xaa4   :  { %v4315_v61 = vld [vmem:[%s5612_s1 + $0x80] ss:$8 sps:$4 sm:$0xff]  }
 0xaa5   :  { %v1205_v0 = vpop.f32.mrf.mxu0 }
 0xaa6   :  { %v1218_v1 = vsel %vm392_vm2, %v1205_v0, -inf }
 0xaa7   :  { %1219 = vmax.xlane.f32.xlu0 %v1218_v1  ;;  %v4021_v2 = vpop.f32.mrf.mxu0 }
 0xaa9   :  { %v1208_v3 = vpop.f32.mrf.mxu0 }
 0xaaa   :  { %v1221_v4 = vsel %vm392_vm2, %v1208_v3, -inf }
 0xaab   :  { %1222 = vmax.xlane.f32.xlu0 %v1221_v4  ;;  %v4022_v6 = vpop.f32.mrf.mxu0 }
 0xb1a   :  { %v1214_v7 = vpop.xlane.xlu0 %1213 }
 0xb1b   :  { %v1224_v9 = vsub.f32 %v1154_v48, %v1214_v7 }
 0xb1d   :  { %v1228_v11 = vmul.f32 1.442695, %v1224_v9 }
 0xb1e   :  { %v1217_v12 = vpop.xlane.xlu1 %1216 }
 0xb1f   :  { %4420 = vpow2.f32 %v1228_v11  ;;  %v1225_v14 = vsub.f32 %v1157_v51, %v1217_v12  ;;  %v4313_v51 = vld [vmem:[%s5612_s1 + $0xa0] ss:$8 sps:$4 sm:$0xff]  }
 0xb21   :  { %v1230_v18 = vmul.f32 1.442695, %v1225_v14 }
 0xb23   :  { %4422 = vpow2.f32 %v1230_v18 }
 0xb2c   :  { %v4421_v20 = vpop.eup %4420 }
 0xb2d   :  { %v1236_v42 = vsel %vm392_vm2, %v4421_v20, 0.0 }
 0xb2e   :  { %1237 = vadd.xlane.f32.xlu0 %v1236_v42 }
 0xb30   :  { %v4423_v21 = vpop.eup %4422  ;;  %v1220_v22 = vpop.xlane.xlu0 %1219 }
 0xb31   :  { %v1226_v52 = vsub.f32 %v1205_v0, %v1220_v22  ;;  %v1239_v23 = vsel %vm392_vm2, %v4423_v21, 0.0 }
 0xb32   :  { %1240 = vadd.xlane.f32.xlu1 %v1239_v23 }
 0xb33   :  { %v1232_v24 = vmul.f32 1.442695, %v1226_v52 }
 0xb34   :  { %v1223_v25 = vpop.xlane.xlu0 %1222 }
 0xb35   :  { %4424 = vpow2.f32 %v1232_v24  ;;  %v1227_v30 = vsub.f32 %v1208_v3, %v1223_v25 }
 0xb37   :  { %v1234_v35 = vmul.f32 1.442695, %v1227_v30 }
 0xb39   :  { %4426 = vpow2.f32 %v1234_v35 }
 0xb42   :  { %v4425_v36 = vpop.eup %4424 }
 0xb43   :  { %v1242_v37 = vsel %vm392_vm2, %v4425_v36, 0.0 }
 0xb44   :  { %1243 = vadd.xlane.f32.xlu0 %v1242_v37 }
 0xb46   :  { %v4427_v38 = vpop.eup %4426 }
 0xb47   :  { %v1245_v39 = vsel %vm392_vm2, %v4427_v38, 0.0 }
 0xb48   :  { %1246 = vadd.xlane.f32.xlu1 %v1245_v39 }
 0xb59   :  { %1305 = vrot.lane.b32.xlu1 %v4790_v54, %s4617_s7 }
 0xb5a   :  { %1258 = vrot.lane.b32.xlu0 %v4782_v45, %s4617_s7 }
 0xb5d   :  { %4235 = vrot.lane.b32.xlu1 %v4234_v17, %s4616_s6 }
 0xb5e   :  { %4245 = vrot.lane.b32.xlu0 %v4244_v46, %s4614_s30 }
 0xb61   :  { %4240 = vrot.lane.b32.xlu1 %v4239_v34, %s4616_s6 }
 0xb65   :  { %4250 = vrot.lane.b32.xlu1 %v4249_v59, %s4614_s30 }
 0xbb7   :  { %v1238_v41 = vpop.xlane.xlu0 %1237 }
 0xbbb   :  { %v1241_v40 = vpop.xlane.xlu1 %1240 }
 0xbbc   :  { %4428 = vrcp.f32 %v1241_v40 }
 0xbbd   :  { %4430 = vrcp.f32 %v1238_v41 }
 0xbc9   :  { %v4429_v54 = vpop.eup %4428 }
 0xbca   :  { %v4431_v43 = vpop.eup %4430  ;;  %v1253_v44 = vmul.f32 %v4429_v54, %v4423_v21 }
 0xbcb   :  { %v1252_v17 = vmul.f32 %v4431_v43, %v4421_v20 }
 0xbcd   :  { %v1244_v45 = vpop.xlane.xlu0 %1243  ;;  %v1256_v46 = vpack.c.bf16 %v1253_v44, %v1252_v17 }
 0xbce   :  { %4432 = vrcp.f32 %v1244_v45 }
 0xbd1   :  { %v1247_v13 = vpop.xlane.xlu1 %1246  ;;  %v1259_v15 = vpop.permute.xlu0 %1258 }
 0xbd2   :  { %4434 = vrcp.f32 %v1247_v13  ;;  %4024 = vmatpush3.bf16.msra.mxu1 %v1259_v15 }
 0xbd3   :  { %4035 = vmatprep.subr.bf16.mxu1 %v4312_v50 }
 0xbd5   :  { %v1306_v47 = vpop.permute.xlu1 %1305  ;;  %4026 = vmatmul.mubr.msk.bf16.vlgmr.msra.gmra.mxu1 %vm392_vm2, %v1256_v46  ;;  %v4246_v11 = vpop.permute.xlu0 %4245 }
 0xbd6   :  { %4030 = vmatpush3.bf16.msra.mxu0 %v1306_v47  ;;  %4036 = vmatpush3.bf16.msra.mxu1 %v4312_v50  ;;  %v4248_v18 = vunpack.i.h.bf16 %v4246_v11  ;;  %v4247_v20 = vunpack.i.l.bf16 %v4246_v11 }
 0xbd7   :  { %4037 = vmatprep.subr.bf16.mxu1 %v4313_v51 }
 0xbd9   :  { %v4236_v6 = vpop.permute.xlu1 %4235 }
 0xbda   :  { %4038 = vmatpush3.bf16.msra.mxu1 %v4313_v51  ;;  %v4238_v7 = vunpack.i.h.bf16 %v4236_v6  ;;  %v4237_v9 = vunpack.i.l.bf16 %v4236_v6  ;;  %v4318_v6 = vld [vmem:[%s5612_s1 + $0xd0] ss:$8 sps:$4 sm:$0xff]  }
 0xbdb   :  { %v4433_v27 = vpop.eup %4432  ;;  %4039 = vmatprep.subr.bf16.mxu1 %v4314_v55 }
 0xbdc   :  { %v1254_v34 = vmul.f32 %v4433_v27, %v4425_v36  ;;  %v1401_v12 = vsel %vm392_vm2, %v4842_v62, %v4238_v7  ;;  %v1400_v14 = vsel %vm392_vm2, %v4840_v60, %v4237_v9  ;;  %v4319_v7 = vld [vmem:[%s5612_s1 + $0xc0] ss:$8 sps:$4 sm:$0xff]  }
 0xbdd   :  { %v1405_v52 = vsel %vm1404_vm3, %v1400_v14, %v4247_v20  ;;  %v1406_v23 = vsel %vm1404_vm3, %v1401_v12, %v4248_v18  ;;  %v4241_v30 = vpop.permute.xlu1 %4240 }
 0xbde   :  { %4040 = vmatpush3.bf16.msra.mxu1 %v4314_v55  ;;  %v4243_v35 = vunpack.i.h.bf16 %v4241_v30  ;;  %v4242_v36 = vunpack.i.l.bf16 %v4241_v30 }
 0xbdf   :  { %v4435_v33 = vpop.eup %4434  ;;  %4041 = vmatprep.subr.bf16.mxu1 %v4315_v61 }
 0xbe0   :  { %v1255_v48 = vmul.f32 %v4435_v33, %v4427_v38  ;;  %v1403_v40 = vsel %vm392_vm2, %v4848_v10, %v4243_v35  ;;  %v1402_v41 = vsel %vm392_vm2, %v4846_v8, %v4242_v36  ;;  %v1424_v10 = vld [vmem:[%s5613_s2 + $0x6] ss:$0 sm:$0xff] }
 0xbe1   :  { %v4251_v60 = vpop.permute.xlu1 %4250 }
 0xbe2   :  { %v1257_v49 = vpack.c.bf16 %v1255_v48, %v1254_v34  ;;  %4042 = vmatpush3.bf16.msra.mxu1 %v4315_v61  ;;  %v4253_v37 = vunpack.i.h.bf16 %v4251_v60  ;;  %v4252_v38 = vunpack.i.l.bf16 %v4251_v60 }
 0xbe4   :  { %4032 = vmatmul.mubr.msk.bf16.vlgmr.msra.gmra.mxu0 %vm392_vm2, %v1257_v49  ;;  %v1407_v43 = vsel %vm1404_vm3, %v1402_v41, %v4252_v38  ;;  %v1408_v44 = vsel %vm1404_vm3, %v1403_v40, %v4253_v37 }
 0xc95   :  { %v1298_v53 = vpop.f32.mrf.mxu1 }
 0xc97   :  { %v4027_v56 = vpop.f32.mrf.mxu1 }
 0xc99   :  { %v1301_v57 = vpop.f32.mrf.mxu1 }
 0xc9a   :  { %v4254_v58 = vpack.i.bf16 %v1301_v57, %v1298_v53 }
 0xc9b   :  { %v4028_v59 = vpop.f32.mrf.mxu1 }
 0xc9c   :  { %4255 = vrot.lane.b32.xlu0 %v4254_v58, %s4612_s0 }
 0xca4   :  { %v1345_v0 = vpop.f32.mrf.mxu0 }
 0xca6   :  { %v4033_v1 = vpop.f32.mrf.mxu0 }
 0xca8   :  { %v1348_v2 = vpop.f32.mrf.mxu0 }
 0xca9   :  { %v4259_v3 = vpack.i.bf16 %v1348_v2, %v1345_v0 }
 0xcaa   :  { %v4034_v4 = vpop.f32.mrf.mxu0 }
 0xcab   :  { %4260 = vrot.lane.b32.xlu1 %v4259_v3, %s4612_s0  ;;  %v4316_v3 = vld [vmem:[%s5612_s1 + $0xf0] ss:$8 sps:$4 sm:$0xff]   ;;  %v4317_v4 = vld [vmem:[%s5612_s1 + $0xe0] ss:$8 sps:$4 sm:$0xff]  }
 0xcac   :  { %4047 = vmatprep.subr.bf16.mxu0 %v4316_v3 }
 0xcad   :  { %4048 = vmatpush3.bf16.msra.mxu0 %v4316_v3 }
 0xcae   :  { %4049 = vmatprep.subr.bf16.mxu0 %v4317_v4 }
 0xcb1   :  { %4050 = vmatpush3.bf16.msra.mxu0 %v4317_v4  ;;  %v4320_v4 = vld [vmem:[%s5612_s1 + $0x170] ss:$8 sps:$4 sm:$0xff]  }
 0xcb2   :  { %4051 = vmatprep.subr.bf16.mxu0 %v4318_v6  ;;  %4059 = vmatprep.subr.bf16.mxu1 %v4320_v4 }
 0xcb5   :  { %4052 = vmatpush3.bf16.msra.mxu0 %v4318_v6  ;;  %v4321_v6 = vld [vmem:[%s5612_s1 + $0x160] ss:$8 sps:$4 sm:$0xff]  }
 0xcb6   :  { %4053 = vmatprep.subr.bf16.mxu0 %v4319_v7 }
 0xcb9   :  { %4054 = vmatpush3.bf16.msra.mxu0 %v4319_v7  ;;  %v4322_v7 = vld [vmem:[%s5612_s1 + $0x150] ss:$8 sps:$4 sm:$0xff]  }
 0xd0e   :  { %v4256_v42 = vpop.permute.xlu0 %4255 }
 0xd0f   :  { %v4258_v21 = vunpack.i.h.bf16 %v4256_v42  ;;  %v4257_v22 = vunpack.i.l.bf16 %v4256_v42 }
 0xd11   :  { %v1410_v24 = vsel %vm1409_vm4, %v1405_v52, %v4257_v22  ;;  %v1411_v25 = vsel %vm1409_vm4, %v1406_v23, %v4258_v21 }
 0xd12   :  { %v1422_v62 = vpack.c.bf16 %v1411_v25, %v1410_v24 }
 0xd14   :  { %4043 = vmatprep.mubr.msk.bf16.mxu1 %vm66_vm0, %v1422_v62 }
 0xd1d   :  { %v4261_v39 = vpop.permute.xlu1 %4260 }
 0xd1e   :  { %v4263_v54 = vunpack.i.h.bf16 %v4261_v39  ;;  %v4262_v45 = vunpack.i.l.bf16 %v4261_v39 }
 0xd20   :  { %v1413_v13 = vsel %vm1409_vm4, %v1408_v44, %v4263_v54  ;;  %v1412_v15 = vsel %vm1409_vm4, %v1407_v43, %v4262_v45 }
 0xd21   :  { %v1423_v17 = vpack.c.bf16 %v1413_v13, %v1412_v15 }
 0xd23   :  { %4044 = vmatmul.mubr.msk.bf16.vlgmr.msra.gmra.mxu1 %vm66_vm0, %v1423_v17 }
 0xd24   :  { %4060 = vmatpush3.bf16.msra.mxu1 %v4320_v4 }
 0xd25   :  { %4061 = vmatprep.subr.bf16.mxu1 %v4321_v6 }
 0xd28   :  { %4062 = vmatpush3.bf16.msra.mxu1 %v4321_v6 }
 0xd29   :  { %4063 = vmatprep.subr.bf16.mxu1 %v4322_v7 }
 0xd2c   :  { %4064 = vmatpush3.bf16.msra.mxu1 %v4322_v7 }
 0xde3   :  { %v4045_v46 = vpop.f32.mrf.mxu1 }
 0xde4   :  { %v1498_v47 = vadd.f32 %v4045_v46, %v1424_v10 }
 0xde5   :  { %v1489_v8 = vpop.f32.mrf.mxu1 }
 0xde6   :  { %v4996_v27 = vadd.f32 %v1498_v47, %v4711_v16  ;;  %v1490_v33 = vadd.f32 %v1489_v8, %v1424_v10 }
 0xde7   :  { %v4046_v34 = vpop.f32.mrf.mxu1 }
 0xde8   :  { %v4999_v48 = vadd.f32 %v1490_v33, %v4695_v63  ;;  %v1501_v49 = vadd.f32 %v4046_v34, %v1424_v10  ;;  %v1514_v50 = vsel %vm66_vm0, %v4996_v27, 0.0  ;;  %v1526_v0 = vmul.f32 %v4996_v27, %v4996_v27 }
 0xde9   :  { %1515 = vadd.xlane.f32.xlu0 %v1514_v50  ;;  %v1492_v51 = vpop.f32.mrf.mxu1 }
 0xdea   :  { %v1493_v53 = vadd.f32 %v1492_v51, %v1424_v10  ;;  %v5004_v55 = vadd.f32 %v1501_v49, %v4715_v19  ;;  %v1508_v16 = vsel %vm66_vm0, %v4999_v48, 0.0  ;;  %v1524_v19 = vmul.f32 %v4999_v48, %v4999_v48  ;;  %v1568_v10 = vld [vmem:[%s5613_s2 + $0x7] ss:$0 sm:$0xff]  ;;  %v1573_v51 = vld [vmem:[%s5613_s2 + $0x10] ss:$0 sm:$0xff] }
 0xdeb   :  { %v1534_v2 = vsel %vm66_vm0, %v1526_v0, 0.0 }
 0xdec   :  { %v5007_v56 = vadd.f32 %v1493_v53, %v4702_v5  ;;  %v1517_v58 = vsel %vm66_vm0, %v5004_v55, 0.0  ;;  %v1527_v59 = vmul.f32 %v5004_v55, %v5004_v55  ;;  %v1528_v61 = vsel %vm66_vm0, %v1524_v19, 0.0 }
 0xded   :  { %1509 = vadd.xlane.f32.xlu0 %v1508_v16 }
 0xdee   :  { %v1511_v63 = vsel %vm66_vm0, %v5007_v56, 0.0  ;;  %v1525_v57 = vmul.f32 %v5007_v56, %v5007_v56  ;;  %v1537_v1 = vsel %vm66_vm0, %v1527_v59, 0.0 }
 0xdef   :  { %1512 = vadd.xlane.f32.xlu1 %v1511_v63 }
 0xdf0   :  { %v1531_v5 = vsel %vm66_vm0, %v1525_v57, 0.0 }
 0xdf1   :  { %1518 = vadd.xlane.f32.xlu0 %v1517_v58 }
 0xdf3   :  { %1532 = vadd.xlane.f32.xlu1 %v1531_v5 }
 0xdf5   :  { %1529 = vadd.xlane.f32.xlu0 %v1528_v61 }
 0xdf7   :  { %1538 = vadd.xlane.f32.xlu1 %v1537_v1 }
 0xdf9   :  { %1535 = vadd.xlane.f32.xlu0 %v1534_v2 }
 0xe72   :  { %v1516_v9 = vpop.xlane.xlu0 %1515 }
 0xe73   :  { %v1522_v23 = vmul.f32 0.015625, %v1516_v9  ;;  %v4323_v9 = vld [vmem:[%s5612_s1 + $0x140] ss:$8 sps:$4 sm:$0xff]  }
 0xe74   :  { %4065 = vmatprep.subr.bf16.mxu1 %v4323_v9 }
 0xe75   :  { %v1546_v39 = vmul.f32 %v1522_v23, %v1522_v23  ;;  %v1554_v53 = vsub.f32 %v4996_v27, %v1522_v23  ;;  %4066 = vmatpush3.bf16.msra.mxu1 %v4323_v9 }
 0xe76   :  { %v1510_v11 = vpop.xlane.xlu0 %1509 }
 0xe77   :  { %v1520_v20 = vmul.f32 0.015625, %v1510_v11  ;;  %v4324_v11 = vld [vmem:[%s5612_s1 + $0x130] ss:$8 sps:$4 sm:$0xff]  }
 0xe78   :  { %v1513_v12 = vpop.xlane.xlu1 %1512  ;;  %4067 = vmatprep.subr.bf16.mxu1 %v4324_v11 }
 0xe79   :  { %v1521_v14 = vmul.f32 0.015625, %v1513_v12  ;;  %v1544_v25 = vmul.f32 %v1520_v20, %v1520_v20  ;;  %v1552_v46 = vsub.f32 %v4999_v48, %v1520_v20  ;;  %4068 = vmatpush3.bf16.msra.mxu1 %v4324_v11  ;;  %v4325_v12 = vld [vmem:[%s5612_s1 + $0x120] ss:$8 sps:$4 sm:$0xff]   ;;  %v1588_v20 = vld [vmem:[%s5613_s2 + $0x11] ss:$0 sm:$0xff] }
 0xe7a   :  { %v1519_v18 = vpop.xlane.xlu0 %1518  ;;  %4069 = vmatprep.subr.bf16.mxu1 %v4325_v12 }
 0xe7b   :  { %v1545_v21 = vmul.f32 %v1521_v14, %v1521_v14  ;;  %v1523_v22 = vmul.f32 0.015625, %v1519_v18  ;;  %v1553_v15 = vsub.f32 %v5007_v56, %v1521_v14  ;;  %v4326_v14 = vld [vmem:[%s5612_s1 + $0x110] ss:$8 sps:$4 sm:$0xff]   ;;  %v4327_v18 = vld [vmem:[%s5612_s1 + $0x100] ss:$8 sps:$4 sm:$0xff]  }
 0xe7c   :  { %v1533_v42 = vpop.xlane.xlu1 %1532 }
 0xe7d   :  { %v1541_v52 = vmul.f32 0.015625, %v1533_v42  ;;  %v1547_v35 = vmul.f32 %v1523_v22, %v1523_v22  ;;  %v1555_v33 = vsub.f32 %v5004_v55, %v1523_v22  ;;  %4070 = vmatpush3.bf16.msra.mxu1 %v4325_v12 }
 0xe7e   :  { %v1530_v24 = vpop.xlane.xlu0 %1529  ;;  %4071 = vmatprep.subr.bf16.mxu1 %v4326_v14 }
 0xe7f   :  { %v1549_v30 = vsub.f32 %v1541_v52, %v1545_v21  ;;  %v1540_v62 = vmul.f32 0.015625, %v1530_v24 }
 0xe80   :  { %v1539_v60 = vpop.xlane.xlu1 %1538 }
 0xe81   :  { %v1557_v36 = vadd.f32 1e-05, %v1549_v30  ;;  %v1548_v37 = vsub.f32 %v1540_v62, %v1544_v25  ;;  %v1543_v38 = vmul.f32 0.015625, %v1539_v60  ;;  %4072 = vmatpush3.bf16.msra.mxu1 %v4326_v14 }
 0xe82   :  { %v1536_v40 = vpop.xlane.xlu0 %1535  ;;  %4073 = vmatprep.subr.bf16.mxu1 %v4327_v18 }
 0xe83   :  { %4436 = vrsqrt.f32 %v1557_v36  ;;  %v1556_v41 = vadd.f32 1e-05, %v1548_v37  ;;  %v1551_v54 = vsub.f32 %v1543_v38, %v1547_v35  ;;  %v1542_v45 = vmul.f32 0.015625, %v1536_v40 }
 0xe85   :  { %4438 = vrsqrt.f32 %v1556_v41  ;;  %v1559_v43 = vadd.f32 1e-05, %v1551_v54  ;;  %v1550_v44 = vsub.f32 %v1542_v45, %v1546_v39  ;;  %4074 = vmatpush3.bf16.msra.mxu1 %v4327_v18 }
 0xe86   :  { %4085 = vmatprep.subr.bf16.mxu1 %v4609_v26 }
 0xe87   :  { %4440 = vrsqrt.f32 %v1559_v43  ;;  %v1558_v13 = vadd.f32 1e-05, %v1550_v44 }
 0xe89   :  { %4442 = vrsqrt.f32 %v1558_v13 }
 0xe90   :  { %v4437_v17 = vpop.eup %4436 }
 0xe91   :  { %v1565_v47 = vmul.f32 %v4437_v17, %v1553_v15 }
 0xe92   :  { %v4439_v8 = vpop.eup %4438 }
 0xe93   :  { %v1564_v34 = vmul.f32 %v4439_v8, %v1552_v46  ;;  %v1570_v49 = vmul.f32 %v1568_v10, %v1565_v47 }
 0xe94   :  { %v4441_v50 = vpop.eup %4440 }
 0xe95   :  { %v1567_v16 = vmul.f32 %v4441_v50, %v1555_v33  ;;  %v1569_v63 = vmul.f32 %v1568_v10, %v1564_v34  ;;  %v1575_v5 = vadd.f32 %v1573_v51, %v1570_v49 }
 0xe96   :  { %v4443_v57 = vpop.eup %4442 }
 0xe97   :  { %v1566_v58 = vmul.f32 %v4443_v57, %v1554_v53  ;;  %v1574_v19 = vadd.f32 %v1573_v51, %v1569_v63  ;;  %v1572_v59 = vmul.f32 %v1568_v10, %v1567_v16 }
 0xe99   :  { %v1586_v61 = vpack.c.bf16 %v1575_v5, %v1574_v19  ;;  %v1571_v0 = vmul.f32 %v1568_v10, %v1566_v58  ;;  %v1577_v2 = vadd.f32 %v1573_v51, %v1572_v59 }
 0xe9b   :  { %4055 = vmatprep.mubr.msk.bf16.mxu0 %vm66_vm0, %v1586_v61  ;;  %v1576_v1 = vadd.f32 %v1573_v51, %v1571_v0 }
 0xe9d   :  { %v1587_v3 = vpack.c.bf16 %v1577_v2, %v1576_v1 }
 0xe9f   :  { %4056 = vmatmul.mubr.msk.bf16.vlgmr.msra.gmra.mxu0 %vm66_vm0, %v1587_v3 }
 0xea0   :  { %2071 = vmatprep.mubr.bf16.mxu0 %v4608_v31 }
 0xf5f   :  { %v4057_v42 = vpop.f32.mrf.mxu0 }
 0xf60   :  { %v5080_v21 = vadd.f32 %v4057_v42, %v1588_v20 }
 0xf61   :  { %v1653_v22 = vpop.f32.mrf.mxu0 }
 0xf62   :  { %v5083_v52 = vmul.f32 0.70710677, %v5080_v21  ;;  %v5085_v23 = vadd.f32 %v1653_v22, %v1588_v20 }
 0xf63   :  { %v4058_v24 = vpop.f32.mrf.mxu0 }
 0xf64   :  { %v1686_v25 = vand.u32 2147483647, %v5083_v52  ;;  %v5089_v30 = vmul.f32 0.70710677, %v5085_v23  ;;  %v5091_v62 = vadd.f32 %v4058_v24, %v1588_v20  ;;  %vm1678_vm5 = vcmp.lt.f32.partialorder %v5083_v52, 0.0 }
 0xf65   :  { %v1656_v60 = vpop.f32.mrf.mxu0 }
 0xf66   :  { %v1690_v35 = vmul.f32 0.3275911, %v1686_v25  ;;  %v1684_v36 = vand.u32 2147483647, %v5089_v30  ;;  %v5095_v37 = vmul.f32 0.70710677, %v5091_v62  ;;  %v5097_v38 = vadd.f32 %v1656_v60, %v1588_v20 }
 0xf67   :  { %v1742_v10 = vsub.f32 0.0, %v1686_v25  ;;  %vm1676_vm6 = vcmp.lt.f32.partialorder %v5089_v30, 0.0 }
 0xf68   :  { %v1694_v39 = vadd.f32 1.0, %v1690_v35  ;;  %v1688_v40 = vmul.f32 0.3275911, %v1684_v36  ;;  %v1687_v41 = vand.u32 2147483647, %v5095_v37  ;;  %v1740_v46 = vsub.f32 0.0, %v1684_v36 }
 0xf69   :  { %v5101_v54 = vmul.f32 0.70710677, %v5097_v38  ;;  %v1746_v47 = vmul.f32 %v1742_v10, %v1686_v25  ;;  %vm1679_vm7 = vcmp.lt.f32.partialorder %v5095_v37, 0.0 }
 0xf6a   :  { %4444 = vrcp.f32 %v1694_v39  ;;  %v1692_v45 = vadd.f32 1.0, %v1688_v40  ;;  %v1691_v43 = vmul.f32 0.3275911, %v1687_v41  ;;  %v1743_v8 = vsub.f32 0.0, %v1687_v41 }
 0xf6b   :  { %v1685_v44 = vand.u32 2147483647, %v5101_v54  ;;  %v1744_v34 = vmul.f32 %v1740_v46, %v1684_v36  ;;  %v1752_v51 = vmul.f32 1.442695, %v1746_v47  ;;  %vm1677_vm8 = vcmp.lt.f32.partialorder %v5101_v54, 0.0 }
 0xf6c   :  { %4446 = vrcp.f32 %v1692_v45  ;;  %v1695_v13 = vadd.f32 1.0, %v1691_v43  ;;  %v1747_v53 = vmul.f32 %v1743_v8, %v1687_v41 }
 0xf6d   :  { %v1689_v15 = vmul.f32 0.3275911, %v1685_v44  ;;  %v1741_v50 = vsub.f32 0.0, %v1685_v44  ;;  %v1748_v58 = vmul.f32 1.442695, %v1744_v34 }
 0xf6e   :  { %4448 = vrcp.f32 %v1695_v13  ;;  %v1754_v1 = vmul.f32 1.442695, %v1747_v53 }
 0xf6f   :  { %v1693_v17 = vadd.f32 1.0, %v1689_v15  ;;  %v1745_v59 = vmul.f32 %v1741_v50, %v1685_v44 }
 0xf71   :  { %4450 = vrcp.f32 %v1693_v17  ;;  %v1750_v11 = vmul.f32 1.442695, %v1745_v59  ;;  %v4618_v59 = vmov 1.0  }
 0xf72   :  { %4452 = vpow2.f32 %v1752_v51  ;;  %v1681_v37 = vsel %vm1677_vm8, -1.0, %v4618_v59 }
 0xf73   :  { %4454 = vpow2.f32 %v1748_v58 }
 0xf74   :  { %4456 = vpow2.f32 %v1754_v1  ;;  %v1683_v1 = vsel %vm1679_vm7, -1.0, %v4618_v59 }
 0xf75   :  { %4458 = vpow2.f32 %v1750_v11  ;;  %v1671_v11 = vmul.f32 0.5, %v5091_v62 }
 0xf77   :  { %v4445_v33 = vpop.eup %4444 }
 0xf78   :  { %v1706_v49 = vmul.f32 1.0614054, %v4445_v33 }
 0xf79   :  { %v4447_v16 = vpop.eup %4446 }
 0xf7a   :  { %v1710_v63 = vadd.f32 -1.4531521, %v1706_v49  ;;  %v1704_v57 = vmul.f32 1.0614054, %v4447_v16 }
 0xf7b   :  { %v4449_v19 = vpop.eup %4448 }
 0xf7c   :  { %v1714_v5 = vmul.f32 %v4445_v33, %v1710_v63  ;;  %v1708_v61 = vadd.f32 -1.4531521, %v1704_v57  ;;  %v1707_v0 = vmul.f32 1.0614054, %v4449_v19 }
 0xf7e   :  { %v1718_v2 = vadd.f32 1.4214138, %v1714_v5  ;;  %v4451_v3 = vpop.eup %4450  ;;  %v1712_v4 = vmul.f32 %v4447_v16, %v1708_v61  ;;  %v1711_v6 = vadd.f32 -1.4531521, %v1707_v0  ;;  %v1680_v61 = vsel %vm1676_vm6, -1.0, %v4618_v59 }
 0xf7f   :  { %v1705_v9 = vmul.f32 1.0614054, %v4451_v3  ;;  %v4453_v15 = vpop.eup %4452 }
 0xf80   :  { %v1722_v7 = vmul.f32 %v4445_v33, %v1718_v2  ;;  %v1716_v12 = vadd.f32 1.4214138, %v1712_v4  ;;  %v1715_v14 = vmul.f32 %v4449_v19, %v1711_v6  ;;  %v4455_v8 = vpop.eup %4454 }
 0xf81   :  { %v1709_v20 = vadd.f32 -1.4531521, %v1705_v9  ;;  %v4457_v51 = vpop.eup %4456 }
 0xf82   :  { %v1726_v18 = vadd.f32 -0.28449672, %v1722_v7  ;;  %v1720_v42 = vmul.f32 %v4447_v16, %v1716_v12  ;;  %v1719_v22 = vadd.f32 1.4214138, %v1715_v14  ;;  %v4459_v5 = vpop.eup %4458  ;;  %v1668_v12 = vmul.f32 0.5, %v5085_v23 }
 0xf83   :  { %v1713_v25 = vmul.f32 %v4451_v3, %v1709_v20  ;;  %v1669_v14 = vmul.f32 0.5, %v5097_v38  ;;  %v1670_v20 = vmul.f32 0.5, %v5080_v21  ;;  %v1794_v23 = vld [vmem:[%s5613_s2 + $0x12] ss:$0 sm:$0xff] }
 0xf84   :  { %v1730_v24 = vmul.f32 %v4445_v33, %v1726_v18  ;;  %v1724_v60 = vadd.f32 -0.28449672, %v1720_v42  ;;  %v1723_v35 = vmul.f32 %v4449_v19, %v1719_v22 }
 0xf85   :  { %v1717_v39 = vadd.f32 1.4214138, %v1713_v25 }
 0xf86   :  { %v1734_v36 = vadd.f32 0.2548296, %v1730_v24  ;;  %v1728_v40 = vmul.f32 %v4447_v16, %v1724_v60  ;;  %v1727_v41 = vadd.f32 -0.28449672, %v1723_v35 }
 0xf87   :  { %v1721_v43 = vmul.f32 %v4451_v3, %v1717_v39 }
 0xf88   :  { %v1738_v45 = vmul.f32 %v4445_v33, %v1734_v36  ;;  %v1732_v44 = vadd.f32 0.2548296, %v1728_v40  ;;  %v1731_v13 = vmul.f32 %v4449_v19, %v1727_v41 }
 0xf89   :  { %v1725_v17 = vadd.f32 -0.28449672, %v1721_v43 }
 0xf8a   :  { %v1758_v10 = vmul.f32 %v4453_v15, %v1738_v45  ;;  %v1736_v46 = vmul.f32 %v4447_v16, %v1732_v44  ;;  %v1735_v47 = vadd.f32 0.2548296, %v1731_v13  ;;  %v1682_v16 = vsel %vm1678_vm5, -1.0, %v4618_v59 }
 0xf8b   :  { %v1729_v34 = vmul.f32 %v4451_v3, %v1725_v17 }
 0xf8c   :  { %v1756_v49 = vmul.f32 %v4455_v8, %v1736_v46  ;;  %v1739_v50 = vmul.f32 %v4449_v19, %v1735_v47  ;;  %v1762_v63 = vsub.f32 1.0, %v1758_v10 }
 0xf8d   :  { %v1733_v53 = vadd.f32 0.2548296, %v1729_v34 }
 0xf8e   :  { %v1760_v33 = vsub.f32 1.0, %v1756_v49  ;;  %v1759_v57 = vmul.f32 %v4457_v51, %v1739_v50  ;;  %v1766_v30 = vmul.f32 %v1762_v63, %v1682_v16  ;;  %v4330_v50 = vld [vmem:[%s5612_s1 + $0x1b4] ss:$8 sps:$4 sm:$0xff]   ;;  %v4328_v51 = vld [vmem:[%s5612_s1 + $0x1b0] ss:$8 sps:$4 sm:$0xff]  }
 0xf8f   :  { %v1737_v58 = vmul.f32 %v4451_v3, %v1733_v53  ;;  %2047 = vmatprep.subr.bf16.mxu0 %v4330_v50  ;;  %v4333_v53 = vld [vmem:[%s5612_s1 + $0x1a4] ss:$8 sps:$4 sm:$0xff]   ;;  %v4331_v63 = vld [vmem:[%s5612_s1 + $0x1a0] ss:$8 sps:$4 sm:$0xff]  }
 0xf90   :  { %v1763_v0 = vsub.f32 1.0, %v1759_v57  ;;  %v1764_v19 = vmul.f32 %v1760_v33, %v1680_v61  ;;  %v1770_v9 = vadd.f32 1.0, %v1766_v30  ;;  %2048 = vmatpush1.bf16.msra.mxu0 %v4328_v51  ;;  %v4336_v33 = vld [vmem:[%s5612_s1 + $0x194] ss:$8 sps:$4 sm:$0xff]   ;;  %v4334_v57 = vld [vmem:[%s5612_s1 + $0x190] ss:$8 sps:$4 sm:$0xff]  }
 0xf91   :  { %v1757_v52 = vmul.f32 %v4459_v5, %v1737_v58  ;;  %2049 = vmatprep.subr.bf16.mxu0 %v4333_v53  ;;  %v4339_v58 = vld [vmem:[%s5612_s1 + $0x184] ss:$8 sps:$4 sm:$0xff]   ;;  %v4337_v5 = vld [vmem:[%s5612_s1 + $0x180] ss:$8 sps:$4 sm:$0xff]  }
 0xf92   :  { %v1767_v2 = vmul.f32 %v1763_v0, %v1683_v1  ;;  %v1768_v3 = vadd.f32 1.0, %v1764_v19  ;;  %v1774_v24 = vmul.f32 %v1770_v9, %v1670_v20 }
 0xf93   :  { %v1761_v4 = vsub.f32 1.0, %v1757_v52 }
 0xf94   :  { %v1771_v6 = vadd.f32 1.0, %v1767_v2  ;;  %v1772_v42 = vmul.f32 %v1768_v3, %v1668_v12  ;;  %2050 = vmatpush1.bf16.msra.mxu0 %v4331_v63 }
 0xf95   :  { %v1765_v7 = vmul.f32 %v1761_v4, %v1681_v37  ;;  %2051 = vmatprep.subr.bf16.mxu0 %v4336_v33 }
 0xf96   :  { %v1775_v54 = vmul.f32 %v1771_v6, %v1671_v11 }
 0xf97   :  { %v1769_v18 = vadd.f32 1.0, %v1765_v7 }
 0xf98   :  { %v1793_v60 = vpack.c.bf16 %v1775_v54, %v1774_v24  ;;  %2052 = vmatpush1.bf16.msra.mxu0 %v4334_v57 }
 0xf99   :  { %v1773_v22 = vmul.f32 %v1769_v18, %v1669_v14  ;;  %2053 = vmatprep.subr.bf16.mxu0 %v4339_v58  ;;  %v3766_v58 = vld [vmem:[%s5613_s2 + $0x15] ss:$8 sm:$0x3] }
 0xf9b   :  { %v1792_v25 = vpack.c.bf16 %v1773_v22, %v1772_v42 }
 0xf9c   :  { %2054 = vmatpush1.bf16.msra.mxu0 %v4337_v5 }
 0xf9d   :  { %4075 = vmatprep.mubr.bf16.mxu1 %v1792_v25  ;;  %4079 = vmatprep.subr.bf16.mxu0 %v4609_v26 }
 0xf9e   :  { %4076 = vmatmul.mubr.bf16.vlgmr.msra.gmra.mxu1 %v1793_v60 }
 0xf9f   :  { %4087 = vmatprep.mubr.msk.bf16.mxu1 %vm4610_vm1, %v4609_v26 }
0x105e   :  { %v4077_v62 = vpop.f32.mrf.mxu1 }
0x105f   :  { %v1886_v38 = vadd.f32 %v4077_v62, %v1794_v23 }
0x1060   :  { %v1877_v35 = vpop.f32.mrf.mxu1 }
0x1061   :  { %v5122_v21 = vadd.f32 %v1886_v38, %v4996_v27  ;;  %v1878_v36 = vadd.f32 %v1877_v35, %v1794_v23 }
0x1062   :  { %v4078_v39 = vpop.f32.mrf.mxu1 }
0x1063   :  { %1898 = vst.msk [vmem:[#allocation4 + $0x10] sm:$0xff] %vm66_vm0, %v5122_v21  ;;  %v5127_v40 = vadd.f32 %v1878_v36, %v4999_v48  ;;  %v1889_v41 = vadd.f32 %v4078_v39, %v1794_v23  ;;  %v1906_v46 = vsel %vm66_vm0, %v5122_v21, 0.0 }
0x1064   :  { %v1880_v45 = vpop.f32.mrf.mxu1 }
0x1065   :  { %1896 = vst.msk [vmem:[#allocation4] sm:$0xff] %vm66_vm0, %v5127_v40  ;;  %v5132_v43 = vadd.f32 %v1889_v41, %v5004_v55  ;;  %v1881_v44 = vadd.f32 %v1880_v45, %v1794_v23  ;;  %v1900_v27 = vsel %vm66_vm0, %v5127_v40, 0.0  ;;  %v1916_v13 = vmul.f32 %v5127_v40, %v5127_v40  ;;  %v1960_v41 = vld [vmem:[%s5613_s2 + $0x13] ss:$0 sm:$0xff] }
0x1066   :  { %1901 = vadd.xlane.f32.xlu0 %v1900_v27 }
0x1067   :  { %1899 = vst.msk [vmem:[#allocation4 + $0x18] sm:$0xff] %vm66_vm0, %v5132_v43  ;;  %v5141_v48 = vadd.f32 %v1881_v44, %v5007_v56  ;;  %v1920_v15 = vsel %vm66_vm0, %v1916_v13, 0.0  ;;  %v1918_v56 = vmul.f32 %v5122_v21, %v5122_v21  ;;  %v1909_v47 = vsel %vm66_vm0, %v5132_v43, 0.0 }
0x1068   :  { %v1919_v34 = vmul.f32 %v5132_v43, %v5132_v43 }
0x1069   :  { %1897 = vst.msk [vmem:[#allocation4 + $0x8] sm:$0xff] %vm66_vm0, %v5141_v48  ;;  %v1903_v55 = vsel %vm66_vm0, %v5141_v48, 0.0  ;;  %v1917_v17 = vmul.f32 %v5141_v48, %v5141_v48  ;;  %v1926_v8 = vsel %vm66_vm0, %v1918_v56, 0.0 }
0x106a   :  { %1904 = vadd.xlane.f32.xlu1 %v1903_v55  ;;  %1921 = vadd.xlane.f32.xlu0 %v1920_v15  ;;  %v1929_v49 = vsel %vm66_vm0, %v1919_v34, 0.0  ;;  %v1965_v55 = vld [vmem:[%s5613_s2 + $0x14] ss:$0 sm:$0xff] }
0x106b   :  { %v1923_v10 = vsel %vm66_vm0, %v1917_v17, 0.0 }
0x106e   :  { %1924 = vadd.xlane.f32.xlu1 %v1923_v10  ;;  %1907 = vadd.xlane.f32.xlu0 %v1906_v46 }
0x1072   :  { %1910 = vadd.xlane.f32.xlu1 %v1909_v47  ;;  %1927 = vadd.xlane.f32.xlu0 %v1926_v8 }
0x1076   :  { %1930 = vadd.xlane.f32.xlu1 %v1929_v49 }
0x10ef   :  { %v1902_v16 = vpop.xlane.xlu0 %1901 }
0x10f0   :  { %v1912_v61 = vmul.f32 0.015625, %v1902_v16  ;;  %v1986_v16 = vrot.slane %v3766_v58, %v278_v29 }
0x10f2   :  { %v1936_v1 = vmul.f32 %v1912_v61, %v1912_v61  ;;  %v1944_v35 = vsub.f32 %v5127_v40, %v1912_v61 }
0x10f3   :  { %v1905_v0 = vpop.xlane.xlu1 %1904  ;;  %v1922_v19 = vpop.xlane.xlu0 %1921 }
0x10f4   :  { %v1913_v52 = vmul.f32 0.015625, %v1905_v0  ;;  %v1932_v30 = vmul.f32 0.015625, %v1922_v19 }
0x10f6   :  { %v1940_v2 = vsub.f32 %v1932_v30, %v1936_v1  ;;  %v1937_v37 = vmul.f32 %v1913_v52, %v1913_v52  ;;  %v1945_v45 = vsub.f32 %v5141_v48, %v1913_v52 }
0x10f7   :  { %v1925_v4 = vpop.xlane.xlu1 %1924  ;;  %v1908_v6 = vpop.xlane.xlu0 %1907 }
0x10f8   :  { %v1948_v3 = vadd.f32 1e-05, %v1940_v2  ;;  %v1933_v7 = vmul.f32 0.015625, %v1925_v4  ;;  %v1914_v9 = vmul.f32 0.015625, %v1908_v6 }
0x10fa   :  { %4460 = vrsqrt.f32 %v1948_v3  ;;  %v1941_v11 = vsub.f32 %v1933_v7, %v1937_v37  ;;  %v1938_v20 = vmul.f32 %v1914_v9, %v1914_v9  ;;  %v1946_v15 = vsub.f32 %v5122_v21, %v1914_v9 }
0x10fb   :  { %v1911_v12 = vpop.xlane.xlu1 %1910  ;;  %v1928_v14 = vpop.xlane.xlu0 %1927 }
0x10fc   :  { %v1949_v18 = vadd.f32 1e-05, %v1941_v11  ;;  %v1915_v54 = vmul.f32 0.015625, %v1911_v12  ;;  %v1934_v42 = vmul.f32 0.015625, %v1928_v14 }
0x10fe   :  { %4462 = vrsqrt.f32 %v1949_v18  ;;  %v1942_v22 = vsub.f32 %v1934_v42, %v1938_v20  ;;  %v1939_v25 = vmul.f32 %v1915_v54, %v1915_v54  ;;  %v1947_v8 = vsub.f32 %v5132_v43, %v1915_v54 }
0x10ff   :  { %v1931_v24 = vpop.xlane.xlu1 %1930 }
0x1100   :  { %v1950_v60 = vadd.f32 1e-05, %v1942_v22  ;;  %v1935_v23 = vmul.f32 0.015625, %v1931_v24 }
0x1102   :  { %4464 = vrsqrt.f32 %v1950_v60  ;;  %v1943_v62 = vsub.f32 %v1935_v23, %v1939_v25 }
0x1104   :  { %v1951_v38 = vadd.f32 1e-05, %v1943_v62 }
0x1106   :  { %4466 = vrsqrt.f32 %v1951_v38 }
0x1107   :  { %v4461_v36 = vpop.eup %4460 }
0x1108   :  { %v1956_v39 = vmul.f32 %v4461_v36, %v1944_v35 }
0x110a   :  { %v1961_v13 = vmul.f32 %v1960_v41, %v1956_v39 }
0x110b   :  { %v4463_v44 = vpop.eup %4462 }
0x110c   :  { %v1957_v27 = vmul.f32 %v4463_v44, %v1945_v45  ;;  %v1966_v46 = vadd.f32 %v1965_v55, %v1961_v13 }
0x110e   :  { %v1962_v17 = vmul.f32 %v1960_v41, %v1957_v27 }
0x110f   :  { %v4465_v10 = vpop.eup %4464 }
0x1110   :  { %v1967_v56 = vadd.f32 %v1965_v55, %v1962_v17  ;;  %v1958_v47 = vmul.f32 %v4465_v10, %v1946_v15 }
0x1112   :  { %v1978_v34 = vpack.c.bf16 %v1967_v56, %v1966_v46  ;;  %v1963_v51 = vmul.f32 %v1960_v41, %v1958_v47 }
0x1113   :  { %v4467_v49 = vpop.eup %4466 }
0x1114   :  { %3775 = vmatmul.mubr.msk.bf16.vlgmr.msra.gmra.mxu0 %vm66_vm0, %v1978_v34  ;;  %v1959_v50 = vmul.f32 %v4467_v49, %v1947_v8  ;;  %v1968_v63 = vadd.f32 %v1965_v55, %v1963_v51 }
0x1115   :  { %2081 = vmatprep.mubr.bf16.mxu0 %v4608_v31  ;;  %v1990_v31 = vrot.slane %v3766_v58, %v282_v32 }
0x1116   :  { %v1964_v53 = vmul.f32 %v1960_v41, %v1959_v50 }
0x1118   :  { %v1969_v33 = vadd.f32 %v1965_v55, %v1964_v53 }
0x111a   :  { %v1979_v57 = vpack.c.bf16 %v1969_v33, %v1968_v63 }
0x111c   :  { %3776 = vmatmul.mubr.msk.bf16.gmra.mxu0 %vm66_vm0, %v1979_v57 }
0x111d   :  { %4081 = vmatprep.mubr.msk.bf16.mxu0 %vm4610_vm1, %v4609_v26 }
0x11d4   :  { %v2073_v5 = vpop.f32.mrf.mxu0 }
0x11d5   :  { %v2074_v19 = vadd.f32 %v2073_v5, %v1986_v16 }
0x11d6   :  { %v2075_v61 = vpop.f32.mrf.mxu0 }
0x11d7   :  { %v2076_v30 = vadd.f32 %v2075_v61, %v1990_v31 }
0x11d8   :  { %v2077_v0 = vpop.f32.mrf.mxu0 }
0x11d9   :  { %v2078_v1 = vadd.f32 %v2077_v0, %v1986_v16 }
0x11da   :  { %v2079_v52 = vpop.f32.mrf.mxu0 }
0x11db   :  { %v5208_v2 = vpack.c.bf16 %v2078_v1, %v2074_v19  ;;  %v2080_v4 = vadd.f32 %v2079_v52, %v1990_v31 }
0x11dc   :  { %v2083_v6 = vpop.f32.mrf.mxu0 }
0x11dd   :  { %v5210_v37 = vpack.c.bf16 %v2080_v4, %v2076_v30  ;;  %2097 = vrot.lane.b32.xlu0 %v5208_v2, %s4611_s28  ;;  %v2084_v7 = vadd.f32 %v2083_v6, %v1986_v16 }
0x11de   :  { %v2085_v3 = vpop.f32.mrf.mxu0 }
0x11df   :  { %v2086_v54 = vadd.f32 %v2085_v3, %v1990_v31 }
0x11e0   :  { %v2087_v29 = vpop.f32.mrf.mxu0 }
0x11e1   :  { %v2088_v9 = vadd.f32 %v2087_v29, %v1986_v16 }
0x11e2   :  { %v2089_v14 = vpop.f32.mrf.mxu0 }
0x11e3   :  { %v5214_v28 = vpack.c.bf16 %v2088_v9, %v2084_v7  ;;  %v2090_v20 = vadd.f32 %v2089_v14, %v1990_v31 }
0x11e5   :  { %2147 = vrot.lane.b32.xlu1 %v5214_v28, %s4611_s28  ;;  %v5228_v42 = vpack.c.bf16 %v2090_v20, %v2086_v54 }
0x124f   :  { %v2098_v32 = vpop.permute.xlu0 %2097 }
0x1250   :  { %v2103_v11 = vsel %vm392_vm2, %v2098_v32, 0 }
0x1251   :  { %4080 = vmatpush3.bf16.xpose.msra.mxu0 %v2103_v11 }
0x1252   :  { %4091 = vmatprep.subr.bf16.mxu0 %v4609_v26 }
0x1257   :  { %v2148_v12 = vpop.permute.xlu1 %2147 }
0x1258   :  { %v2153_v18 = vsel %vm392_vm2, %v2148_v12, 0  ;;  %4082 = vmatmul.mubr.msk.bf16.vlgmr.msra.gmra.mxu0 %vm392_vm2, %v5208_v2 }
0x1259   :  { %4086 = vmatpush3.bf16.xpose.msra.mxu1 %v2153_v18  ;;  %4092 = vmatpush3.bf16.msra.mxu0 %v5210_v37 }
0x125a   :  { %4097 = vmatprep.subr.bf16.mxu1 %v4609_v26  ;;  %4093 = vmatprep.mubr.msk.bf16.mxu0 %vm4610_vm1, %v4609_v26 }
0x125b   :  { %4103 = vmatprep.subr.bf16.mxu0 %v4609_v26 }
0x1260   :  { %4088 = vmatmul.mubr.msk.bf16.vlgmr.msra.gmra.mxu1 %vm392_vm2, %v5214_v28 }
0x1261   :  { %4098 = vmatpush3.bf16.msra.mxu1 %v5228_v42  ;;  %4099 = vmatprep.mubr.msk.bf16.mxu1 %vm4610_vm1, %v4609_v26 }
0x1262   :  { %4109 = vmatprep.subr.bf16.mxu1 %v4609_v26 }
0x1318   :  { %v2139_v22 = vpop.f32.mrf.mxu0 }
0x1319   :  { %v2196_v24 = vsel %vm392_vm2, %v2139_v22, -inf }
0x131a   :  { %2197 = vmax.xlane.f32.xlu1 %v2196_v24  ;;  %v4083_v25 = vpop.f32.mrf.mxu0 }
0x131c   :  { %v2142_v60 = vpop.f32.mrf.mxu0 }
0x131d   :  { %v2199_v23 = vsel %vm392_vm2, %v2142_v60, -inf }
0x131e   :  { %2200 = vmax.xlane.f32.xlu0 %v2199_v23  ;;  %v4084_v62 = vpop.f32.mrf.mxu0 }
0x1320   :  { %v2189_v38 = vpop.f32.mrf.mxu1 }
0x1321   :  { %v2202_v35 = vsel %vm392_vm2, %v2189_v38, -inf }
0x1322   :  { %v4089_v36 = vpop.f32.mrf.mxu1  ;;  %2203 = vmax.xlane.f32.xlu0 %v2202_v35 }
0x1324   :  { %v2192_v39 = vpop.f32.mrf.mxu1 }
0x1325   :  { %v2205_v41 = vsel %vm392_vm2, %v2192_v39, -inf }
0x1326   :  { %v4090_v45 = vpop.f32.mrf.mxu1  ;;  %2206 = vmax.xlane.f32.xlu1 %v2205_v41 }
0x13a3   :  { %v2198_v44 = vpop.xlane.xlu1 %2197 }
0x13a4   :  { %v2208_v27 = vsub.f32 %v2139_v22, %v2198_v44 }
0x13a6   :  { %v2212_v13 = vmul.f32 1.442695, %v2208_v27 }
0x13a7   :  { %v2201_v55 = vpop.xlane.xlu0 %2200 }
0x13a8   :  { %4468 = vpow2.f32 %v2212_v13  ;;  %v2209_v15 = vsub.f32 %v2142_v60, %v2201_v55 }
0x13aa   :  { %v2214_v17 = vmul.f32 1.442695, %v2209_v15 }
0x13ab   :  { %v2204_v10 = vpop.xlane.xlu0 %2203 }
0x13ac   :  { %4470 = vpow2.f32 %v2214_v17  ;;  %v2210_v46 = vsub.f32 %v2189_v38, %v2204_v10 }
0x13ae   :  { %v2216_v56 = vmul.f32 1.442695, %v2210_v46 }
0x13af   :  { %v2207_v53 = vpop.xlane.xlu1 %2206 }
0x13b0   :  { %4472 = vpow2.f32 %v2216_v56  ;;  %v2211_v63 = vsub.f32 %v2192_v39, %v2207_v53 }
0x13b2   :  { %v2218_v33 = vmul.f32 1.442695, %v2211_v63 }
0x13b4   :  { %4474 = vpow2.f32 %v2218_v33 }
0x13b5   :  { %v4469_v47 = vpop.eup %4468 }
0x13b6   :  { %v2220_v8 = vsel %vm392_vm2, %v4469_v47, 0.0 }
0x13b7   :  { %2221 = vadd.xlane.f32.xlu0 %v2220_v8 }
0x13b9   :  { %v4471_v34 = vpop.eup %4470 }
0x13ba   :  { %v2223_v49 = vsel %vm392_vm2, %v4471_v34, 0.0 }
0x13bb   :  { %2224 = vadd.xlane.f32.xlu1 %v2223_v49 }
0x13bd   :  { %v4473_v50 = vpop.eup %4472 }
0x13be   :  { %v2226_v51 = vsel %vm392_vm2, %v4473_v50, 0.0 }
0x13bf   :  { %2227 = vadd.xlane.f32.xlu0 %v2226_v51 }
0x13c1   :  { %v4475_v57 = vpop.eup %4474 }
0x13c2   :  { %v2229_v58 = vsel %vm392_vm2, %v4475_v57, 0.0 }
0x13cc   :  { %2383 = vrot.lane.b32.xlu1 %v5214_v28, %s4612_s0 }
0x13d5   :  { %2332 = vrot.lane.b32.xlu0 %v5208_v2, %s4612_s0 }
0x13f0   :  { %2230 = vadd.xlane.f32.xlu1 %v2229_v58 }
0x1401   :  { %2330 = vrot.lane.b32.xlu1 %v5208_v2, %s4613_s29 }
0x1405   :  { %2381 = vrot.lane.b32.xlu1 %v5214_v28, %s4613_s29 }
0x1440   :  { %v2222_v5 = vpop.xlane.xlu0 %2221 }
0x1441   :  { %4476 = vrcp.f32 %v2222_v5 }
0x1444   :  { %v2225_v16 = vpop.xlane.xlu1 %2224 }
0x1445   :  { %4478 = vrcp.f32 %v2225_v16 }
0x1448   :  { %v2228_v61 = vpop.xlane.xlu0 %2227  ;;  %v2384_v6 = vpop.permute.xlu1 %2383 }
0x1449   :  { %4480 = vrcp.f32 %v2228_v61  ;;  %v2389_v14 = vsel %vm392_vm2, %v2384_v6, 0 }
0x144c   :  { %v2333_v52 = vpop.permute.xlu0 %2332 }
0x144d   :  { %v2338_v4 = vsel %vm392_vm2, %v2333_v52, 0 }
0x144e   :  { %v4477_v31 = vpop.eup %4476 }
0x144f   :  { %v2236_v19 = vmul.f32 %v4477_v31, %v4469_v47 }
0x1452   :  { %v4479_v0 = vpop.eup %4478 }
0x1453   :  { %v2237_v1 = vmul.f32 %v4479_v0, %v4471_v34 }
0x1455   :  { %v2240_v30 = vpack.c.bf16 %v2237_v1, %v2236_v19 }
0x1456   :  { %v4481_v7 = vpop.eup %4480 }
0x1457   :  { %4094 = vmatmul.mubr.msk.bf16.vlgmr.msra.gmra.mxu0 %vm392_vm2, %v2240_v30  ;;  %v2238_v32 = vmul.f32 %v4481_v7, %v4473_v50 }
0x1458   :  { %4104 = vmatpush3.bf16.xpose.msra.mxu0 %v2338_v4  ;;  %4105 = vmatprep.mubr.msk.bf16.mxu0 %vm4610_vm1, %v4609_v26 }
0x1459   :  { %4115 = vmatprep.subr.bf16.mxu0 %v4609_v26 }
0x1479   :  { %v2231_v3 = vpop.xlane.xlu1 %2230 }
0x147a   :  { %4482 = vrcp.f32 %v2231_v3 }
0x147d   :  { %v2331_v29 = vpop.permute.xlu1 %2330 }
0x147e   :  { %4106 = vmatmul.mubr.msk.bf16.vlgmr.msra.gmra.mxu0 %vm392_vm2, %v2331_v29 }
0x147f   :  { %4117 = vmatprep.mubr.msk.bf16.mxu0 %vm4610_vm1, %v4609_v26 }
0x1481   :  { %v2382_v18 = vpop.permute.xlu1 %2381 }
0x1487   :  { %v4483_v9 = vpop.eup %4482 }
0x1488   :  { %v2239_v11 = vmul.f32 %v4483_v9, %v4475_v57 }
0x148a   :  { %v2241_v12 = vpack.c.bf16 %v2239_v11, %v2238_v32 }
0x148c   :  { %4100 = vmatmul.mubr.msk.bf16.vlgmr.msra.gmra.mxu1 %vm392_vm2, %v2241_v12 }
0x148d   :  { %4110 = vmatpush3.bf16.xpose.msra.mxu1 %v2389_v14  ;;  %4111 = vmatprep.mubr.msk.bf16.mxu1 %vm4610_vm1, %v4609_v26 }
0x148e   :  { %4121 = vmatprep.subr.bf16.mxu1 %v4609_v26 }
0x1494   :  { %4112 = vmatmul.mubr.msk.bf16.vlgmr.msra.gmra.mxu1 %vm392_vm2, %v2382_v18 }
0x1495   :  { %4123 = vmatprep.mubr.msk.bf16.mxu1 %vm4610_vm1, %v4609_v26 }
0x1517   :  { %v5268_v20 = vpop.f32.mrf.mxu0 }
0x1519   :  { %v4095_v54 = vpop.f32.mrf.mxu0 }
0x151b   :  { %v5270_v22 = vpop.f32.mrf.mxu0 }
0x151d   :  { %v4096_v24 = vpop.f32.mrf.mxu0 }
0x153e   :  { %v2374_v25 = vpop.f32.mrf.mxu0 }
0x153f   :  { %v2432_v60 = vsel %vm392_vm2, %v2374_v25, -inf }
0x1540   :  { %2433 = vmax.xlane.f32.xlu0 %v2432_v60  ;;  %v4107_v23 = vpop.f32.mrf.mxu0 }
0x1542   :  { %v2377_v62 = vpop.f32.mrf.mxu0 }
0x1543   :  { %v2435_v38 = vsel %vm392_vm2, %v2377_v62, -inf }
0x1544   :  { %2436 = vmax.xlane.f32.xlu1 %v2435_v38  ;;  %v4108_v35 = vpop.f32.mrf.mxu0 }
0x154c   :  { %v5274_v36 = vpop.f32.mrf.mxu1 }
0x154e   :  { %v4101_v39 = vpop.f32.mrf.mxu1 }
0x1550   :  { %v5276_v41 = vpop.f32.mrf.mxu1 }
0x1552   :  { %v4102_v45 = vpop.f32.mrf.mxu1 }
0x1554   :  { %v2425_v44 = vpop.f32.mrf.mxu1 }
0x1555   :  { %v2438_v27 = vsel %vm392_vm2, %v2425_v44, -inf }
0x1556   :  { %v4113_v13 = vpop.f32.mrf.mxu1  ;;  %2439 = vmax.xlane.f32.xlu0 %v2438_v27 }
0x1558   :  { %v2428_v55 = vpop.f32.mrf.mxu1 }
0x1559   :  { %v2441_v15 = vsel %vm392_vm2, %v2428_v55, -inf }
0x155a   :  { %v4114_v17 = vpop.f32.mrf.mxu1  ;;  %2442 = vmax.xlane.f32.xlu0 %v2441_v15 }
0x15c9   :  { %v2434_v10 = vpop.xlane.xlu0 %2433 }
0x15ca   :  { %v2444_v46 = vsub.f32 %v2374_v25, %v2434_v10 }
0x15cc   :  { %v2448_v56 = vmul.f32 1.442695, %v2444_v46 }
0x15cd   :  { %v2437_v47 = vpop.xlane.xlu1 %2436 }
0x15ce   :  { %4484 = vpow2.f32 %v2448_v56  ;;  %v2445_v8 = vsub.f32 %v2377_v62, %v2437_v47 }
0x15d0   :  { %v2450_v34 = vmul.f32 1.442695, %v2445_v8 }
0x15d2   :  { %4486 = vpow2.f32 %v2450_v34 }
0x15db   :  { %v4485_v49 = vpop.eup %4484 }
0x15dc   :  { %v2456_v50 = vsel %vm392_vm2, %v4485_v49, 0.0 }
0x15dd   :  { %2457 = vadd.xlane.f32.xlu0 %v2456_v50 }
0x15df   :  { %v4487_v51 = vpop.eup %4486  ;;  %v2440_v53 = vpop.xlane.xlu0 %2439 }
0x15e0   :  { %v2446_v63 = vsub.f32 %v2425_v44, %v2440_v53  ;;  %v2459_v33 = vsel %vm392_vm2, %v4487_v51, 0.0 }
0x15e1   :  { %2460 = vadd.xlane.f32.xlu1 %v2459_v33 }
0x15e2   :  { %v2452_v57 = vmul.f32 1.442695, %v2446_v63 }
0x15e3   :  { %v2443_v16 = vpop.xlane.xlu0 %2442 }
0x15e4   :  { %4488 = vpow2.f32 %v2452_v57  ;;  %v2447_v61 = vsub.f32 %v2428_v55, %v2443_v16 }
0x15e6   :  { %v2454_v31 = vmul.f32 1.442695, %v2447_v61 }
0x15e8   :  { %4490 = vpow2.f32 %v2454_v31 }
0x15f1   :  { %v4489_v58 = vpop.eup %4488 }
0x15f2   :  { %2527 = vrot.lane.b32.xlu1 %v5228_v42, %s4613_s29  ;;  %v2462_v5 = vsel %vm392_vm2, %v4489_v58, 0.0 }
0x15f3   :  { %2463 = vadd.xlane.f32.xlu0 %v2462_v5 }
0x15f5   :  { %v4491_v0 = vpop.eup %4490 }
0x15f6   :  { %2576 = vrot.lane.b32.xlu1 %v5208_v2, %s4614_s30  ;;  %v2465_v19 = vsel %vm392_vm2, %v4491_v0, 0.0 }
0x1609   :  { %2479 = vrot.lane.b32.xlu0 %v5210_v37, %s4613_s29 }
0x160d   :  { %2574 = vrot.lane.b32.xlu0 %v5208_v2, %s4615_s5 }
0x161a   :  { %2466 = vadd.xlane.f32.xlu1 %v2465_v19 }
0x162b   :  { %2627 = vrot.lane.b32.xlu1 %v5214_v28, %s4614_s30 }
0x162f   :  { %2625 = vrot.lane.b32.xlu1 %v5214_v28, %s4615_s5 }
0x1666   :  { %v2458_v52 = vpop.xlane.xlu0 %2457 }
0x166a   :  { %v2461_v1 = vpop.xlane.xlu1 %2460 }
0x166b   :  { %4492 = vrcp.f32 %v2461_v1 }
0x166c   :  { %4494 = vrcp.f32 %v2458_v52 }
0x166e   :  { %v2528_v30 = vpop.permute.xlu1 %2527 }
0x166f   :  { %4122 = vmatpush3.bf16.msra.mxu1 %v2528_v30 }
0x1670   :  { %4133 = vmatprep.subr.bf16.mxu1 %v4609_v26 }
0x1672   :  { %v2577_v32 = vpop.permute.xlu1 %2576 }
0x1673   :  { %v2582_v12 = vsel %vm392_vm2, %v2577_v32, 0 }
0x1678   :  { %v4493_v4 = vpop.eup %4492 }
0x1679   :  { %v4495_v3 = vpop.eup %4494  ;;  %v2473_v29 = vmul.f32 %v4493_v4, %v4487_v51 }
0x167a   :  { %v2472_v9 = vmul.f32 %v4495_v3, %v4485_v49 }
0x167c   :  { %v2464_v6 = vpop.xlane.xlu0 %2463  ;;  %v2476_v11 = vpack.c.bf16 %v2473_v29, %v2472_v9 }
0x167d   :  { %4496 = vrcp.f32 %v2464_v6 }
0x1680   :  { %v2480_v7 = vpop.permute.xlu0 %2479 }
0x1681   :  { %4116 = vmatpush3.bf16.msra.mxu0 %v2480_v7 }
0x1682   :  { %4127 = vmatprep.subr.bf16.mxu0 %v4609_v26 }
0x1684   :  { %4118 = vmatmul.mubr.msk.bf16.vlgmr.msra.gmra.mxu0 %vm392_vm2, %v2476_v11  ;;  %v2575_v14 = vpop.permute.xlu0 %2574 }
0x1685   :  { %4128 = vmatpush3.bf16.xpose.msra.mxu0 %v2582_v12  ;;  %4129 = vmatprep.mubr.msk.bf16.mxu0 %vm4610_vm1, %v4609_v26 }
0x1686   :  { %4139 = vmatprep.subr.bf16.mxu0 %v4609_v26 }
0x168a   :  { %v4497_v54 = vpop.eup %4496 }
0x168b   :  { %v2474_v25 = vmul.f32 %v4497_v54, %v4489_v58 }
0x168c   :  { %4130 = vmatmul.mubr.msk.bf16.vlgmr.msra.gmra.mxu0 %vm392_vm2, %v2575_v14 }
0x168d   :  { %4141 = vmatprep.mubr.msk.bf16.mxu0 %vm4610_vm1, %v4609_v26 }
0x16a3   :  { %v2467_v18 = vpop.xlane.xlu1 %2466 }
0x16a4   :  { %4498 = vrcp.f32 %v2467_v18 }
0x16a7   :  { %v2628_v23 = vpop.permute.xlu1 %2627 }
0x16a8   :  { %v2633_v38 = vsel %vm392_vm2, %v2628_v23, 0 }
0x16ab   :  { %v2626_v35 = vpop.permute.xlu1 %2625 }
0x16b1   :  { %v4499_v24 = vpop.eup %4498 }
0x16b2   :  { %v2475_v60 = vmul.f32 %v4499_v24, %v4491_v0 }
0x16b4   :  { %v2477_v62 = vpack.c.bf16 %v2475_v60, %v2474_v25 }
0x16b6   :  { %4124 = vmatmul.mubr.msk.bf16.vlgmr.msra.gmra.mxu1 %vm392_vm2, %v2477_v62 }
0x16b7   :  { %4134 = vmatpush3.bf16.xpose.msra.mxu1 %v2633_v38  ;;  %4135 = vmatprep.mubr.msk.bf16.mxu1 %vm4610_vm1, %v4609_v26 }
0x16b8   :  { %4145 = vmatprep.subr.bf16.mxu1 %v4609_v26 }
0x16be   :  { %4136 = vmatmul.mubr.msk.bf16.vlgmr.msra.gmra.mxu1 %vm392_vm2, %v2626_v35 }
0x16bf   :  { %4147 = vmatprep.mubr.msk.bf16.mxu1 %vm4610_vm1, %v4609_v26 }
0x1744   :  { %v5314_v39 = vpop.f32.mrf.mxu0 }
0x1746   :  { %v4119_v45 = vpop.f32.mrf.mxu0 }
0x1748   :  { %v5316_v44 = vpop.f32.mrf.mxu0 }
0x1749   :  { %v4264_v27 = vpack.i.bf16 %v5316_v44, %v5314_v39 }
0x174a   :  { %v4120_v13 = vpop.f32.mrf.mxu0 }
0x174c   :  { %v2618_v55 = vpop.f32.mrf.mxu0 }
0x174d   :  { %v2676_v15 = vsel %vm392_vm2, %v2618_v55, -inf }
0x174e   :  { %2677 = vmax.xlane.f32.xlu0 %v2676_v15  ;;  %v4131_v17 = vpop.f32.mrf.mxu0 }
0x1750   :  { %v2621_v10 = vpop.f32.mrf.mxu0 }
0x1751   :  { %v2679_v46 = vsel %vm392_vm2, %v2621_v10, -inf }
0x1752   :  { %2680 = vmax.xlane.f32.xlu1 %v2679_v46  ;;  %v4132_v56 = vpop.f32.mrf.mxu0 }
0x1776   :  { %v5322_v47 = vpop.f32.mrf.mxu1 }
0x1778   :  { %v4125_v8 = vpop.f32.mrf.mxu1 }
0x177a   :  { %v5324_v34 = vpop.f32.mrf.mxu1 }
0x177b   :  { %v4269_v49 = vpack.i.bf16 %v5324_v34, %v5322_v47 }
0x177c   :  { %v4126_v50 = vpop.f32.mrf.mxu1 }
0x177e   :  { %v2669_v51 = vpop.f32.mrf.mxu1 }
0x177f   :  { %v2682_v53 = vsel %vm392_vm2, %v2669_v51, -inf }
0x1780   :  { %v4137_v63 = vpop.f32.mrf.mxu1  ;;  %2683 = vmax.xlane.f32.xlu0 %v2682_v53 }
0x1782   :  { %v2672_v33 = vpop.f32.mrf.mxu1 }
0x1783   :  { %v2685_v57 = vsel %vm392_vm2, %v2672_v33, -inf }
0x1784   :  { %v4138_v58 = vpop.f32.mrf.mxu1  ;;  %2686 = vmax.xlane.f32.xlu0 %v2685_v57 }
0x17d7   :  { %v2678_v5 = vpop.xlane.xlu0 %2677 }
0x17d8   :  { %v2688_v16 = vsub.f32 %v2618_v55, %v2678_v5 }
0x17da   :  { %v2692_v61 = vmul.f32 1.442695, %v2688_v16 }
0x17db   :  { %v2681_v31 = vpop.xlane.xlu1 %2680 }
0x17dc   :  { %4500 = vpow2.f32 %v2692_v61  ;;  %v2689_v0 = vsub.f32 %v2621_v10, %v2681_v31 }
0x17de   :  { %v2694_v19 = vmul.f32 1.442695, %v2689_v0 }
0x17e0   :  { %4502 = vpow2.f32 %v2694_v19 }
0x17e9   :  { %v4501_v1 = vpop.eup %4500 }
0x17ea   :  { %v2700_v52 = vsel %vm392_vm2, %v4501_v1, 0.0 }
0x17eb   :  { %2701 = vadd.xlane.f32.xlu0 %v2700_v52 }
0x17ed   :  { %v4503_v30 = vpop.eup %4502 }
0x17ee   :  { %v2703_v4 = vsel %vm392_vm2, %v4503_v30, 0.0 }
0x17ef   :  { %2704 = vadd.xlane.f32.xlu1 %v2703_v4 }
0x1800   :  { %2769 = vrot.lane.b32.xlu1 %v5228_v42, %s4615_s5 }
0x1804   :  { %2818 = vrot.lane.b32.xlu1 %v5208_v2, %s4616_s6 }
0x1809   :  { %v2684_v6 = vpop.xlane.xlu0 %2683 }
0x180a   :  { %v2690_v3 = vsub.f32 %v2669_v51, %v2684_v6 }
0x180c   :  { %v2696_v29 = vmul.f32 1.442695, %v2690_v3 }
0x180d   :  { %v2687_v7 = vpop.xlane.xlu0 %2686 }
0x180e   :  { %4504 = vpow2.f32 %v2696_v29  ;;  %v2691_v9 = vsub.f32 %v2672_v33, %v2687_v7 }
0x1810   :  { %v2698_v32 = vmul.f32 1.442695, %v2691_v9 }
0x1812   :  { %4506 = vpow2.f32 %v2698_v32 }
0x181b   :  { %v4505_v11 = vpop.eup %4504 }
0x181c   :  { %v2706_v12 = vsel %vm392_vm2, %v4505_v11, 0.0 }
0x181d   :  { %2707 = vadd.xlane.f32.xlu0 %v2706_v12 }
0x181f   :  { %v4507_v14 = vpop.eup %4506 }
0x1820   :  { %v2709_v18 = vsel %vm392_vm2, %v4507_v14, 0.0 }
0x1828   :  { %2710 = vadd.xlane.f32.xlu1 %v2709_v18 }
0x1833   :  { %2722 = vrot.lane.b32.xlu0 %v5210_v37, %s4615_s5 }
0x1837   :  { %2816 = vrot.lane.b32.xlu0 %v5208_v2, %s4617_s7 }
0x1839   :  { %2869 = vrot.lane.b32.xlu1 %v5214_v28, %s4616_s6 }
0x183d   :  { %2867 = vrot.lane.b32.xlu1 %v5214_v28, %s4617_s7 }
0x1874   :  { %v2702_v25 = vpop.xlane.xlu0 %2701 }
0x1878   :  { %v2705_v54 = vpop.xlane.xlu1 %2704 }
0x1879   :  { %4508 = vrcp.f32 %v2705_v54 }
0x187a   :  { %4510 = vrcp.f32 %v2702_v25 }
0x187c   :  { %v2770_v24 = vpop.permute.xlu1 %2769 }
0x187d   :  { %4146 = vmatpush3.bf16.msra.mxu1 %v2770_v24 }
0x187e   :  { %4157 = vmatprep.subr.bf16.mxu1 %v4609_v26 }
0x1880   :  { %v2819_v45 = vpop.permute.xlu1 %2818 }
0x1881   :  { %v2824_v28 = vsel %vm392_vm2, %v2819_v45, 0 }
0x1886   :  { %v4509_v60 = vpop.eup %4508 }
0x1887   :  { %v4511_v62 = vpop.eup %4510  ;;  %v2717_v38 = vmul.f32 %v4509_v60, %v4503_v30 }
0x1888   :  { %v2716_v2 = vmul.f32 %v4511_v62, %v4501_v1 }
0x188a   :  { %v2720_v13 = vpack.c.bf16 %v2717_v38, %v2716_v2 }
0x18a6   :  { %v2708_v23 = vpop.xlane.xlu0 %2707 }
0x18a7   :  { %4512 = vrcp.f32 %v2708_v23 }
0x18aa   :  { %v2723_v35 = vpop.permute.xlu0 %2722 }
0x18ab   :  { %4140 = vmatpush3.bf16.msra.mxu0 %v2723_v35 }
0x18ac   :  { %4151 = vmatprep.subr.bf16.mxu0 %v4609_v26 }
0x18ae   :  { %4142 = vmatmul.mubr.msk.bf16.vlgmr.msra.gmra.mxu0 %vm392_vm2, %v2720_v13  ;;  %v2817_v15 = vpop.permute.xlu0 %2816 }
0x18af   :  { %4152 = vmatpush3.bf16.xpose.msra.mxu0 %v2824_v28  ;;  %4153 = vmatprep.mubr.msk.bf16.mxu0 %vm4610_vm1, %v4609_v26 }
0x18b0   :  { %4163 = vmatprep.subr.bf16.mxu0 %v4609_v26 }
0x18b1   :  { %v2711_v55 = vpop.xlane.xlu1 %2710 }
0x18b2   :  { %4514 = vrcp.f32 %v2711_v55 }
0x18b4   :  { %v4513_v17 = vpop.eup %4512 }
0x18b5   :  { %v2718_v46 = vmul.f32 %v4513_v17, %v4505_v11  ;;  %v2870_v8 = vpop.permute.xlu1 %2869 }
0x18b6   :  { %4154 = vmatmul.mubr.msk.bf16.vlgmr.msra.gmra.mxu0 %vm392_vm2, %v2817_v15  ;;  %v2875_v51 = vsel %vm392_vm2, %v2870_v8, 0 }
0x18b7   :  { %4165 = vmatprep.mubr.msk.bf16.mxu0 %vm4610_vm1, %v4609_v26 }
0x18b9   :  { %v2868_v53 = vpop.permute.xlu1 %2867 }
0x18bf   :  { %v4515_v10 = vpop.eup %4514 }
0x18c0   :  { %v2719_v56 = vmul.f32 %v4515_v10, %v4507_v14 }
0x18c2   :  { %v2721_v50 = vpack.c.bf16 %v2719_v56, %v2718_v46 }
0x18c4   :  { %4148 = vmatmul.mubr.msk.bf16.vlgmr.msra.gmra.mxu1 %vm392_vm2, %v2721_v50 }
0x18c5   :  { %4158 = vmatpush3.bf16.xpose.msra.mxu1 %v2875_v51  ;;  %4159 = vmatprep.mubr.msk.bf16.mxu1 %vm4610_vm1, %v4609_v26 }
0x18c6   :  { %4169 = vmatprep.subr.bf16.mxu1 %v4609_v26 }
0x18cc   :  { %4160 = vmatmul.mubr.msk.bf16.vlgmr.msra.gmra.mxu1 %vm392_vm2, %v2868_v53 }
0x18cd   :  { %4171 = vmatprep.mubr.msk.bf16.mxu1 %vm4610_vm1, %v4609_v26 }
0x196e   :  { %v2762_v63 = vpop.f32.mrf.mxu0 }
0x1970   :  { %v4143_v33 = vpop.f32.mrf.mxu0 }
0x1972   :  { %v2765_v57 = vpop.f32.mrf.mxu0 }
0x1973   :  { %v4274_v58 = vpack.i.bf16 %v2765_v57, %v2762_v63 }
0x1974   :  { %v4144_v5 = vpop.f32.mrf.mxu0 }
0x1975   :  { %v4341_v5 = vld [vmem:[%s5612_s1 + $0x1e0] ss:$8 sps:$4 sm:$0xff]  }
0x1976   :  { %v2860_v16 = vpop.f32.mrf.mxu0 }
0x1977   :  { %v2918_v61 = vsel %vm392_vm2, %v2860_v16, -inf }
0x1978   :  { %2919 = vmax.xlane.f32.xlu0 %v2918_v61  ;;  %v4155_v31 = vpop.f32.mrf.mxu0  ;;  %v4342_v61 = vld [vmem:[%s5612_s1 + $0x1d0] ss:$8 sps:$4 sm:$0xff]  }
0x197a   :  { %v2863_v0 = vpop.f32.mrf.mxu0 }
0x197b   :  { %v2921_v19 = vsel %vm392_vm2, %v2863_v0, -inf }
0x197c   :  { %2922 = vmax.xlane.f32.xlu1 %v2921_v19  ;;  %v4156_v1 = vpop.f32.mrf.mxu0 }
0x1984   :  { %v2809_v52 = vpop.f32.mrf.mxu1 }
0x1986   :  { %v4149_v30 = vpop.f32.mrf.mxu1 }
0x1988   :  { %v2812_v4 = vpop.f32.mrf.mxu1 }
0x1989   :  { %v4279_v6 = vpack.i.bf16 %v2812_v4, %v2809_v52  ;;  %v4343_v52 = vld [vmem:[%s5612_s1 + $0x1c0] ss:$8 sps:$4 sm:$0xff]  }
0x198a   :  { %v4150_v26 = vpop.f32.mrf.mxu1 }
0x198c   :  { %v2911_v3 = vpop.f32.mrf.mxu1 }
0x198d   :  { %v2924_v29 = vsel %vm392_vm2, %v2911_v3, -inf }
0x198e   :  { %v4161_v7 = vpop.f32.mrf.mxu1  ;;  %2925 = vmax.xlane.f32.xlu0 %v2924_v29 }
0x1990   :  { %v2914_v9 = vpop.f32.mrf.mxu1 }
0x1991   :  { %v2927_v32 = vsel %vm392_vm2, %v2914_v9, -inf }
0x1992   :  { %v4162_v11 = vpop.f32.mrf.mxu1  ;;  %2928 = vmax.xlane.f32.xlu0 %v2927_v32 }
0x1a01   :  { %v2920_v12 = vpop.xlane.xlu0 %2919 }
0x1a02   :  { %v2930_v14 = vsub.f32 %v2860_v16, %v2920_v12 }
0x1a04   :  { %v2934_v18 = vmul.f32 1.442695, %v2930_v14 }
0x1a05   :  { %v2923_v54 = vpop.xlane.xlu1 %2922 }
0x1a06   :  { %4516 = vpow2.f32 %v2934_v18  ;;  %v2931_v24 = vsub.f32 %v2863_v0, %v2923_v54 }
0x1a08   :  { %v2936_v25 = vmul.f32 1.442695, %v2931_v24 }
0x1a0a   :  { %4518 = vpow2.f32 %v2936_v25 }
0x1a13   :  { %v4517_v60 = vpop.eup %4516 }
0x1a14   :  { %v2942_v23 = vsel %vm392_vm2, %v4517_v60, 0.0 }
0x1a15   :  { %2943 = vadd.xlane.f32.xlu0 %v2942_v23 }
0x1a17   :  { %v4519_v62 = vpop.eup %4518  ;;  %v2926_v38 = vpop.xlane.xlu0 %2925 }
0x1a18   :  { %v2932_v35 = vsub.f32 %v2911_v3, %v2926_v38  ;;  %v2945_v2 = vsel %vm392_vm2, %v4519_v62, 0.0 }
0x1a19   :  { %2946 = vadd.xlane.f32.xlu1 %v2945_v2 }
0x1a1a   :  { %v2938_v45 = vmul.f32 1.442695, %v2932_v35 }
0x1a1b   :  { %v2929_v13 = vpop.xlane.xlu0 %2928 }
0x1a1c   :  { %4520 = vpow2.f32 %v2938_v45  ;;  %v2933_v28 = vsub.f32 %v2914_v9, %v2929_v13 }
0x1a1e   :  { %v2940_v55 = vmul.f32 1.442695, %v2933_v28 }
0x1a20   :  { %4522 = vpow2.f32 %v2940_v55 }
0x1a29   :  { %v4521_v15 = vpop.eup %4520 }
0x1a2a   :  { %v2948_v17 = vsel %vm392_vm2, %v4521_v15, 0.0 }
0x1a2b   :  { %2949 = vadd.xlane.f32.xlu0 %v2948_v17 }
0x1a2d   :  { %v4523_v10 = vpop.eup %4522 }
0x1a2e   :  { %v2951_v46 = vsel %vm392_vm2, %v4523_v10, 0.0 }
0x1a2f   :  { %2952 = vadd.xlane.f32.xlu1 %v2951_v46 }
0x1a40   :  { %3011 = vrot.lane.b32.xlu1 %v5228_v42, %s4617_s7 }
0x1a41   :  { %2964 = vrot.lane.b32.xlu0 %v5210_v37, %s4617_s7 }
0x1a44   :  { %4265 = vrot.lane.b32.xlu1 %v4264_v27, %s4616_s6 }
0x1a45   :  { %4275 = vrot.lane.b32.xlu0 %v4274_v58, %s4614_s30  ;;  %v4340_v58 = vld [vmem:[%s5612_s1 + $0x1f0] ss:$8 sps:$4 sm:$0xff]  }
0x1a48   :  { %4270 = vrot.lane.b32.xlu1 %v4269_v49, %s4616_s6 }
0x1a4c   :  { %4280 = vrot.lane.b32.xlu1 %v4279_v6, %s4614_s30 }
0x1a9e   :  { %v2944_v8 = vpop.xlane.xlu0 %2943 }
0x1aa2   :  { %v2947_v56 = vpop.xlane.xlu1 %2946 }
0x1aa3   :  { %4524 = vrcp.f32 %v2947_v56 }
0x1aa4   :  { %4526 = vrcp.f32 %v2944_v8 }
0x1ab0   :  { %v4525_v42 = vpop.eup %4524 }
0x1ab1   :  { %v4527_v50 = vpop.eup %4526  ;;  %v2959_v51 = vmul.f32 %v4525_v42, %v4519_v62 }
0x1ab2   :  { %v2958_v27 = vmul.f32 %v4527_v50, %v4517_v60 }
0x1ab4   :  { %v2950_v37 = vpop.xlane.xlu0 %2949  ;;  %v2962_v53 = vpack.c.bf16 %v2959_v51, %v2958_v27 }
0x1ab5   :  { %4528 = vrcp.f32 %v2950_v37 }
0x1ab8   :  { %v2965_v39 = vpop.permute.xlu0 %2964  ;;  %v2953_v44 = vpop.xlane.xlu1 %2952 }
0x1ab9   :  { %4530 = vrcp.f32 %v2953_v44  ;;  %4164 = vmatpush3.bf16.msra.mxu0 %v2965_v39 }
0x1aba   :  { %4175 = vmatprep.subr.bf16.mxu0 %v4340_v58 }
0x1abc   :  { %4166 = vmatmul.mubr.msk.bf16.vlgmr.msra.gmra.mxu0 %vm392_vm2, %v2962_v53  ;;  %v3012_v47 = vpop.permute.xlu1 %3011  ;;  %v4276_v32 = vpop.permute.xlu0 %4275 }
0x1abd   :  { %4170 = vmatpush3.bf16.msra.mxu1 %v3012_v47  ;;  %4176 = vmatpush3.bf16.msra.mxu0 %v4340_v58  ;;  %v4278_v14 = vunpack.i.h.bf16 %v4276_v32  ;;  %v4277_v18 = vunpack.i.l.bf16 %v4276_v32 }
0x1abe   :  { %4177 = vmatprep.subr.bf16.mxu0 %v4341_v5 }
0x1ac0   :  { %v4266_v29 = vpop.permute.xlu1 %4265 }
0x1ac1   :  { %4178 = vmatpush3.bf16.msra.mxu0 %v4341_v5  ;;  %v4268_v7 = vunpack.i.h.bf16 %v4266_v29  ;;  %v4267_v9 = vunpack.i.l.bf16 %v4266_v29 }
0x1ac2   :  { %v4529_v34 = vpop.eup %4528  ;;  %4179 = vmatprep.subr.bf16.mxu0 %v4342_v61 }
0x1ac3   :  { %v2960_v63 = vmul.f32 %v4529_v34, %v4521_v15  ;;  %v3107_v11 = vsel %vm392_vm2, %v5270_v22, %v4268_v7  ;;  %v3106_v12 = vsel %vm392_vm2, %v5268_v20, %v4267_v9 }
0x1ac4   :  { %v3110_v60 = vsel %vm1404_vm3, %v3106_v12, %v4277_v18  ;;  %v3111_v23 = vsel %vm1404_vm3, %v3107_v11, %v4278_v14  ;;  %v4271_v35 = vpop.permute.xlu1 %4270 }
0x1ac5   :  { %4180 = vmatpush3.bf16.msra.mxu0 %v4342_v61  ;;  %v4273_v45 = vunpack.i.h.bf16 %v4271_v35  ;;  %v4272_v20 = vunpack.i.l.bf16 %v4271_v35 }
0x1ac6   :  { %v4531_v49 = vpop.eup %4530  ;;  %4181 = vmatprep.subr.bf16.mxu0 %v4343_v52 }
0x1ac7   :  { %v2961_v33 = vmul.f32 %v4531_v49, %v4523_v10  ;;  %v3109_v15 = vsel %vm392_vm2, %v5276_v41, %v4273_v45  ;;  %v3108_v17 = vsel %vm392_vm2, %v5274_v36, %v4272_v20  ;;  %v3128_v41 = vld [vmem:[%s5613_s2 + $0x16] ss:$0 sm:$0xff] }
0x1ac8   :  { %v4281_v22 = vpop.permute.xlu1 %4280 }
0x1ac9   :  { %v2963_v57 = vpack.c.bf16 %v2961_v33, %v2960_v63  ;;  %4182 = vmatpush3.bf16.msra.mxu0 %v4343_v52  ;;  %v4283_v13 = vunpack.i.h.bf16 %v4281_v22  ;;  %v4282_v28 = vunpack.i.l.bf16 %v4281_v22  ;;  %v4344_v52 = vld [vmem:[%s5612_s1 + $0x230] ss:$8 sps:$4 sm:$0xff]  }
0x1aca   :  { %4187 = vmatprep.subr.bf16.mxu1 %v4344_v52 }
0x1acb   :  { %4172 = vmatmul.mubr.msk.bf16.vlgmr.msra.gmra.mxu1 %vm392_vm2, %v2963_v57  ;;  %v3112_v56 = vsel %vm1404_vm3, %v3108_v17, %v4282_v28  ;;  %v3113_v8 = vsel %vm1404_vm3, %v3109_v15, %v4283_v13 }
0x1acc   :  { %4188 = vmatpush3.bf16.msra.mxu1 %v4344_v52  ;;  %v4351_v52 = vld [vmem:[%s5612_s1 + $0x280] ss:$8 sps:$4 sm:$0xff]  }
0x1b7c   :  { %v3004_v16 = vpop.f32.mrf.mxu0 }
0x1b7e   :  { %v4167_v31 = vpop.f32.mrf.mxu0 }
0x1b80   :  { %v3007_v0 = vpop.f32.mrf.mxu0 }
0x1b81   :  { %v4284_v19 = vpack.i.bf16 %v3007_v0, %v3004_v16 }
0x1b82   :  { %v4168_v1 = vpop.f32.mrf.mxu0 }
0x1b83   :  { %4285 = vrot.lane.b32.xlu0 %v4284_v19, %s4612_s0 }
0x1b8b   :  { %v3051_v30 = vpop.f32.mrf.mxu1 }
0x1b8d   :  { %v4173_v4 = vpop.f32.mrf.mxu1 }
0x1b8e   :  { %v4346_v4 = vld [vmem:[%s5612_s1 + $0x210] ss:$8 sps:$4 sm:$0xff]  }
0x1b8f   :  { %v3054_v6 = vpop.f32.mrf.mxu1 }
0x1b90   :  { %v4289_v26 = vpack.i.bf16 %v3054_v6, %v3051_v30  ;;  %v4345_v30 = vld [vmem:[%s5612_s1 + $0x220] ss:$8 sps:$4 sm:$0xff]  }
0x1b91   :  { %v4174_v3 = vpop.f32.mrf.mxu1  ;;  %4189 = vmatprep.subr.bf16.mxu1 %v4345_v30  ;;  %v4347_v6 = vld [vmem:[%s5612_s1 + $0x200] ss:$8 sps:$4 sm:$0xff]  }
0x1b92   :  { %4290 = vrot.lane.b32.xlu1 %v4289_v26, %s4612_s0  ;;  %4190 = vmatpush3.bf16.msra.mxu1 %v4345_v30  ;;  %v4352_v30 = vld [vmem:[%s5612_s1 + $0x270] ss:$8 sps:$4 sm:$0xff]  }
0x1b93   :  { %4191 = vmatprep.subr.bf16.mxu1 %v4346_v4 }
0x1b96   :  { %4192 = vmatpush3.bf16.msra.mxu1 %v4346_v4  ;;  %v4353_v4 = vld [vmem:[%s5612_s1 + $0x260] ss:$8 sps:$4 sm:$0xff]  }
0x1b97   :  { %4193 = vmatprep.subr.bf16.mxu1 %v4347_v6 }
0x1b9a   :  { %4194 = vmatpush3.bf16.msra.mxu1 %v4347_v6  ;;  %v4354_v6 = vld [vmem:[%s5612_s1 + $0x250] ss:$8 sps:$4 sm:$0xff]  }
0x1bf5   :  { %v4286_v54 = vpop.permute.xlu0 %4285 }
0x1bf6   :  { %v4288_v24 = vunpack.i.h.bf16 %v4286_v54  ;;  %v4287_v25 = vunpack.i.l.bf16 %v4286_v54 }
0x1bf8   :  { %v3115_v62 = vsel %vm1409_vm4, %v3111_v23, %v4288_v24  ;;  %v3114_v38 = vsel %vm1409_vm4, %v3110_v60, %v4287_v25 }
0x1bf9   :  { %v3126_v2 = vpack.c.bf16 %v3115_v62, %v3114_v38 }
0x1bfb   :  { %4183 = vmatprep.mubr.msk.bf16.mxu0 %vm66_vm0, %v3126_v2 }
0x1c04   :  { %v4291_v55 = vpop.permute.xlu1 %4290 }
0x1c05   :  { %v4293_v10 = vunpack.i.h.bf16 %v4291_v55  ;;  %v4292_v46 = vunpack.i.l.bf16 %v4291_v55 }
0x1c07   :  { %v3116_v42 = vsel %vm1409_vm4, %v3112_v56, %v4292_v46  ;;  %v3117_v37 = vsel %vm1409_vm4, %v3113_v8, %v4293_v10  ;;  %v3272_v8 = vld [vmem:[%s5613_s2 + $0x17] ss:$0 sm:$0xff] }
0x1c08   :  { %v3127_v50 = vpack.c.bf16 %v3117_v37, %v3116_v42 }
0x1c0a   :  { %4184 = vmatmul.mubr.msk.bf16.vlgmr.msra.gmra.mxu0 %vm66_vm0, %v3127_v50 }
0x1cca   :  { %v4185_v51 = vpop.f32.mrf.mxu0 }
0x1ccb   :  { %v3202_v39 = vadd.f32 %v4185_v51, %v3128_v41 }
0x1ccc   :  { %v3193_v36 = vpop.f32.mrf.mxu0 }
0x1ccd   :  { %v5424_v44 = vadd.f32 %v3202_v39, %v5122_v21  ;;  %v3194_v27 = vadd.f32 %v3193_v36, %v3128_v41 }
0x1cce   :  { %v4186_v53 = vpop.f32.mrf.mxu0 }
0x1ccf   :  { %v5427_v47 = vadd.f32 %v3194_v27, %v5127_v40  ;;  %v3205_v34 = vadd.f32 %v4186_v53, %v3128_v41  ;;  %v3218_v49 = vsel %vm66_vm0, %v5424_v44, 0.0  ;;  %v3230_v0 = vmul.f32 %v5424_v44, %v5424_v44  ;;  %v3277_v27 = vld [vmem:[%s5613_s2 + $0x20] ss:$0 sm:$0xff] }
0x1cd0   :  { %3219 = vadd.xlane.f32.xlu0 %v3218_v49  ;;  %v3196_v63 = vpop.f32.mrf.mxu0 }
0x1cd1   :  { %v3197_v33 = vadd.f32 %v3196_v63, %v3128_v41  ;;  %v5432_v57 = vadd.f32 %v3205_v34, %v5132_v43  ;;  %v3212_v21 = vsel %vm66_vm0, %v5427_v47, 0.0  ;;  %v3228_v43 = vmul.f32 %v5427_v47, %v5427_v47 }
0x1cd2   :  { %v3238_v1 = vsel %vm66_vm0, %v3230_v0, 0.0  ;;  %v4348_v0 = vld [vmem:[%s5612_s1 + $0x2b0] ss:$8 sps:$4 sm:$0xff]  }
0x1cd3   :  { %v5435_v58 = vadd.f32 %v3197_v33, %v5141_v48  ;;  %v3221_v16 = vsel %vm66_vm0, %v5432_v57, 0.0  ;;  %v3231_v61 = vmul.f32 %v5432_v57, %v5432_v57  ;;  %v3232_v31 = vsel %vm66_vm0, %v3228_v43, 0.0  ;;  %4199 = vmatprep.subr.bf16.mxu0 %v4348_v0 }
0x1cd4   :  { %3213 = vadd.xlane.f32.xlu0 %v3212_v21  ;;  %4200 = vmatpush3.bf16.msra.mxu0 %v4348_v0 }
0x1cd5   :  { %v3215_v40 = vsel %vm66_vm0, %v5435_v58, 0.0  ;;  %v3229_v5 = vmul.f32 %v5435_v58, %v5435_v58  ;;  %v3241_v19 = vsel %vm66_vm0, %v3231_v61, 0.0 }
0x1cd6   :  { %3216 = vadd.xlane.f32.xlu1 %v3215_v40 }
0x1cd7   :  { %v3235_v48 = vsel %vm66_vm0, %v3229_v5, 0.0 }
0x1cd8   :  { %3222 = vadd.xlane.f32.xlu0 %v3221_v16 }
0x1cda   :  { %3236 = vadd.xlane.f32.xlu1 %v3235_v48 }
0x1cdc   :  { %3233 = vadd.xlane.f32.xlu0 %v3232_v31 }
0x1cde   :  { %3242 = vadd.xlane.f32.xlu1 %v3241_v19  ;;  %v4349_v19 = vld [vmem:[%s5612_s1 + $0x2a0] ss:$8 sps:$4 sm:$0xff]  }
0x1cdf   :  { %4201 = vmatprep.subr.bf16.mxu0 %v4349_v19 }
0x1ce0   :  { %3239 = vadd.xlane.f32.xlu0 %v3238_v1  ;;  %4202 = vmatpush3.bf16.msra.mxu0 %v4349_v19  ;;  %v4350_v1 = vld [vmem:[%s5612_s1 + $0x290] ss:$8 sps:$4 sm:$0xff]  }
0x1ce1   :  { %4203 = vmatprep.subr.bf16.mxu0 %v4350_v1 }
0x1ce4   :  { %4204 = vmatpush3.bf16.msra.mxu0 %v4350_v1 }
0x1ce5   :  { %4205 = vmatprep.subr.bf16.mxu0 %v4351_v52 }
0x1ce8   :  { %4206 = vmatpush3.bf16.msra.mxu0 %v4351_v52 }
0x1ce9   :  { %4207 = vmatprep.subr.bf16.mxu0 %v4352_v30 }
0x1cec   :  { %4208 = vmatpush3.bf16.msra.mxu0 %v4352_v30 }
0x1ced   :  { %4209 = vmatprep.subr.bf16.mxu0 %v4353_v4 }
0x1cf0   :  { %4210 = vmatpush3.bf16.msra.mxu0 %v4353_v4 }
0x1cf1   :  { %4211 = vmatprep.subr.bf16.mxu0 %v4354_v6 }
0x1cf4   :  { %4212 = vmatpush3.bf16.msra.mxu0 %v4354_v6 }
0x1d59   :  { %v3220_v26 = vpop.xlane.xlu0 %3219 }
0x1d5a   :  { %v3226_v54 = vmul.f32 0.015625, %v3220_v26  ;;  %v4355_v26 = vld [vmem:[%s5612_s1 + $0x240] ss:$8 sps:$4 sm:$0xff]  }
0x1d5b   :  { %4213 = vmatprep.subr.bf16.mxu0 %v4355_v26 }
0x1d5c   :  { %v3250_v45 = vmul.f32 %v3226_v54, %v3226_v54  ;;  %v3258_v53 = vsub.f32 %v5424_v44, %v3226_v54  ;;  %4214 = vmatpush3.bf16.msra.mxu0 %v4355_v26 }
0x1d5d   :  { %v3214_v3 = vpop.xlane.xlu0 %3213 }
0x1d5e   :  { %v3224_v32 = vmul.f32 0.015625, %v3214_v3  ;;  %v3292_v3 = vld [vmem:[%s5613_s2 + $0x21] ss:$0 sm:$0xff] }
0x1d5f   :  { %v3217_v29 = vpop.xlane.xlu1 %3216 }
0x1d60   :  { %v3225_v7 = vmul.f32 0.015625, %v3217_v29  ;;  %v3248_v25 = vmul.f32 %v3224_v32, %v3224_v32  ;;  %v3256_v42 = vsub.f32 %v5427_v47, %v3224_v32 }
0x1d61   :  { %v3223_v9 = vpop.xlane.xlu0 %3222 }
0x1d62   :  { %v3249_v12 = vmul.f32 %v3225_v7, %v3225_v7  ;;  %v3227_v14 = vmul.f32 0.015625, %v3223_v9  ;;  %v3257_v46 = vsub.f32 %v5435_v58, %v3225_v7 }
0x1d63   :  { %v3237_v11 = vpop.xlane.xlu1 %3236 }
0x1d64   :  { %v3245_v18 = vmul.f32 0.015625, %v3237_v11  ;;  %v3251_v38 = vmul.f32 %v3227_v14, %v3227_v14  ;;  %v3259_v41 = vsub.f32 %v5432_v57, %v3227_v14 }
0x1d65   :  { %v3234_v24 = vpop.xlane.xlu0 %3233 }
0x1d66   :  { %v3253_v60 = vsub.f32 %v3245_v18, %v3249_v12  ;;  %v3244_v23 = vmul.f32 0.015625, %v3234_v24 }
0x1d67   :  { %v3243_v62 = vpop.xlane.xlu1 %3242 }
0x1d68   :  { %v3261_v35 = vadd.f32 1e-05, %v3253_v60  ;;  %v3252_v2 = vsub.f32 %v3244_v23, %v3248_v25  ;;  %v3247_v22 = vmul.f32 0.015625, %v3243_v62 }
0x1d69   :  { %v3240_v20 = vpop.xlane.xlu0 %3239 }
0x1d6a   :  { %4532 = vrsqrt.f32 %v3261_v35  ;;  %v3260_v13 = vadd.f32 1e-05, %v3252_v2  ;;  %v3255_v28 = vsub.f32 %v3247_v22, %v3251_v38  ;;  %v3246_v55 = vmul.f32 0.015625, %v3240_v20 }
0x1d6c   :  { %4534 = vrsqrt.f32 %v3260_v13  ;;  %v3263_v15 = vadd.f32 1e-05, %v3255_v28  ;;  %v3254_v17 = vsub.f32 %v3246_v55, %v3250_v45 }
0x1d6e   :  { %4536 = vrsqrt.f32 %v3263_v15  ;;  %v3262_v10 = vadd.f32 1e-05, %v3254_v17 }
0x1d70   :  { %4538 = vrsqrt.f32 %v3262_v10 }
0x1d77   :  { %v4533_v56 = vpop.eup %4532 }
0x1d78   :  { %v3269_v37 = vmul.f32 %v4533_v56, %v3257_v46 }
0x1d79   :  { %v4535_v50 = vpop.eup %4534 }
0x1d7a   :  { %v3268_v51 = vmul.f32 %v4535_v50, %v3256_v42  ;;  %v3274_v39 = vmul.f32 %v3272_v8, %v3269_v37 }
0x1d7b   :  { %v4537_v36 = vpop.eup %4536 }
0x1d7c   :  { %v3271_v34 = vmul.f32 %v4537_v36, %v3259_v41  ;;  %v3273_v49 = vmul.f32 %v3272_v8, %v3268_v51  ;;  %v3279_v40 = vadd.f32 %v3277_v27, %v3274_v39 }
0x1d7d   :  { %v4539_v63 = vpop.eup %4538 }
0x1d7e   :  { %v3270_v33 = vmul.f32 %v4539_v63, %v3258_v53  ;;  %v3278_v21 = vadd.f32 %v3277_v27, %v3273_v49  ;;  %v3276_v5 = vmul.f32 %v3272_v8, %v3271_v34 }
0x1d80   :  { %v3290_v16 = vpack.c.bf16 %v3279_v40, %v3278_v21  ;;  %v3275_v43 = vmul.f32 %v3272_v8, %v3270_v33  ;;  %v3281_v61 = vadd.f32 %v3277_v27, %v3276_v5 }
0x1d82   :  { %4195 = vmatprep.mubr.msk.bf16.mxu1 %vm66_vm0, %v3290_v16  ;;  %v3280_v48 = vadd.f32 %v3277_v27, %v3275_v43 }
0x1d84   :  { %v3291_v31 = vpack.c.bf16 %v3281_v61, %v3280_v48 }
0x1d86   :  { %4196 = vmatmul.mubr.msk.bf16.vlgmr.msra.gmra.mxu1 %vm66_vm0, %v3291_v31 }
0x1e46   :  { %v4197_v29 = vpop.f32.mrf.mxu1 }
0x1e47   :  { %v5506_v7 = vadd.f32 %v4197_v29, %v3292_v3 }
0x1e48   :  { %v3357_v9 = vpop.f32.mrf.mxu1 }
0x1e49   :  { %v5509_v32 = vmul.f32 0.70710677, %v5506_v7  ;;  %v5511_v11 = vadd.f32 %v3357_v9, %v3292_v3 }
0x1e4a   :  { %v4198_v12 = vpop.f32.mrf.mxu1 }
0x1e4b   :  { %v3390_v14 = vand.u32 2147483647, %v5509_v32  ;;  %v5515_v18 = vmul.f32 0.70710677, %v5511_v11  ;;  %v5517_v54 = vadd.f32 %v4198_v12, %v3292_v3  ;;  %vm3382_vm9 = vcmp.lt.f32.partialorder %v5509_v32, 0.0 }
0x1e4c   :  { %v3360_v24 = vpop.f32.mrf.mxu1 }
0x1e4d   :  { %v3394_v25 = vmul.f32 0.3275911, %v3390_v14  ;;  %v3388_v60 = vand.u32 2147483647, %v5515_v18  ;;  %v5521_v23 = vmul.f32 0.70710677, %v5517_v54  ;;  %v5523_v62 = vadd.f32 %v3360_v24, %v3292_v3 }
0x1e4e   :  { %v3446_v17 = vsub.f32 0.0, %v3390_v14  ;;  %vm3380_vm10 = vcmp.lt.f32.partialorder %v5515_v18, 0.0 }
0x1e4f   :  { %v3398_v38 = vadd.f32 1.0, %v3394_v25  ;;  %v3392_v35 = vmul.f32 0.3275911, %v3388_v60  ;;  %v3391_v2 = vand.u32 2147483647, %v5521_v23  ;;  %v3444_v10 = vsub.f32 0.0, %v3388_v60 }
0x1e50   :  { %v5527_v22 = vmul.f32 0.70710677, %v5523_v62  ;;  %v3450_v46 = vmul.f32 %v3446_v17, %v3390_v14  ;;  %vm3383_vm11 = vcmp.lt.f32.partialorder %v5521_v23, 0.0 }
0x1e51   :  { %4540 = vrcp.f32 %v3398_v38  ;;  %v3396_v45 = vadd.f32 1.0, %v3392_v35  ;;  %v3395_v20 = vmul.f32 0.3275911, %v3391_v2  ;;  %v3447_v56 = vsub.f32 0.0, %v3391_v2 }
0x1e52   :  { %v3389_v13 = vand.u32 2147483647, %v5527_v22  ;;  %v3448_v42 = vmul.f32 %v3444_v10, %v3388_v60  ;;  %v3456_v41 = vmul.f32 1.442695, %v3450_v46  ;;  %vm3381_vm12 = vcmp.lt.f32.partialorder %v5527_v22, 0.0 }
0x1e53   :  { %4542 = vrcp.f32 %v3396_v45  ;;  %v3399_v28 = vadd.f32 1.0, %v3395_v20  ;;  %v3451_v51 = vmul.f32 %v3447_v56, %v3391_v2  ;;  %v3385_v23 = vsel %vm3381_vm12, -1.0, %v4618_v59 }
0x1e54   :  { %v3393_v55 = vmul.f32 0.3275911, %v3389_v13  ;;  %v3445_v50 = vsub.f32 0.0, %v3389_v13  ;;  %v3452_v53 = vmul.f32 1.442695, %v3448_v42 }
0x1e55   :  { %4544 = vrcp.f32 %v3399_v28  ;;  %v3458_v40 = vmul.f32 1.442695, %v3451_v51 }
0x1e56   :  { %v3397_v15 = vadd.f32 1.0, %v3393_v55  ;;  %v3449_v63 = vmul.f32 %v3445_v50, %v3389_v13 }
0x1e58   :  { %4546 = vrcp.f32 %v3397_v15  ;;  %v3454_v0 = vmul.f32 1.442695, %v3449_v63 }
0x1e59   :  { %4548 = vpow2.f32 %v3456_v41 }
0x1e5a   :  { %4550 = vpow2.f32 %v3452_v53 }
0x1e5b   :  { %4552 = vpow2.f32 %v3458_v40 }
0x1e5c   :  { %4554 = vpow2.f32 %v3454_v0 }
0x1e5e   :  { %v4541_v8 = vpop.eup %4540 }
0x1e5f   :  { %v3410_v37 = vmul.f32 1.0614054, %v4541_v8 }
0x1e60   :  { %v4543_v39 = vpop.eup %4542 }
0x1e61   :  { %v3414_v36 = vadd.f32 -1.4531521, %v3410_v37  ;;  %v3408_v27 = vmul.f32 1.0614054, %v4543_v39 }
0x1e62   :  { %v4545_v34 = vpop.eup %4544 }
0x1e63   :  { %v3418_v49 = vmul.f32 %v4541_v8, %v3414_v36  ;;  %v3412_v33 = vadd.f32 -1.4531521, %v3408_v27  ;;  %v3411_v21 = vmul.f32 1.0614054, %v4545_v34  ;;  %v3384_v36 = vsel %vm3380_vm10, -1.0, %v4618_v59 }
0x1e65   :  { %v3422_v5 = vadd.f32 1.4214138, %v3418_v49  ;;  %v4547_v16 = vpop.eup %4546  ;;  %v3416_v43 = vmul.f32 %v4543_v39, %v3412_v33  ;;  %v3415_v48 = vadd.f32 -1.4531521, %v3411_v21 }
0x1e66   :  { %v3409_v31 = vmul.f32 1.0614054, %v4547_v16  ;;  %v4549_v45 = vpop.eup %4548 }
0x1e67   :  { %v3426_v61 = vmul.f32 %v4541_v8, %v3422_v5  ;;  %v3420_v19 = vadd.f32 1.4214138, %v3416_v43  ;;  %v3419_v1 = vmul.f32 %v4545_v34, %v3415_v48  ;;  %v4551_v15 = vpop.eup %4550  ;;  %v3372_v43 = vmul.f32 0.5, %v5511_v11 }
0x1e68   :  { %v3413_v30 = vadd.f32 -1.4531521, %v3409_v31  ;;  %v4553_v56 = vpop.eup %4552  ;;  %v3373_v48 = vmul.f32 0.5, %v5523_v62  ;;  %v3374_v31 = vmul.f32 0.5, %v5506_v7 }
0x1e69   :  { %v3430_v52 = vadd.f32 -0.28449672, %v3426_v61  ;;  %v3424_v4 = vmul.f32 %v4543_v39, %v3420_v19  ;;  %v3423_v6 = vadd.f32 1.4214138, %v3419_v1  ;;  %v4555_v51 = vpop.eup %4554 }
0x1e6a   :  { %v3417_v3 = vmul.f32 %v4547_v16, %v3413_v30 }
0x1e6b   :  { %v3434_v26 = vmul.f32 %v4541_v8, %v3430_v52  ;;  %v3428_v29 = vadd.f32 -0.28449672, %v3424_v4  ;;  %v3427_v9 = vmul.f32 %v4545_v34, %v3423_v6 }
0x1e6c   :  { %v3421_v14 = vadd.f32 1.4214138, %v3417_v3 }
0x1e6d   :  { %v3438_v12 = vadd.f32 0.2548296, %v3434_v26  ;;  %v3432_v24 = vmul.f32 %v4543_v39, %v3428_v29  ;;  %v3431_v25 = vadd.f32 -0.28449672, %v3427_v9 }
0x1e6e   :  { %v3425_v38 = vmul.f32 %v4547_v16, %v3421_v14 }
0x1e6f   :  { %v3442_v60 = vmul.f32 %v4541_v8, %v3438_v12  ;;  %v3436_v35 = vadd.f32 0.2548296, %v3432_v24  ;;  %v3435_v2 = vmul.f32 %v4545_v34, %v3431_v25 }
0x1e70   :  { %v3429_v20 = vadd.f32 -0.28449672, %v3425_v38 }
0x1e71   :  { %v3462_v13 = vmul.f32 %v4549_v45, %v3442_v60  ;;  %v3440_v28 = vmul.f32 %v4543_v39, %v3436_v35  ;;  %v3439_v55 = vadd.f32 0.2548296, %v3435_v2  ;;  %v3386_v39 = vsel %vm3382_vm9, -1.0, %v4618_v59 }
0x1e72   :  { %v3433_v17 = vmul.f32 %v4547_v16, %v3429_v20 }
0x1e73   :  { %v3460_v10 = vmul.f32 %v4551_v15, %v3440_v28  ;;  %v3443_v46 = vmul.f32 %v4545_v34, %v3439_v55  ;;  %v3466_v37 = vsub.f32 1.0, %v3462_v13  ;;  %v3387_v34 = vsel %vm3383_vm11, -1.0, %v4618_v59  ;;  %v3498_v59 = vld [vmem:[%s5613_s2 + $0x22] ss:$0 sm:$0xff] }
0x1e74   :  { %v3437_v42 = vadd.f32 0.2548296, %v3433_v17 }
0x1e75   :  { %v3464_v8 = vsub.f32 1.0, %v3460_v10  ;;  %v3463_v50 = vmul.f32 %v4553_v56, %v3443_v46  ;;  %v3470_v18 = vmul.f32 %v3466_v37, %v3386_v39 }
0x1e76   :  { %v3441_v41 = vmul.f32 %v4547_v16, %v3437_v42  ;;  %v3375_v16 = vmul.f32 0.5, %v5517_v54 }
0x1e77   :  { %v3467_v27 = vsub.f32 1.0, %v3463_v50  ;;  %v3468_v53 = vmul.f32 %v3464_v8, %v3384_v36  ;;  %v3474_v5 = vadd.f32 1.0, %v3470_v18 }
0x1e78   :  { %v3461_v32 = vmul.f32 %v4555_v51, %v3441_v41 }
0x1e79   :  { %v3471_v49 = vmul.f32 %v3467_v27, %v3387_v34  ;;  %v3472_v21 = vadd.f32 1.0, %v3468_v53  ;;  %v3478_v1 = vmul.f32 %v3474_v5, %v3374_v31 }
0x1e7a   :  { %v3465_v63 = vsub.f32 1.0, %v3461_v32 }
0x1e7b   :  { %v3475_v33 = vadd.f32 1.0, %v3471_v49  ;;  %v3476_v0 = vmul.f32 %v3472_v21, %v3372_v43 }
0x1e7c   :  { %v3469_v40 = vmul.f32 %v3465_v63, %v3385_v23 }
0x1e7d   :  { %v3479_v22 = vmul.f32 %v3475_v33, %v3375_v16 }
0x1e7e   :  { %v3473_v61 = vadd.f32 1.0, %v3469_v40 }
0x1e7f   :  { %v3497_v30 = vpack.c.bf16 %v3479_v22, %v3478_v1 }
0x1e80   :  { %v3477_v19 = vmul.f32 %v3473_v61, %v3373_v48 }
0x1e82   :  { %v3496_v52 = vpack.c.bf16 %v3477_v19, %v3476_v0 }
0x1e84   :  { %4215 = vmatprep.mubr.bf16.mxu0 %v3496_v52 }
0x1e85   :  { %4216 = vmatmul.mubr.bf16.vlgmr.msra.gmra.mxu0 %v3497_v30 }
0x1f45   :  { %v4217_v54 = vpop.f32.mrf.mxu0 }
0x1f46   :  { %v3590_v4 = vadd.f32 %v4217_v54, %v3498_v59 }
0x1f47   :  { %v3581_v11 = vpop.f32.mrf.mxu0 }
0x1f48   :  { %v5546_v62 = vadd.f32 %v3590_v4, %v5424_v44  ;;  %v3582_v6 = vadd.f32 %v3581_v11, %v3498_v59 }
0x1f49   :  { %v4218_v7 = vpop.f32.mrf.mxu0 }
0x1f4a   :  { %3603 = vst.msk [vmem:[#allocation4 + $0x30] sm:$0xff] %vm66_vm0, %v5546_v62  ;;  %v5551_v26 = vadd.f32 %v3582_v6, %v5427_v47  ;;  %v3593_v3 = vadd.f32 %v4218_v7, %v3498_v59  ;;  %v3611_v29 = vsel %vm66_vm0, %v5546_v62, 0.0  ;;  %v3623_v38 = vmul.f32 %v5546_v62, %v5546_v62 }
0x1f4b   :  { %3612 = vadd.xlane.f32.xlu0 %v3611_v29  ;;  %v3584_v9 = vpop.f32.mrf.mxu0 }
0x1f4c   :  { %3601 = vst.msk [vmem:[#allocation4 + $0x20] sm:$0xff] %vm66_vm0, %v5551_v26  ;;  %v5558_v44 = vadd.f32 %v3593_v3, %v5432_v57  ;;  %v3585_v12 = vadd.f32 %v3584_v9, %v3498_v59  ;;  %v3605_v24 = vsel %vm66_vm0, %v5551_v26, 0.0  ;;  %v3621_v25 = vmul.f32 %v5551_v26, %v5551_v26 }
0x1f4d   :  { %v3631_v2 = vsel %vm66_vm0, %v3623_v38, 0.0 }
0x1f4e   :  { %3604 = vst.msk [vmem:[#allocation4 + $0x38] sm:$0xff] %vm66_vm0, %v5558_v44  ;;  %v5563_v14 = vadd.f32 %v3585_v12, %v5435_v58  ;;  %v3614_v47 = vsel %vm66_vm0, %v5558_v44, 0.0  ;;  %v3625_v58 = vsel %vm66_vm0, %v3621_v25, 0.0  ;;  %v3624_v45 = vmul.f32 %v5558_v44, %v5558_v44 }
0x1f4f   :  { %3615 = vadd.xlane.f32.xlu1 %v3614_v47  ;;  %3606 = vadd.xlane.f32.xlu0 %v3605_v24 }
0x1f50   :  { %3602 = vst.msk [vmem:[#allocation4 + $0x28] sm:$0xff] %vm66_vm0, %v5563_v14  ;;  %v3608_v57 = vsel %vm66_vm0, %v5563_v14, 0.0  ;;  %v3622_v60 = vmul.f32 %v5563_v14, %v5563_v14  ;;  %v3634_v20 = vsel %vm66_vm0, %v3624_v45, 0.0 }
0x1f52   :  { %v3628_v35 = vsel %vm66_vm0, %v3622_v60, 0.0 }
0x1f53   :  { %3609 = vadd.xlane.f32.xlu1 %v3608_v57  ;;  %3626 = vadd.xlane.f32.xlu0 %v3625_v58 }
0x1f57   :  { %3629 = vadd.xlane.f32.xlu1 %v3628_v35  ;;  %3632 = vadd.xlane.f32.xlu0 %v3631_v2 }
0x1f5b   :  { %3635 = vadd.xlane.f32.xlu1 %v3634_v20 }
0x1f5c   :  { %4575 = shalt.err (!%p4572_p4)
}
0x1f5d   :  { %s4620_s22 = smov 128   ;;  %s4621_s23 = smov 8   ;;  %v3665_v48 = vld [vmem:[%s5613_s2 + $0x23] ss:$0 sm:$0xff]  ;;  %v3670_v31 = vld [vmem:[%s5613_s2 + $0x24] ss:$0 sm:$0xff] }
0x1f5e   :  { %3702 = dma.vmem_to_hbm [thread:$0]  %s3697_s20, 1024, %s5615_s4, [#allocation5], %s4620_s22, %s4620_s22, %s4621_s23  }
0x1f5f   :  { %s4622_s2 = smov [#allocation2]  }
0x1f60   :  { %s3684_s9 = sshll.u32 %s4622_s2, 4  ;;  %s3685_s9 = int_to_ptr.vmem [resolvable:$true] %s3684_s9 }
0x1f61   :  { %s4584_s10 = scalar_lea.vmem %s3685_s9, 512  ;;  %p4589_p6 = scmp.lt.s32.totalorder %s3685_s9, %s3685_s9 }
0x1f62   :  { %p4585_p5 = scmp.ne.s32.totalorder %s3685_s9, %s4584_s10  ;;  %p4590_p7 = scmp.lt.s32.totalorder %s4584_s10, %s4584_s10 }
0x1f64   :  { %p4591_p8 = por %p4590_p7, %p4589_p6 }
0x1f66   :  { %p4592_p9 = pnand %p4591_p8, %p4585_p5 }
0x1fd4   :  { %v3613_v13 = vpop.xlane.xlu0 %3612 }
0x1fd5   :  { %v3619_v17 = vmul.f32 0.015625, %v3613_v13 }
0x1fd7   :  { %v3643_v50 = vmul.f32 %v3619_v17, %v3619_v17  ;;  %v3651_v1 = vsub.f32 %v5546_v62, %v3619_v17 }
0x1fd8   :  { %v3616_v28 = vpop.xlane.xlu1 %3615  ;;  %v3607_v55 = vpop.xlane.xlu0 %3606 }
0x1fd9   :  { %v3617_v15 = vmul.f32 0.015625, %v3607_v55  ;;  %v3620_v41 = vmul.f32 0.015625, %v3616_v28 }
0x1fdb   :  { %v3641_v56 = vmul.f32 %v3617_v15, %v3617_v15  ;;  %v3644_v63 = vmul.f32 %v3620_v41, %v3620_v41  ;;  %v3649_v16 = vsub.f32 %v5551_v26, %v3617_v15  ;;  %v3652_v4 = vsub.f32 %v5558_v44, %v3620_v41 }
0x1fdc   :  { %v3610_v10 = vpop.xlane.xlu1 %3609  ;;  %v3627_v46 = vpop.xlane.xlu0 %3626 }
0x1fdd   :  { %v3618_v42 = vmul.f32 0.015625, %v3610_v10  ;;  %v3637_v37 = vmul.f32 0.015625, %v3627_v46 }
0x1fdf   :  { %v3645_v8 = vsub.f32 %v3637_v37, %v3641_v56  ;;  %v3642_v36 = vmul.f32 %v3618_v42, %v3618_v42  ;;  %v3650_v22 = vsub.f32 %v5563_v14, %v3618_v42 }
0x1fe0   :  { %v3630_v51 = vpop.xlane.xlu1 %3629  ;;  %v3633_v39 = vpop.xlane.xlu0 %3632 }
0x1fe1   :  { %v3653_v27 = vadd.f32 1e-05, %v3645_v8  ;;  %v3638_v53 = vmul.f32 0.015625, %v3630_v51  ;;  %v3639_v34 = vmul.f32 0.015625, %v3633_v39 }
0x1fe3   :  { %4556 = vrsqrt.f32 %v3653_v27  ;;  %v3646_v32 = vsub.f32 %v3638_v53, %v3642_v36  ;;  %v3647_v18 = vsub.f32 %v3639_v34, %v3643_v50 }
0x1fe4   :  { %v3636_v49 = vpop.xlane.xlu1 %3635 }
0x1fe5   :  { %v3654_v33 = vadd.f32 1e-05, %v3646_v32  ;;  %v3655_v23 = vadd.f32 1e-05, %v3647_v18  ;;  %v3640_v21 = vmul.f32 0.015625, %v3636_v49 }
0x1fe7   :  { %4558 = vrsqrt.f32 %v3654_v33  ;;  %v3648_v40 = vsub.f32 %v3640_v21, %v3644_v63 }
0x1fe8   :  { %4560 = vrsqrt.f32 %v3655_v23 }
0x1fe9   :  { %v3656_v5 = vadd.f32 1e-05, %v3648_v40 }
0x1feb   :  { %4562 = vrsqrt.f32 %v3656_v5 }
0x1ff0   :  { %v4557_v43 = vpop.eup %4556 }
0x1ff1   :  { %v3661_v61 = vmul.f32 %v4557_v43, %v3649_v16 }
0x1ff3   :  { %v3666_v0 = vmul.f32 %v3665_v48, %v3661_v61 }
0x1ff4   :  { %v4559_v19 = vpop.eup %4558 }
0x1ff5   :  { %v4561_v52 = vpop.eup %4560  ;;  %v3662_v30 = vmul.f32 %v4559_v19, %v3650_v22  ;;  %v3671_v59 = vadd.f32 %v3670_v31, %v3666_v0 }
0x1ff6   :  { %v3663_v54 = vmul.f32 %v4561_v52, %v3651_v1 }
0x1ff7   :  { %v3667_v11 = vmul.f32 %v3665_v48, %v3662_v30  ;;  %3675 = vst.msk [vmem:[#allocation2] sm:$0xff] %vm66_vm0, %v3671_v59 }
0x1ff8   :  { %v4563_v6 = vpop.eup %4562  ;;  %v3668_v7 = vmul.f32 %v3665_v48, %v3663_v54 }
0x1ff9   :  { %v3664_v26 = vmul.f32 %v4563_v6, %v3652_v4  ;;  %v3672_v3 = vadd.f32 %v3670_v31, %v3667_v11 }
0x1ffa   :  { %v3673_v29 = vadd.f32 %v3670_v31, %v3668_v7 }
0x1ffb   :  { %v3669_v9 = vmul.f32 %v3665_v48, %v3664_v26  ;;  %3676 = vst.msk [vmem:[#allocation2 + $0x8] sm:$0xff] %vm66_vm0, %v3672_v3 }
0x1ffc   :  { %3677 = vst.msk [vmem:[#allocation2 + $0x10] sm:$0xff] %vm66_vm0, %v3673_v29 }
0x1ffd   :  { %v3674_v62 = vadd.f32 %v3670_v31, %v3669_v9 }
0x1fff   :  { %3678 = vst.msk [vmem:[#allocation2 + $0x18] sm:$0xff] %vm66_vm0, %v3674_v62 }
0x2000   :  { %4595 = shalt.err (!%p4592_p9)
}
0x2001   :  { %3690 = dma.vmem_to_hbm [thread:$0]  %s3685_s9, 512, %s5614_s3, [#allocation3], %s4620_s22, %s4620_s22, %s4621_s23  }
0x2002   :  { %4604 = dma.done.wait [#allocation3], 512  }
0x2003   :  { %4605 = vsyncadd [#allocation3], 4294966784 }
0x2004   :  { %4606 = dma.done.wait [#allocation5], 1024  }
0x2005   :  { %4607 = vsyncadd [#allocation5], 4294966272 }
0x2006   :  { %3709 = vsyncpa [#allocation3], 1 }
0x2007   :  { %3710 = vsyncpa [#allocation5], 1 }

</bundles_post_ra>
